<compile_context>
chip_gen: v6e
topology: v6e:2x2x1
jax: 0.10.0
libtpu: 0.0.40
codegen_flags: <defaults>
</compile_context>

<pallas_src>
import numpy as np
import jax
import jax.numpy as jnp
from jax import lax
from jax.experimental import pallas as pl
from jax.experimental.pallas import tpu as pltpu


# --------------------------------------------------------------------------- #
# Pallas kernel: Bt batch images per grid step.
# --------------------------------------------------------------------------- #
def _ffmv1_kernel(x1_ref, x2_ref, w1_ref, w2_ref, b1_ref, b2_ref, o_ref, pad_ref):
    Bt, Hs, Ws, C2 = x2_ref.shape
    C1 = x1_ref.shape[-1]
    F = w1_ref.shape[1]
    F2 = w2_ref.shape[1]
    n_pix = Hs * Ws

    # ---- conv1: 1x1 conv == per-pixel matmul (BN scale pre-folded) + bias + ReLU.
    # x1 arrives phase-separated: row ((ph*2+pw)*Hs + i)*Ws + j == pixel (2i+ph, 2j+pw),
    # so the result can be stored straight into the output slab (lane-aligned slice).
    x1 = x1_ref[...].reshape(Bt * 4 * n_pix, C1)                     # fold Bt into M
    y1 = jnp.dot(x1, w1_ref[...], preferred_element_type=jnp.float32)
    y1 = jnp.maximum(y1 + b1_ref[...], 0.0)                          # (Bt*4*n_pix, F) f32
    o_ref[:, :, F2:F2 + F] = y1.reshape(Bt, 4 * n_pix, F).astype(o_ref.dtype)

    # ---- conv2: 3x3 "same" conv via a haloed VMEM scratch + ONE im2col matmul (K=9*C2).
    # Zero only the 1-pixel border each step (cheap, megacore-safe: every core/step sees a
    # valid halo), then write the interior.
    pad_ref[:, 0:1, :, :] = jnp.zeros((Bt, 1, Ws + 2, C2), pad_ref.dtype)
    pad_ref[:, Hs + 1:Hs + 2, :, :] = jnp.zeros((Bt, 1, Ws + 2, C2), pad_ref.dtype)
    pad_ref[:, :, 0:1, :] = jnp.zeros((Bt, Hs + 2, 1, C2), pad_ref.dtype)
    pad_ref[:, :, Ws + 1:Ws + 2, :] = jnp.zeros((Bt, Hs + 2, 1, C2), pad_ref.dtype)
    pad_ref[:, 1:Hs + 1, 1:Ws + 1, :] = x2_ref[...]

    # Horizontal im2col once (3 kw-shifted views), then 3 kh-shifted row windows, all
    # concatenated along the channel axis -> (Bt*n_pix, 9*C2) patch matrix.
    xw = jnp.concatenate([pad_ref[:, :, kw:kw + Ws, :] for kw in range(3)],
                         axis=-1)                                    # (Bt, Hs+2, Ws, 3*C2)
    patches = jnp.concatenate([xw[:, kh:kh + Hs] for kh in range(3)],
                              axis=-1)                               # (Bt, Hs, Ws, 9*C2)
    y2 = jnp.dot(patches.reshape(Bt * n_pix, 9 * C2), w2_ref[...],
                 preferred_element_type=jnp.float32)                 # single K=9*C2 matmul
    y2 = jnp.maximum(y2 + b2_ref[...], 0.0).reshape(Bt, Hs, Ws, F2)  # f32

    # ---- bilinear 2x upsample (align_corners=False): factored 0.25/0.75 VPU blend.
    # out[2i]   = 0.75*y[i] + 0.25*y[i-1]   (clamped at the border)
    # out[2i+1] = 0.75*y[i] + 0.25*y[i+1]
    q = 0.25 * y2
    r = y2 - q                                                       # 0.75*y2, shared
    up = jnp.concatenate([q[:, :1], q[:, :-1]], axis=1)              # q[i-1] (clamped)
    dn = jnp.concatenate([q[:, 1:], q[:, -1:]], axis=1)              # q[i+1] (clamped)
    rows = (r + up, r + dn)                                          # even / odd out rows
    for ph in range(2):
        t = rows[ph]                                                 # (Bt, Hs, Ws, F2)
        qc = 0.25 * t
        rc = t - qc
        lf = jnp.concatenate([qc[:, :, :1], qc[:, :, :-1]], axis=2)  # q[j-1] (clamped)
        rt = jnp.concatenate([qc[:, :, 1:], qc[:, :, -1:]], axis=2)  # q[j+1] (clamped)
        cols = (rc + lf, rc + rt)                                    # even / odd out cols
        for pw in range(2):
            p = ph * 2 + pw
            o_ref[:, p * n_pix:(p + 1) * n_pix, 0:F2] = (
                cols[pw].reshape(Bt, n_pix, F2).astype(o_ref.dtype))


# --------------------------------------------------------------------------- #
# Host-side wrapper (layout glue + BN folding).
# --------------------------------------------------------------------------- #
@jax.jit
def ffmv1_forward(x1_nchw, x2_nchw, w1_oihw, w2_oihw, s1, b1, s2, b2):
    N, C1, H, W = x1_nchw.shape
    _, C2, Hs, Ws = x2_nchw.shape
    F = w1_oihw.shape[0]
    F2 = w2_oihw.shape[0]
    Cout = F2 + F
    assert H == 2 * Hs and W == 2 * Ws, "FFMv1 kernel assumes an exact 2x upsample"
    assert F % 128 == 0 and F2 % 128 == 0, (
        "f_channels must be a multiple of 128 so channel-sliced stores stay unmasked "
        "lane-aligned vst (otherwise they degrade to masked partial stores)")

    # Fold Bt batch images into one grid step (larger matmul M; fewer grid steps).
    bt = 2 if (N >= 2 and N % 2 == 0) else 1
    assert N % bt == 0

    # Fold BN scale into the conv weights; cast matmul operands to bf16.
    w1_k = (jnp.transpose(w1_oihw[:, :, 0, 0], (1, 0)) *
            s1[None, :]).astype(jnp.bfloat16)                        # (C1, F)
    w2_k = (jnp.transpose(w2_oihw, (2, 3, 1, 0)) *                   # (kh, kw, C2, F2)
            s2[None, None, None, :]).reshape(9 * C2, F2).astype(jnp.bfloat16)
    b1_k = b1.reshape(1, F).astype(jnp.float32)
    b2_k = b2.reshape(1, F2).astype(jnp.float32)

    # TODO(synk): these relayouts are wrapper-side HBM passes; remove them in production
    # by adopting channels-last activations at the module boundary.
    # x1: NCHW -> phase-separated channels-last, flattened to (N, 4*Hs*Ws, C1).
    x1_ph = jnp.transpose(x1_nchw.reshape(N, C1, Hs, 2, Ws, 2),
                          (0, 3, 5, 2, 4, 1)).reshape(N, 4 * Hs * Ws, C1)
    x1_ph = x1_ph.astype(jnp.bfloat16)
    # x2: NCHW -> NHWC (unpadded; the 1-pixel halo is built in the VMEM scratch).
    x2_nhwc = jnp.transpose(x2_nchw, (0, 2, 3, 1)).astype(jnp.bfloat16)

    const = dict(pipeline_mode=pl.Buffered(1))   # constants: no double-buffer VMEM
    out_flat = pl.pallas_call(
        _ffmv1_kernel,
        out_shape=jax.ShapeDtypeStruct((N, 4 * Hs * Ws, Cout), jnp.bfloat16),
        grid_spec=pltpu.PrefetchScalarGridSpec(
            num_scalar_prefetch=0,
            grid=(N // bt,),
            in_specs=[
                pl.BlockSpec((bt, 4 * Hs * Ws, C1), lambda n: (n, 0, 0)),
                pl.BlockSpec((bt, Hs, Ws, C2), lambda n: (n, 0, 0, 0)),
                pl.BlockSpec((C1, F), lambda n: (0, 0), **const),
                pl.BlockSpec((9 * C2, F2), lambda n: (0, 0), **const),
                pl.BlockSpec((1, F), lambda n: (0, 0), **const),
                pl.BlockSpec((1, F2), lambda n: (0, 0), **const),
            ],
            out_specs=pl.BlockSpec((bt, 4 * Hs * Ws, Cout), lambda n: (n, 0, 0)),
            scratch_shapes=[pltpu.VMEM((bt, Hs + 2, Ws + 2, C2), jnp.bfloat16)],
        ),
        compiler_params=pltpu.CompilerParams(
            dimension_semantics=("parallel",)),
    )(x1_ph, x2_nhwc, w1_k, w2_k, b1_k, b2_k)

    # Undo the phase layout and go back to NCHW in a single fused (bf16) transpose.
    out = out_flat.reshape(N, 2, 2, Hs, Ws, Cout)
    out = jnp.transpose(out, (0, 5, 3, 1, 4, 2)).reshape(N, Cout, H, W)
    return out                                                       # bf16


# --------------------------------------------------------------------------- #
# Pure-JAX reference (independent implementation) for verification.
# --------------------------------------------------------------------------- #
def ffmv1_reference(x1, x2, w1_oihw, w2_oihw, s1, b1, s2, b2):
    y1 = lax.conv_general_dilated(x1, w1_oihw, (1, 1), 'VALID',
                                  dimension_numbers=('NCHW', 'OIHW', 'NCHW'))
    y1 = jnp.maximum(y1 * s1[None, :, None, None] + b1[None, :, None, None], 0.0)
    y2 = lax.conv_general_dilated(x2, w2_oihw, (1, 1), ((1, 1), (1, 1)),
                                  dimension_numbers=('NCHW', 'OIHW', 'NCHW'))
    y2 = jnp.maximum(y2 * s2[None, :, None, None] + b2[None, :, None, None], 0.0)

    H, W = x1.shape[2], x1.shape[3]
    _, _, Hs, Ws = y2.shape

    def up_axis(a, axis, out_size, in_size):
        o = np.arange(out_size)
        s = (o + 0.5) * in_size / out_size - 0.5
        s0 = np.floor(s)
        frac = (s - s0).astype(np.float32)
        i0 = np.clip(s0, 0, in_size - 1).astype(np.int32)
        i1 = np.clip(s0 + 1, 0, in_size - 1).astype(np.int32)
        a0 = jnp.take(a, i0, axis=axis)
        a1 = jnp.take(a, i1, axis=axis)
        shp = [1] * a.ndim
        shp[axis] = out_size
        frac = jnp.asarray(frac).reshape(shp)
        return a0 * (1.0 - frac) + a1 * frac

    y2u = up_axis(y2, 2, H, Hs)
    y2u = up_axis(y2u, 3, W, Ws)
    return jnp.concatenate([y2u, y1], axis=1)


# --------------------------------------------------------------------------- #
if __name__ == "__main__":
    key = jax.random.PRNGKey(0)
    ks = jax.random.split(key, 10)

    N, H, W = 2, 16, 16
    C1, C2 = 16, 32          # in_channels_list = [16, 32]
    F = 128                  # f_channels (so F2=256 and Cout=384 are lane-aligned)
    F2 = 2 * F
    Hs, Ws = H // 2, W // 2

    x1 = jax.random.normal(ks[0], (N, C1, H, W), jnp.float32)
    x2 = jax.random.normal(ks[1], (N, C2, Hs, Ws), jnp.float32)

    # Conv weights (no conv bias: horch Conv2d with a norm layer uses bias=False).
    w1_oihw = 0.2 * jax.random.normal(ks[2], (F, C1, 1, 1), jnp.float32)
    w2_oihw = 0.1 * jax.random.normal(ks[3], (F2, C2, 3, 3), jnp.float32)

    # BatchNorm (inference mode), folded into per-channel scale/shift.
    eps = 1e-5
    g1 = 1.0 + 0.1 * jax.random.normal(ks[4], (F,), jnp.float32)
    be1 = 0.1 * jax.random.normal(ks[5], (F,), jnp.float32)
    rm1 = 0.1 * jax.random.normal(ks[6], (F,), jnp.float32)
    rv1 = 1.0 + 0.1 * jnp.abs(jax.random.normal(ks[7], (F,), jnp.float32))
    g2 = 1.0 + 0.1 * jax.random.normal(ks[8], (F2,), jnp.float32)
    be2 = 0.1 * jax.random.normal(ks[9], (F2,), jnp.float32)
    rm2 = jnp.zeros((F2,), jnp.float32)
    rv2 = jnp.ones((F2,), jnp.float32)

    s1 = g1 / jnp.sqrt(rv1 + eps)
    b1 = be1 - rm1 * s1
    s2 = g2 / jnp.sqrt(rv2 + eps)
    b2 = be2 - rm2 * s2

    out = jax.block_until_ready(
        ffmv1_forward(x1, x2, w1_oihw, w2_oihw, s1, b1, s2, b2))
    ref = jax.block_until_ready(
        ffmv1_reference(x1, x2, w1_oihw, w2_oihw, s1, b1, s2, b2))

    assert out.shape == (N, F2 + F, H, W), out.shape
    assert out.dtype == jnp.bfloat16, out.dtype
    # bf16 matmul operands + bf16 output (f32 accumulation) -> bf16-level tolerance.
    out_f32 = out.astype(jnp.float32)
    if not jnp.allclose(out_f32, ref, atol=7.5e-2, rtol=7.5e-2):
        max_err = float(jnp.max(jnp.abs(out_f32 - ref)))
        raise AssertionError(f"mismatch vs reference, max abs err = {max_err}")

    print("KERNEL_OK")
</pallas_src>

<mosaic_0001>
module attributes {stable_mosaic.version = 11 : i64} {
  func.func @_ffmv1_kernel(%arg0: i32, %arg1: memref<2x256x16xbf16, #tpu.memory_space<vmem>>, %arg2: memref<2x8x8x32xbf16, #tpu.memory_space<vmem>>, %arg3: memref<16x128xbf16, #tpu.memory_space<vmem>>, %arg4: memref<288x256xbf16, #tpu.memory_space<vmem>>, %arg5: memref<1x128xf32, #tpu.memory_space<vmem>>, %arg6: memref<1x256xf32, #tpu.memory_space<vmem>>, %arg7: memref<2x256x384xbf16, #tpu.memory_space<vmem>>, %arg8: memref<2x10x10x32xbf16, #tpu.memory_space<vmem>>) attributes {dimension_semantics = [#tpu.dimension_semantics<parallel>], iteration_bounds = array<i64: 1>, scalar_prefetch = 0 : i64, scratch_operands = 1 : i64, tpu.core_type = #tpu.core_type<tc>, window_params = [{transform_indices = @transform_0, window_bounds = array<i64: 2, 256, 16>}, {transform_indices = @transform_1, window_bounds = array<i64: 2, 8, 8, 32>}, {pipeline_mode = #tpu.pipeline_mode<synchronous>, transform_indices = @transform_2, window_bounds = array<i64: 16, 128>}, {pipeline_mode = #tpu.pipeline_mode<synchronous>, transform_indices = @transform_3, window_bounds = array<i64: 288, 256>}, {pipeline_mode = #tpu.pipeline_mode<synchronous>, transform_indices = @transform_4, window_bounds = array<i64: 1, 128>}, {pipeline_mode = #tpu.pipeline_mode<synchronous>, transform_indices = @transform_5, window_bounds = array<i64: 1, 256>}, {transform_indices = @transform_6, window_bounds = array<i64: 2, 256, 384>}]} {
    %c0 = arith.constant 0 : index
    %c0_0 = arith.constant 0 : index
    %c0_1 = arith.constant 0 : index
    %0 = vector.load %arg1[%c0, %c0_0, %c0_1] : memref<2x256x16xbf16, #tpu.memory_space<vmem>>, vector<2x256x16xbf16>
    %1 = vector.shape_cast %0 : vector<2x256x16xbf16> to vector<512x16xbf16>
    %c0_2 = arith.constant 0 : index
    %c0_3 = arith.constant 0 : index
    %2 = vector.load %arg3[%c0_2, %c0_3] : memref<16x128xbf16, #tpu.memory_space<vmem>>, vector<16x128xbf16>
    %cst = arith.constant dense<0.000000e+00> : vector<512x128xf32>
    %3 = tpu.matmul %1, %2, %cst {dimension_numbers = #tpu.dot_dimension_numbers<[1], [0], [0], [1], [0, 0, 1, 1], [], []>} : vector<512x16xbf16>, vector<16x128xbf16>, vector<512x128xf32> -> vector<512x128xf32>
    %c0_4 = arith.constant 0 : index
    %c0_5 = arith.constant 0 : index
    %4 = vector.load %arg5[%c0_4, %c0_5] : memref<1x128xf32, #tpu.memory_space<vmem>>, vector<1x128xf32>
    %5 = vector.broadcast %4 : vector<1x128xf32> to vector<512x128xf32>
    %6 = arith.addf %3, %5 : vector<512x128xf32>
    %cst_6 = arith.constant 0.000000e+00 : f32
    %7 = vector.broadcast %cst_6 : f32 to vector<512x128xf32>
    %8 = arith.maximumf %6, %7 : vector<512x128xf32>
    %9 = vector.shape_cast %8 : vector<512x128xf32> to vector<2x256x128xf32>
    %10 = arith.truncf %9 : vector<2x256x128xf32> to vector<2x256x128xbf16>
    %c0_7 = arith.constant 0 : index
    %c0_8 = arith.constant 0 : index
    %c256 = arith.constant 256 : index
    %11 = vector.load %arg7[%c0_7, %c0_8, %c256] : memref<2x256x384xbf16, #tpu.memory_space<vmem>>, vector<2x256x128xbf16>
    tpu.vector_store %arg7[%c0_7, %c0_8, %c256], %10 {strides = array<i32>} : memref<2x256x384xbf16, #tpu.memory_space<vmem>>, vector<2x256x128xbf16>,
    %cst_9 = arith.constant 0.000000e+00 : bf16
    %12 = vector.broadcast %cst_9 : bf16 to vector<2x1x10x32xbf16>
    %c0_10 = arith.constant 0 : index
    %c0_11 = arith.constant 0 : index
    %c0_12 = arith.constant 0 : index
    %c0_13 = arith.constant 0 : index
    %13 = vector.load %arg8[%c0_10, %c0_11, %c0_12, %c0_13] : memref<2x10x10x32xbf16, #tpu.memory_space<vmem>>, vector<2x1x10x32xbf16>
    tpu.vector_store %arg8[%c0_10, %c0_11, %c0_12, %c0_13], %12 {strides = array<i32>} : memref<2x10x10x32xbf16, #tpu.memory_space<vmem>>, vector<2x1x10x32xbf16>,
    %cst_14 = arith.constant 0.000000e+00 : bf16
    %14 = vector.broadcast %cst_14 : bf16 to vector<2x1x10x32xbf16>
    %c0_15 = arith.constant 0 : index
    %c9 = arith.constant 9 : index
    %c0_16 = arith.constant 0 : index
    %c0_17 = arith.constant 0 : index
    %15 = vector.load %arg8[%c0_15, %c9, %c0_16, %c0_17] : memref<2x10x10x32xbf16, #tpu.memory_space<vmem>>, vector<2x1x10x32xbf16>
    tpu.vector_store %arg8[%c0_15, %c9, %c0_16, %c0_17], %14 {strides = array<i32>} : memref<2x10x10x32xbf16, #tpu.memory_space<vmem>>, vector<2x1x10x32xbf16>,
    %cst_18 = arith.constant 0.000000e+00 : bf16
    %16 = vector.broadcast %cst_18 : bf16 to vector<2x10x1x32xbf16>
    %c0_19 = arith.constant 0 : index
    %c0_20 = arith.constant 0 : index
    %c0_21 = arith.constant 0 : index
    %c0_22 = arith.constant 0 : index
    %17 = vector.load %arg8[%c0_19, %c0_20, %c0_21, %c0_22] : memref<2x10x10x32xbf16, #tpu.memory_space<vmem>>, vector<2x10x1x32xbf16>
    tpu.vector_store %arg8[%c0_19, %c0_20, %c0_21, %c0_22], %16 {strides = array<i32>} : memref<2x10x10x32xbf16, #tpu.memory_space<vmem>>, vector<2x10x1x32xbf16>,
    %cst_23 = arith.constant 0.000000e+00 : bf16
    %18 = vector.broadcast %cst_23 : bf16 to vector<2x10x1x32xbf16>
    %c0_24 = arith.constant 0 : index
    %c0_25 = arith.constant 0 : index
    %c9_26 = arith.constant 9 : index
    %c0_27 = arith.constant 0 : index
    %19 = vector.load %arg8[%c0_24, %c0_25, %c9_26, %c0_27] : memref<2x10x10x32xbf16, #tpu.memory_space<vmem>>, vector<2x10x1x32xbf16>
    tpu.vector_store %arg8[%c0_24, %c0_25, %c9_26, %c0_27], %18 {strides = array<i32>} : memref<2x10x10x32xbf16, #tpu.memory_space<vmem>>, vector<2x10x1x32xbf16>,
    %c0_28 = arith.constant 0 : index
    %c0_29 = arith.constant 0 : index
    %c0_30 = arith.constant 0 : index
    %c0_31 = arith.constant 0 : index
    %20 = vector.load %arg2[%c0_28, %c0_29, %c0_30, %c0_31] : memref<2x8x8x32xbf16, #tpu.memory_space<vmem>>, vector<2x8x8x32xbf16>
    %c0_32 = arith.constant 0 : index
    %c1 = arith.constant 1 : index
    %c1_33 = arith.constant 1 : index
    %c0_34 = arith.constant 0 : index
    %21 = vector.load %arg8[%c0_32, %c1, %c1_33, %c0_34] : memref<2x10x10x32xbf16, #tpu.memory_space<vmem>>, vector<2x8x8x32xbf16>
    tpu.vector_store %arg8[%c0_32, %c1, %c1_33, %c0_34], %20 {strides = array<i32>} : memref<2x10x10x32xbf16, #tpu.memory_space<vmem>>, vector<2x8x8x32xbf16>,
    %c0_35 = arith.constant 0 : index
    %c0_36 = arith.constant 0 : index
    %c0_37 = arith.constant 0 : index
    %c0_38 = arith.constant 0 : index
    %22 = vector.load %arg8[%c0_35, %c0_36, %c0_37, %c0_38] : memref<2x10x10x32xbf16, #tpu.memory_space<vmem>>, vector<2x10x8x32xbf16>
    %c0_39 = arith.constant 0 : index
    %c0_40 = arith.constant 0 : index
    %c1_41 = arith.constant 1 : index
    %c0_42 = arith.constant 0 : index
    %23 = vector.load %arg8[%c0_39, %c0_40, %c1_41, %c0_42] : memref<2x10x10x32xbf16, #tpu.memory_space<vmem>>, vector<2x10x8x32xbf16>
    %c0_43 = arith.constant 0 : index
    %c0_44 = arith.constant 0 : index
    %c2 = arith.constant 2 : index
    %c0_45 = arith.constant 0 : index
    %24 = vector.load %arg8[%c0_43, %c0_44, %c2, %c0_45] : memref<2x10x10x32xbf16, #tpu.memory_space<vmem>>, vector<2x10x8x32xbf16>
    %25 = tpu.concatenate %22, %23, %24 in 3 : vector<2x10x8x32xbf16>, vector<2x10x8x32xbf16>, vector<2x10x8x32xbf16> -> vector<2x10x8x96xbf16>
    %26 = vector.extract_strided_slice %25 {offsets = [0, 0, 0, 0], sizes = [2, 8, 8, 96], strides = [1, 1, 1, 1]} : vector<2x10x8x96xbf16> to vector<2x8x8x96xbf16>
    %27 = vector.extract_strided_slice %25 {offsets = [0, 1, 0, 0], sizes = [2, 8, 8, 96], strides = [1, 1, 1, 1]} : vector<2x10x8x96xbf16> to vector<2x8x8x96xbf16>
    %28 = vector.extract_strided_slice %25 {offsets = [0, 2, 0, 0], sizes = [2, 8, 8, 96], strides = [1, 1, 1, 1]} : vector<2x10x8x96xbf16> to vector<2x8x8x96xbf16>
    %29 = tpu.concatenate %26, %27, %28 in 3 : vector<2x8x8x96xbf16>, vector<2x8x8x96xbf16>, vector<2x8x8x96xbf16> -> vector<2x8x8x288xbf16>
    %30 = vector.shape_cast %29 : vector<2x8x8x288xbf16> to vector<128x288xbf16>
    %c0_46 = arith.constant 0 : index
    %c0_47 = arith.constant 0 : index
    %31 = vector.load %arg4[%c0_46, %c0_47] : memref<288x256xbf16, #tpu.memory_space<vmem>>, vector<288x256xbf16>
    %cst_48 = arith.constant dense<0.000000e+00> : vector<128x256xf32>
    %32 = tpu.matmul %30, %31, %cst_48 {dimension_numbers = #tpu.dot_dimension_numbers<[1], [0], [0], [1], [0, 0, 1, 1], [], []>} : vector<128x288xbf16>, vector<288x256xbf16>, vector<128x256xf32> -> vector<128x256xf32>
    %c0_49 = arith.constant 0 : index
    %c0_50 = arith.constant 0 : index
    %33 = vector.load %arg6[%c0_49, %c0_50] : memref<1x256xf32, #tpu.memory_space<vmem>>, vector<1x256xf32>
    %34 = vector.broadcast %33 : vector<1x256xf32> to vector<128x256xf32>
    %35 = arith.addf %32, %34 : vector<128x256xf32>
    %cst_51 = arith.constant 0.000000e+00 : f32
    %36 = vector.broadcast %cst_51 : f32 to vector<128x256xf32>
    %37 = arith.maximumf %35, %36 : vector<128x256xf32>
    %38 = vector.shape_cast %37 : vector<128x256xf32> to vector<2x8x8x256xf32>
    %cst_52 = arith.constant 2.500000e-01 : f32
    %39 = vector.broadcast %cst_52 : f32 to vector<2x8x8x256xf32>
    %40 = arith.mulf %39, %38 : vector<2x8x8x256xf32>
    %41 = arith.subf %38, %40 : vector<2x8x8x256xf32>
    %42 = vector.extract_strided_slice %40 {offsets = [0, 0, 0, 0], sizes = [2, 1, 8, 256], strides = [1, 1, 1, 1]} : vector<2x8x8x256xf32> to vector<2x1x8x256xf32>
    %43 = vector.extract_strided_slice %40 {offsets = [0, 0, 0, 0], sizes = [2, 7, 8, 256], strides = [1, 1, 1, 1]} : vector<2x8x8x256xf32> to vector<2x7x8x256xf32>
    %44 = tpu.concatenate %42, %43 in 1 : vector<2x1x8x256xf32>, vector<2x7x8x256xf32> -> vector<2x8x8x256xf32>
    %45 = vector.extract_strided_slice %40 {offsets = [0, 1, 0, 0], sizes = [2, 7, 8, 256], strides = [1, 1, 1, 1]} : vector<2x8x8x256xf32> to vector<2x7x8x256xf32>
    %46 = vector.extract_strided_slice %40 {offsets = [0, 7, 0, 0], sizes = [2, 1, 8, 256], strides = [1, 1, 1, 1]} : vector<2x8x8x256xf32> to vector<2x1x8x256xf32>
    %47 = tpu.concatenate %45, %46 in 1 : vector<2x7x8x256xf32>, vector<2x1x8x256xf32> -> vector<2x8x8x256xf32>
    %48 = arith.addf %41, %44 : vector<2x8x8x256xf32>
    %49 = arith.addf %41, %47 : vector<2x8x8x256xf32>
    %cst_53 = arith.constant 2.500000e-01 : f32
    %50 = vector.broadcast %cst_53 : f32 to vector<2x8x8x256xf32>
    %51 = arith.mulf %50, %48 : vector<2x8x8x256xf32>
    %52 = arith.subf %48, %51 : vector<2x8x8x256xf32>
    %53 = vector.extract_strided_slice %51 {offsets = [0, 0, 0, 0], sizes = [2, 8, 1, 256], strides = [1, 1, 1, 1]} : vector<2x8x8x256xf32> to vector<2x8x1x256xf32>
    %54 = vector.extract_strided_slice %51 {offsets = [0, 0, 0, 0], sizes = [2, 8, 7, 256], strides = [1, 1, 1, 1]} : vector<2x8x8x256xf32> to vector<2x8x7x256xf32>
    %55 = tpu.concatenate %53, %54 in 2 : vector<2x8x1x256xf32>, vector<2x8x7x256xf32> -> vector<2x8x8x256xf32>
    %56 = vector.extract_strided_slice %51 {offsets = [0, 0, 1, 0], sizes = [2, 8, 7, 256], strides = [1, 1, 1, 1]} : vector<2x8x8x256xf32> to vector<2x8x7x256xf32>
    %57 = vector.extract_strided_slice %51 {offsets = [0, 0, 7, 0], sizes = [2, 8, 1, 256], strides = [1, 1, 1, 1]} : vector<2x8x8x256xf32> to vector<2x8x1x256xf32>
    %58 = tpu.concatenate %56, %57 in 2 : vector<2x8x7x256xf32>, vector<2x8x1x256xf32> -> vector<2x8x8x256xf32>
    %59 = arith.addf %52, %55 : vector<2x8x8x256xf32>
    %60 = arith.addf %52, %58 : vector<2x8x8x256xf32>
    %61 = vector.shape_cast %59 : vector<2x8x8x256xf32> to vector<2x64x256xf32>
    %62 = arith.truncf %61 : vector<2x64x256xf32> to vector<2x64x256xbf16>
    %c0_54 = arith.constant 0 : index
    %c0_55 = arith.constant 0 : index
    %c0_56 = arith.constant 0 : index
    %63 = vector.load %arg7[%c0_54, %c0_55, %c0_56] : memref<2x256x384xbf16, #tpu.memory_space<vmem>>, vector<2x64x256xbf16>
    tpu.vector_store %arg7[%c0_54, %c0_55, %c0_56], %62 {strides = array<i32>} : memref<2x256x384xbf16, #tpu.memory_space<vmem>>, vector<2x64x256xbf16>,
    %64 = vector.shape_cast %60 : vector<2x8x8x256xf32> to vector<2x64x256xf32>
    %65 = arith.truncf %64 : vector<2x64x256xf32> to vector<2x64x256xbf16>
    %c0_57 = arith.constant 0 : index
    %c64 = arith.constant 64 : index
    %c0_58 = arith.constant 0 : index
    %66 = vector.load %arg7[%c0_57, %c64, %c0_58] : memref<2x256x384xbf16, #tpu.memory_space<vmem>>, vector<2x64x256xbf16>
    tpu.vector_store %arg7[%c0_57, %c64, %c0_58], %65 {strides = array<i32>} : memref<2x256x384xbf16, #tpu.memory_space<vmem>>, vector<2x64x256xbf16>,
    %cst_59 = arith.constant 2.500000e-01 : f32
    %67 = vector.broadcast %cst_59 : f32 to vector<2x8x8x256xf32>
    %68 = arith.mulf %67, %49 : vector<2x8x8x256xf32>
    %69 = arith.subf %49, %68 : vector<2x8x8x256xf32>
    %70 = vector.extract_strided_slice %68 {offsets = [0, 0, 0, 0], sizes = [2, 8, 1, 256], strides = [1, 1, 1, 1]} : vector<2x8x8x256xf32> to vector<2x8x1x256xf32>
    %71 = vector.extract_strided_slice %68 {offsets = [0, 0, 0, 0], sizes = [2, 8, 7, 256], strides = [1, 1, 1, 1]} : vector<2x8x8x256xf32> to vector<2x8x7x256xf32>
    %72 = tpu.concatenate %70, %71 in 2 : vector<2x8x1x256xf32>, vector<2x8x7x256xf32> -> vector<2x8x8x256xf32>
    %73 = vector.extract_strided_slice %68 {offsets = [0, 0, 1, 0], sizes = [2, 8, 7, 256], strides = [1, 1, 1, 1]} : vector<2x8x8x256xf32> to vector<2x8x7x256xf32>
    %74 = vector.extract_strided_slice %68 {offsets = [0, 0, 7, 0], sizes = [2, 8, 1, 256], strides = [1, 1, 1, 1]} : vector<2x8x8x256xf32> to vector<2x8x1x256xf32>
    %75 = tpu.concatenate %73, %74 in 2 : vector<2x8x7x256xf32>, vector<2x8x1x256xf32> -> vector<2x8x8x256xf32>
    %76 = arith.addf %69, %72 : vector<2x8x8x256xf32>
    %77 = arith.addf %69, %75 : vector<2x8x8x256xf32>
    %78 = vector.shape_cast %76 : vector<2x8x8x256xf32> to vector<2x64x256xf32>
    %79 = arith.truncf %78 : vector<2x64x256xf32> to vector<2x64x256xbf16>
    %c0_60 = arith.constant 0 : index
    %c128 = arith.constant 128 : index
    %c0_61 = arith.constant 0 : index
    %80 = vector.load %arg7[%c0_60, %c128, %c0_61] : memref<2x256x384xbf16, #tpu.memory_space<vmem>>, vector<2x64x256xbf16>
    tpu.vector_store %arg7[%c0_60, %c128, %c0_61], %79 {strides = array<i32>} : memref<2x256x384xbf16, #tpu.memory_space<vmem>>, vector<2x64x256xbf16>,
    %81 = vector.shape_cast %77 : vector<2x8x8x256xf32> to vector<2x64x256xf32>
    %82 = arith.truncf %81 : vector<2x64x256xf32> to vector<2x64x256xbf16>
    %c0_62 = arith.constant 0 : index
    %c192 = arith.constant 192 : index
    %c0_63 = arith.constant 0 : index
    %83 = vector.load %arg7[%c0_62, %c192, %c0_63] : memref<2x256x384xbf16, #tpu.memory_space<vmem>>, vector<2x64x256xbf16>
    tpu.vector_store %arg7[%c0_62, %c192, %c0_63], %82 {strides = array<i32>} : memref<2x256x384xbf16, #tpu.memory_space<vmem>>, vector<2x64x256xbf16>,
    return
  }
  func.func @transform_0(%arg0: i32) -> (i32, i32, i32) {
    %c0_i32 = arith.constant 0 : i32
    %c0_i32_0 = arith.constant 0 : i32
    %c0_i32_1 = arith.constant 0 : i32
    return %arg0, %c0_i32, %c0_i32_0 : i32, i32, i32
  }
  func.func @transform_1(%arg0: i32) -> (i32, i32, i32, i32) {
    %c0_i32 = arith.constant 0 : i32
    %c0_i32_0 = arith.constant 0 : i32
    %c0_i32_1 = arith.constant 0 : i32
    %c0_i32_2 = arith.constant 0 : i32
    return %arg0, %c0_i32, %c0_i32_0, %c0_i32_1 : i32, i32, i32, i32
  }
  func.func @transform_2(%arg0: i32) -> (i32, i32) {
    %c0_i32 = arith.constant 0 : i32
    %c0_i32_0 = arith.constant 0 : i32
    %c0_i32_1 = arith.constant 0 : i32
    return %c0_i32, %c0_i32_0 : i32, i32
  }
  func.func @transform_3(%arg0: i32) -> (i32, i32) {
    %c0_i32 = arith.constant 0 : i32
    %c0_i32_0 = arith.constant 0 : i32
    %c0_i32_1 = arith.constant 0 : i32
    return %c0_i32, %c0_i32_0 : i32, i32
  }
  func.func @transform_4(%arg0: i32) -> (i32, i32) {
    %c0_i32 = arith.constant 0 : i32
    %c0_i32_0 = arith.constant 0 : i32
    %c0_i32_1 = arith.constant 0 : i32
    return %c0_i32, %c0_i32_0 : i32, i32
  }
  func.func @transform_5(%arg0: i32) -> (i32, i32) {
    %c0_i32 = arith.constant 0 : i32
    %c0_i32_0 = arith.constant 0 : i32
    %c0_i32_1 = arith.constant 0 : i32
    return %c0_i32, %c0_i32_0 : i32, i32
  }
  func.func @transform_6(%arg0: i32) -> (i32, i32, i32) {
    %c0_i32 = arith.constant 0 : i32
    %c0_i32_0 = arith.constant 0 : i32
    %c0_i32_1 = arith.constant 0 : i32
    return %arg0, %c0_i32, %c0_i32_0 : i32, i32, i32
  }
}

</mosaic_0001>

<bundles_post_ra>
// kernel: ffmv1_forward.1
= control target key start
LH: loop header
LB: loop body
LE: loop exit
PB: predicated region body
PF: predicated region fallthrough
CT: control target
= control target key end

     0   :  { %vm1033_vm0 = vcmask 257024   ;;  %vm1035_vm1 = vcmask 253952   ;;  %vm1045_vm2 = vsmask.f32 256  ;;  %v4772_v0 = vmov 0   ;;  %s4773_s9 = smov 64   ;;  %s6742_s1 = inlined_call_operand.vmem [shape: bf16[2,8,8,32], index: 1, kind: input, shape index: {}]   ;;  %s6743_s2 = inlined_call_operand.vmem [shape: bf16[16,128], index: 2, kind: input, shape index: {}]   ;;  %s6744_s0 = inlined_call_operand.vmem [shape: bf16[2,256,16], index: 0, kind: input, shape index: {}]   ;;  %s6745_s3 = inlined_call_operand.vmem [shape: bf16[288,256], index: 3, kind: input, shape index: {}]   ;;  %s6746_s4 = inlined_call_operand.vmem [shape: f32[1,128], index: 4, kind: input, shape index: {}]   ;;  %s6747_s6 = inlined_call_operand.vmem [shape: bf16[2,256,384], index: 6, kind: output, shape index: {}]   ;;  %s6748_s5 = inlined_call_operand.vmem [shape: f32[1,256], index: 5, kind: input, shape index: {}]  }
   0x1   :  { %1040 = vst.msk [vmem:[#allocation2 + $0x48] sm:$0xf] %vm1033_vm0, %v4772_v0  ;;  %vm4816_vm3 = vmand %vm1035_vm1, %vm1045_vm2  ;;  %vm1107_vm4 = vsmask.f32 7938  ;;  %v1071_v2 = vld [vmem:[#allocation2 + $0x40] sm:$0x1] }
   0x2   :  { %1041 = vst.msk [vmem:[#allocation2 + $0x4c] sm:$0x1] %vm1035_vm1, %v4772_v0  ;;  %1036 = vst.msk [vmem:[#allocation2 + $0x4] sm:$0x1] %vm1035_vm1, %v4772_v0  ;;  %v1133_v3 = vld [vmem:[#allocation2 + $0x44] sm:$0x1] }
   0x3   :  { %1034 = vst.msk [vmem:[#allocation2] sm:$0xf] %vm1033_vm0, %v4772_v0  ;;  %1037 = vst.msk [vmem:[#allocation2 + $0x50] sm:$0xf] %vm1033_vm0, %v4772_v0  ;;  %v1072_v5 = vsel %vm4816_vm3, 0, %v1071_v2  ;;  %s4774_s18 = smov 32  }
   0x4   :  { %1038 = vst.msk [vmem:[#allocation2 + $0x54] sm:$0x1] %vm1035_vm1, %v4772_v0  ;;  %1043 = vst.msk [vmem:[#allocation2 + $0x9c] sm:$0x1] %vm1035_vm1, %v4772_v0  ;;  %v1176_v6 = vld [vmem:[%s6742_s1 + $0x1c] sm:$0xf] }
   0x5   :  { %1042 = vst.msk [vmem:[#allocation2 + $0x98] sm:$0xf] %vm1033_vm0, %v4772_v0  ;;  %vm4834_vm5 = vmand %vm1035_vm1, %vm1107_vm4  ;;  %v1068_v7 = vld [vmem:[#allocation2 + $0x38] sm:$0x1]  ;;  %v1242_v9 = vshrl.u32 %v1176_v6, 16  ;;  %v1245_v10 = vshll.u32 %v1176_v6, 16 }
   0x6   :  { %1073 = vst [vmem:[#allocation2 + $0x40] sm:$0x1] %v1072_v5  ;;  %v1134_v8 = vsel %vm4834_vm5, 0, %v1133_v3  ;;  %v1069_v11 = vsel %vm4816_vm3, 0, %v1068_v7  ;;  %v1130_v12 = vld [vmem:[#allocation2 + $0x3c] sm:$0x1]  ;;  %vm4861_vm6 = vmand %vm1033_vm0, %vm1107_vm4 }
   0x7   :  { %1135 = vst [vmem:[#allocation2 + $0x44] sm:$0x1] %v1134_v8  ;;  %1070 = vst [vmem:[#allocation2 + $0x38] sm:$0x1] %v1069_v11  ;;  %v1131_v13 = vsel %vm4834_vm5, 0, %v1130_v12  ;;  %v1244_v16 = vrot.slane %v1242_v9, 7 }
   0x8   :  { %v1175_v14 = vld [vmem:[%s6742_s1 + $0x18] sm:$0xf]  ;;  %v1083_v15 = vld [vmem:[#allocation2 + $0x60] sm:$0x1]  ;;  %1132 = vst [vmem:[#allocation2 + $0x3c] sm:$0x1] %v1131_v13 }
   0x9   :  { %v1234_v17 = vshrl.u32 %v1175_v14, 16  ;;  %v1237_v18 = vshll.u32 %v1175_v14, 16  ;;  %v1084_v19 = vsel %vm4816_vm3, 0, %v1083_v15  ;;  %v1145_v20 = vld [vmem:[#allocation2 + $0x64] sm:$0x1]  ;;  %v1247_v23 = vor.u32 %v1245_v10, %v1244_v16  ;;  %s4775_s11 = smov 96  }
   0xa   :  { %1085 = vst [vmem:[#allocation2 + $0x60] sm:$0x1] %v1084_v19  ;;  %v1146_v21 = vsel %vm4834_vm5, 0, %v1145_v20  ;;  %v1178_v22 = vld [vmem:[%s6742_s1 + $0x24] sm:$0xf]  ;;  %v1248_v31 = vrot.slane %v1244_v16, 4 }
   0xb   :  { %v1236_v24 = vrot.slane %v1234_v17, 7  ;;  %1147 = vst [vmem:[#allocation2 + $0x64] sm:$0x1] %v1146_v21  ;;  %v1258_v25 = vshrl.u32 %v1178_v22, 16  ;;  %v1080_v26 = vld [vmem:[#allocation2 + $0x58] sm:$0x1] }
   0xc   :  { %v1142_v27 = vld [vmem:[#allocation2 + $0x5c] sm:$0x1]  ;;  %v1136_v28 = vld [vmem:[#allocation2 + $0x4c] sm:$0x1]  ;;  %v1074_v30 = vld [vmem:[#allocation2 + $0x48] sm:$0x1] }
   0xd   :  { %v1137_v32 = vsel %vm4834_vm5, 0, %v1136_v28  ;;  %v1075_v33 = vsel %vm4816_vm3, 0, %v1074_v30  ;;  %v1239_v34 = vor.u32 %v1237_v18, %v1236_v24  ;;  %v1240_v35 = vrot.slane %v1236_v24, 4  ;;  %v1177_v36 = vld [vmem:[%s6742_s1 + $0x20] sm:$0xf] }
   0xe   :  { %1138 = vst [vmem:[#allocation2 + $0x4c] sm:$0x1] %v1137_v32  ;;  %1076 = vst [vmem:[#allocation2 + $0x48] sm:$0x1] %v1075_v33  ;;  %v1390_v37 = vld [vmem:[#allocation2 + $0x40] sm:$0xf] }
   0xf   :  { %v1260_v38 = vrot.slane %v1258_v25, 7  ;;  %v1261_v39 = vshll.u32 %v1178_v22, 16  ;;  %v1081_v40 = vsel %vm4816_vm3, 0, %v1080_v26  ;;  %v1143_v41 = vsel %vm4834_vm5, 0, %v1142_v27  ;;  %v1393_v43 = vld [vmem:[#allocation2 + $0x44] sm:$0x1] }
  0x10   :  { %v1391_v42 = vsel %vm4861_vm6, %v1247_v23, %v1390_v37  ;;  %v1384_v44 = vld [vmem:[#allocation2 + $0x38] sm:$0xf]  ;;  %1082 = vst [vmem:[#allocation2 + $0x58] sm:$0x1] %v1081_v40  ;;  %1144 = vst [vmem:[#allocation2 + $0x5c] sm:$0x1] %v1143_v41  ;;  %v1394_v47 = vsel %vm4816_vm3, %v1248_v31, %v1393_v43 }
  0x11   :  { %v1250_v45 = vshrl.u32 %v1177_v36, 16  ;;  %v1253_v46 = vshll.u32 %v1177_v36, 16  ;;  %1392 = vst [vmem:[#allocation2 + $0x40] sm:$0xf] %v1391_v42  ;;  %v1385_v48 = vsel %vm4861_vm6, %v1239_v34, %v1384_v44  ;;  %v1387_v49 = vld [vmem:[#allocation2 + $0x3c] sm:$0x1]  ;;  %v1263_v50 = vor.u32 %v1261_v39, %v1260_v38 }
  0x12   :  { %v1264_v51 = vrot.slane %v1260_v38, 4  ;;  %v1089_v52 = vld [vmem:[#allocation2 + $0x70] sm:$0x1]  ;;  %v1493_v53 = vld [vmem:[#allocation2 + $0x48] sm:$0xe]  ;;  %v1388_v54 = vsel %vm4816_vm3, %v1240_v35, %v1387_v49  ;;  %vm263_vm7 = vcmask 130048  }
  0x13   :  { %1395 = vst [vmem:[#allocation2 + $0x44] sm:$0x1] %v1394_v47  ;;  %1386 = vst [vmem:[#allocation2 + $0x38] sm:$0xf] %v1385_v48  ;;  %v1402_v55 = vld [vmem:[#allocation2 + $0x60] sm:$0xf] }
  0x14   :  { %v1252_v56 = vrot.slane %v1250_v45, 7  ;;  %v1090_v57 = vsel %vm4816_vm3, 0, %v1089_v52  ;;  %v1151_v58 = vld [vmem:[#allocation2 + $0x74] sm:$0x1]  ;;  %1389 = vst [vmem:[#allocation2 + $0x3c] sm:$0x1] %v1388_v54  ;;  %v1403_v59 = vsel %vm4861_vm6, %v1263_v50, %v1402_v55 }
  0x15   :  { %v1405_v60 = vld [vmem:[#allocation2 + $0x64] sm:$0x1]  ;;  %1091 = vst [vmem:[#allocation2 + $0x70] sm:$0x1] %v1090_v57  ;;  %v1152_v61 = vsel %vm4834_vm5, 0, %v1151_v58  ;;  %vm1904_vm8 = vcmask 261120  }
  0x16   :  { %v1180_v62 = vld [vmem:[%s6742_s1 + $0x2c] sm:$0xf]  ;;  %1404 = vst [vmem:[#allocation2 + $0x60] sm:$0xf] %v1403_v59  ;;  %v1406_v63 = vsel %vm4816_vm3, %v1264_v51, %v1405_v60  ;;  %v1255_v2 = vor.u32 %v1253_v46, %v1252_v56  ;;  %v1256_v3 = vrot.slane %v1252_v56, 4  ;;  %vm1965_vm9 = vcmask 523264  }
  0x17   :  { %1153 = vst [vmem:[#allocation2 + $0x74] sm:$0x1] %v1152_v61  ;;  %v1274_v5 = vshrl.u32 %v1180_v62, 16  ;;  %v1086_v6 = vld [vmem:[#allocation2 + $0x68] sm:$0x1]  ;;  %v1277_v8 = vshll.u32 %v1180_v62, 16 }
  0x18   :  { %v1148_v7 = vld [vmem:[#allocation2 + $0x6c] sm:$0x1]  ;;  %1407 = vst [vmem:[#allocation2 + $0x64] sm:$0x1] %v1406_v63  ;;  %v1087_v9 = vsel %vm4816_vm3, 0, %v1086_v6  ;;  %vm2088_vm10 = vcmask 785408  }
  0x19   :  { %v1149_v10 = vsel %vm4834_vm5, 0, %v1148_v7  ;;  %v1179_v11 = vld [vmem:[%s6742_s1 + $0x28] sm:$0xf]  ;;  %v1473_v12 = vld [vmem:[#allocation2 + $0x4c] sm:$0x1]  ;;  %v1276_v13 = vrot.slane %v1274_v5, 7 }
  0x1a   :  { %1088 = vst [vmem:[#allocation2 + $0x68] sm:$0x1] %v1087_v9  ;;  %1150 = vst [vmem:[#allocation2 + $0x6c] sm:$0x1] %v1149_v10  ;;  %v4228_v14 = vcombine.low %v1493_v53, %v1473_v12  ;;  %v1396_v15 = vld [vmem:[#allocation2 + $0x58] sm:$0xf] }
  0x1b   :  { %v1399_v16 = vld [vmem:[#allocation2 + $0x5c] sm:$0x1]  ;;  %v1266_v17 = vshrl.u32 %v1179_v11, 16  ;;  %v1492_v18 = vld [vmem:[#allocation2 + $0x40] sm:$0xe]  ;;  %v1397_v20 = vsel %vm4861_vm6, %v1255_v2, %v1396_v15  ;;  %v1279_v22 = vor.u32 %v1277_v8, %v1276_v13  ;;  %v1280_v23 = vrot.slane %v1276_v13, 4 }
  0x1c   :  { %v1452_v19 = vld [vmem:[#allocation2 + $0x40] sm:$0xf]  ;;  %v1400_v21 = vsel %vm4816_vm3, %v1256_v3, %v1399_v16  ;;  %v1853_v24 = vrot.slane %v4228_v14, 1  ;;  %v1472_v25 = vld [vmem:[#allocation2 + $0x44] sm:$0x1]  ;;  %v1269_v27 = vshll.u32 %v1179_v11, 16 }
  0x1d   :  { %v1491_v26 = vld [vmem:[#allocation2 + $0x38] sm:$0xe]  ;;  %1398 = vst [vmem:[#allocation2 + $0x58] sm:$0xf] %v1397_v20  ;;  %1401 = vst [vmem:[#allocation2 + $0x5c] sm:$0x1] %v1400_v21  ;;  %v4227_v28 = vcombine.low %v1492_v18, %v1472_v25  ;;  %v4906_v30 = vcombine.low %v1452_v19, %v1472_v25 }
  0x1e   :  { %v1471_v31 = vld [vmem:[#allocation2 + $0x3c] sm:$0x1]  ;;  %v1451_v32 = vld [vmem:[#allocation2 + $0x38] sm:$0xf]  ;;  %v1414_v33 = vld [vmem:[#allocation2 + $0x70] sm:$0xf]  ;;  %1882 = vrot.lane.b32.xlu1 %v1853_v24, %s4773_s9 }
  0x1f   :  { %v1453_v34 = vld [vmem:[#allocation2 + $0x48] sm:$0xf]  ;;  %v4226_v35 = vcombine.low %v1491_v26, %v1471_v31  ;;  %v4909_v36 = vcombine.low %v1451_v32, %v1471_v31  ;;  %v1496_v37 = vld [vmem:[#allocation2 + $0x60] sm:$0xe]  ;;  %v1415_v38 = vsel %vm4861_vm6, %v1279_v22, %v1414_v33  ;;  %v1417_v39 = vld [vmem:[#allocation2 + $0x74] sm:$0x1] }
  0x20   :  { %v1852_v40 = vrot.slane %v4227_v28, 1  ;;  %v1476_v41 = vld [vmem:[#allocation2 + $0x64] sm:$0x1]  ;;  %1416 = vst [vmem:[#allocation2 + $0x70] sm:$0xf] %v1415_v38  ;;  %v1418_v42 = vsel %vm4816_vm3, %v1280_v23, %v1417_v39  ;;  %v1268_v43 = vrot.slane %v1266_v17, 7  ;;  %v4915_v48 = vcombine.low %v1453_v34, %v1473_v12 }
  0x21   :  { %v1851_v44 = vrot.slane %v4226_v35, 1  ;;  %v4231_v45 = vcombine.low %v1496_v37, %v1476_v41  ;;  %1419 = vst [vmem:[#allocation2 + $0x74] sm:$0x1] %v1418_v42  ;;  %v1408_v46 = vld [vmem:[#allocation2 + $0x68] sm:$0xf]  ;;  %v1663_v49 = vshll.u32 %v4906_v30, 16 }
  0x22   :  { %v1411_v47 = vld [vmem:[#allocation2 + $0x6c] sm:$0x1]  ;;  %1880 = vrot.lane.b32.xlu0 %v1852_v40, %s4773_s9  ;;  %v1456_v50 = vld [vmem:[#allocation2 + $0x60] sm:$0xf]  ;;  %v1271_v51 = vor.u32 %v1269_v27, %v1268_v43  ;;  %v1272_v52 = vrot.slane %v1268_v43, 4  ;;  %v1656_v56 = vshll.u32 %v4909_v36, 16 }
  0x23   :  { %v1092_v53 = vld [vmem:[#allocation2 + $0x78] sm:$0x1]  ;;  %v1154_v54 = vld [vmem:[#allocation2 + $0x7c] sm:$0x1]  ;;  %1878 = vrot.lane.b32.xlu1 %v1851_v44, %s4773_s9  ;;  %v1856_v55 = vrot.slane %v4231_v45, 1  ;;  %v1670_v7 = vshll.u32 %v4915_v48, 16  ;;  %v4938_v12 = vcombine.low %v1456_v50, %v1476_v41 }
  0x24   :  { %v1093_v57 = vsel %vm4816_vm3, 0, %v1092_v53  ;;  %v1155_v58 = vsel %vm4834_vm5, 0, %v1154_v54  ;;  %v1181_v59 = vld [vmem:[%s6742_s1 + $0x30] sm:$0xf]  ;;  %v1455_v60 = vld [vmem:[#allocation2 + $0x58] sm:$0xf]  ;;  %v1409_v63 = vsel %vm4861_vm6, %v1271_v51, %v1408_v46  ;;  %v1412_v2 = vsel %vm4816_vm3, %v1272_v52, %v1411_v47 }
  0x25   :  { %v1475_v61 = vld [vmem:[#allocation2 + $0x5c] sm:$0x1]  ;;  %v1495_v62 = vld [vmem:[#allocation2 + $0x58] sm:$0xe]  ;;  %1094 = vst [vmem:[#allocation2 + $0x78] sm:$0x1] %v1093_v57 }
  0x26   :  { %1156 = vst [vmem:[#allocation2 + $0x7c] sm:$0x1] %v1155_v58  ;;  %v4932_v3 = vcombine.low %v1455_v60, %v1475_v61  ;;  %v4230_v5 = vcombine.low %v1495_v62, %v1475_v61  ;;  %1410 = vst [vmem:[#allocation2 + $0x68] sm:$0xf] %v1409_v63  ;;  %v1282_v6 = vshrl.u32 %v1181_v59, 16  ;;  %1888 = vrot.lane.b32.xlu0 %v1856_v55, %s4773_s9  ;;  %v1654_v8 = vshrl.u32 %v4909_v36, 16 }
  0x27   :  { %1413 = vst [vmem:[#allocation2 + $0x6c] sm:$0x1] %v1412_v2  ;;  %v1285_v9 = vshll.u32 %v1181_v59, 16  ;;  %v1661_v10 = vshrl.u32 %v4906_v30, 16  ;;  %v1095_v11 = vld [vmem:[#allocation2 + $0x80] sm:$0x1] }
  0x28   :  { %v1855_v13 = vrot.slane %v4230_v5, 1  ;;  %v1458_v14 = vld [vmem:[#allocation2 + $0x70] sm:$0xf]  ;;  %v1284_v16 = vrot.slane %v1282_v6, 7  ;;  %v1478_v17 = vld [vmem:[#allocation2 + $0x74] sm:$0x1] }
  0x29   :  { %v1498_v15 = vld [vmem:[#allocation2 + $0x70] sm:$0xe]  ;;  %v1658_v18 = vrot.slane %v1656_v56, 1  ;;  %v1665_v19 = vrot.slane %v1663_v49, 1  ;;  %v1668_v20 = vshrl.u32 %v4915_v48, 16  ;;  %v1684_v21 = vshll.u32 %v4932_v3, 16 }
  0x2a   :  { %1886 = vrot.lane.b32.xlu1 %v1855_v13, %s4773_s9  ;;  %v4943_v22 = vcombine.low %v1458_v14, %v1478_v17  ;;  %v4233_v23 = vcombine.low %v1498_v15, %v1478_v17  ;;  %v1287_v24 = vor.u32 %v1285_v9, %v1284_v16  ;;  %v1288_v25 = vrot.slane %v1284_v16, 4  ;;  %v1157_v26 = vld [vmem:[#allocation2 + $0x84] sm:$0x1]  ;;  %v1182_v27 = vld [vmem:[%s6742_s1 + $0x34] sm:$0xf] }
  0x2b   :  { %v4948_v28 = vrot.slane %v1670_v7, 1  ;;  %v1682_v30 = vshrl.u32 %v4932_v3, 16  ;;  %v4951_v31 = vrot.slane %v1684_v21, 1  ;;  %v1096_v32 = vsel %vm4816_vm3, 0, %v1095_v11  ;;  %v1098_v33 = vld [vmem:[#allocation2 + $0x88] sm:$0x1] }
  0x2c   :  { %v1858_v34 = vrot.slane %v4233_v23, 1  ;;  %v1420_v35 = vld [vmem:[#allocation2 + $0x78] sm:$0xf]  ;;  %v1691_v37 = vshll.u32 %v4938_v12, 16  ;;  %1097 = vst [vmem:[#allocation2 + $0x80] sm:$0x1] %v1096_v32  ;;  %v1659_v42 = vor.u32 %v1658_v18, %v1654_v8  ;;  %v1666_v45 = vor.u32 %v1665_v19, %v1661_v10 }
  0x2d   :  { %v1423_v36 = vld [vmem:[#allocation2 + $0x7c] sm:$0x1]  ;;  %v1160_v38 = vld [vmem:[#allocation2 + $0x8c] sm:$0x1]  ;;  %v1457_v39 = vld [vmem:[#allocation2 + $0x68] sm:$0xf]  ;;  %v1421_v43 = vsel %vm4861_vm6, %v1287_v24, %v1420_v35 }
  0x2e   :  { %v1477_v40 = vld [vmem:[#allocation2 + $0x6c] sm:$0x1]  ;;  %v1497_v41 = vld [vmem:[#allocation2 + $0x68] sm:$0xe]  ;;  %v1424_v44 = vsel %vm4816_vm3, %v1288_v25, %v1423_v36  ;;  %1892 = vrot.lane.b32.xlu0 %v1858_v34, %s4773_s9  ;;  %1422 = vst [vmem:[#allocation2 + $0x78] sm:$0xf] %v1421_v43 }
  0x2f   :  { %v4961_v46 = vcombine.low %v1457_v39, %v1477_v40  ;;  %v4232_v47 = vcombine.low %v1497_v41, %v1477_v40  ;;  %1425 = vst [vmem:[#allocation2 + $0x7c] sm:$0x1] %v1424_v44  ;;  %v1689_v49 = vshrl.u32 %v4938_v12, 16  ;;  %v1705_v50 = vshll.u32 %v4943_v22, 16  ;;  %v1183_v51 = vld [vmem:[%s6742_s1 + $0x38] sm:$0xf] }
  0x30   :  { %v1101_v52 = vld [vmem:[#allocation2 + $0x90] sm:$0x1]  ;;  %v1158_v53 = vsel %vm4834_vm5, 0, %v1157_v26  ;;  %v1290_v54 = vshrl.u32 %v1182_v27, 16  ;;  %v1293_v55 = vshll.u32 %v1182_v27, 16  ;;  %v1099_v56 = vsel %vm4816_vm3, 0, %v1098_v33 }
  0x31   :  { %v1163_v57 = vld [vmem:[#allocation2 + $0x94] sm:$0x1]  ;;  %v1857_v58 = vrot.slane %v4232_v47, 1  ;;  %v4972_v59 = vrot.slane %v1691_v37, 1  ;;  %v1698_v60 = vshll.u32 %v4961_v46, 16  ;;  %v1703_v61 = vshrl.u32 %v4943_v22, 16 }
  0x32   :  { %1159 = vst [vmem:[#allocation2 + $0x84] sm:$0x1] %v1158_v53  ;;  %1100 = vst [vmem:[#allocation2 + $0x88] sm:$0x1] %v1099_v56  ;;  %v1184_v62 = vld [vmem:[%s6742_s1 + $0x3c] sm:$0xf]  ;;  %1758 = vrot.lane.b32.xlu0 %v1659_v42, %s4774_s18  ;;  %v1687_v33 = vor.u32 %v4951_v31, %v1682_v30  ;;  %v1673_v44 = vor.u32 %v4948_v28, %v1668_v20 }
  0x33   :  { %v1696_v63 = vshrl.u32 %v4961_v46, 16  ;;  %v1292_v2 = vrot.slane %v1290_v54, 7  ;;  %v1161_v5 = vsel %vm4834_vm5, 0, %v1160_v38  ;;  %v1298_v6 = vshrl.u32 %v1183_v51, 16  ;;  %v1104_v7 = vld [vmem:[#allocation2 + $0x98] sm:$0x1]  ;;  %1890 = vrot.lane.b32.xlu1 %v1857_v58, %s4773_s9 }
  0x34   :  { %v4984_v8 = vrot.slane %v1705_v50, 1  ;;  %1162 = vst [vmem:[#allocation2 + $0x8c] sm:$0x1] %v1161_v5  ;;  %v1301_v9 = vshll.u32 %v1183_v51, 16  ;;  %v1102_v10 = vsel %vm4816_vm3, 0, %v1101_v52  ;;  %v1164_v11 = vsel %vm4834_vm5, 0, %v1163_v57 }
  0x35   :  { %v1166_v13 = vld [vmem:[#allocation2 + $0x9c] sm:$0x1]  ;;  %v1700_v14 = vrot.slane %v1698_v60, 1  ;;  %v1295_v15 = vor.u32 %v1293_v55, %v1292_v2  ;;  %v1426_v16 = vld [vmem:[#allocation2 + $0x80] sm:$0xf]  ;;  %v1300_v17 = vrot.slane %v1298_v6, 7 }
  0x36   :  { %1103 = vst [vmem:[#allocation2 + $0x90] sm:$0x1] %v1102_v10  ;;  %1165 = vst [vmem:[#allocation2 + $0x94] sm:$0x1] %v1164_v11  ;;  %v1053_v18 = vld [vmem:[#allocation2 + $0x10] sm:$0x1]  ;;  %1760 = vrot.lane.b32.xlu0 %v1666_v45, %s4774_s18 }
  0x37   :  { %v1296_v19 = vrot.slane %v1292_v2, 4  ;;  %v1306_v21 = vshrl.u32 %v1184_v62, 16  ;;  %v1309_v23 = vshll.u32 %v1184_v62, 16  ;;  %v1105_v24 = vsel %vm4816_vm3, 0, %v1104_v7  ;;  %v1115_v25 = vld [vmem:[#allocation2 + $0x14] sm:$0x1] }
  0x38   :  { %v1459_v26 = vld [vmem:[#allocation2 + $0x78] sm:$0xf]  ;;  %v1479_v27 = vld [vmem:[#allocation2 + $0x7c] sm:$0x1]  ;;  %v1427_v34 = vsel %vm4861_vm6, %v1295_v15, %v1426_v16  ;;  %v1303_v35 = vor.u32 %v1301_v9, %v1300_v17  ;;  %1106 = vst [vmem:[#allocation2 + $0x98] sm:$0x1] %v1105_v24  ;;  %v1701_v54 = vor.u32 %v1700_v14, %v1696_v63  ;;  %v1708_v14 = vor.u32 %v4984_v8, %v1703_v61 }
  0x39   :  { %v1499_v32 = vld [vmem:[#allocation2 + $0x78] sm:$0xe]  ;;  %v4997_v36 = vcombine.low %v1459_v26, %v1479_v27  ;;  %1428 = vst [vmem:[#allocation2 + $0x80] sm:$0xf] %v1427_v34  ;;  %v1304_v38 = vrot.slane %v1300_v17, 4  ;;  %v1308_v39 = vrot.slane %v1306_v21, 7 }
  0x3a   :  { %v4234_v37 = vcombine.low %v1499_v32, %v1479_v27  ;;  %v1170_v40 = vld [vmem:[%s6742_s1 + $0x4] sm:$0xf]  ;;  %v1056_v3 = vld [vmem:[#allocation2 + $0x18] sm:$0x1]  ;;  %v1432_v30 = vld [vmem:[#allocation2 + $0x88] sm:$0xf]  ;;  %1766 = vrot.lane.b32.xlu0 %v1687_v33, %s4774_s18 }
  0x3b   :  { %v1429_v41 = vld [vmem:[#allocation2 + $0x84] sm:$0x1]  ;;  %v1167_v31 = vsel %vm4834_vm5, 0, %v1166_v13  ;;  %v1054_v42 = vsel %vm4816_vm3, 0, %v1053_v18  ;;  %v1712_v45 = vshll.u32 %v4997_v36, 16  ;;  %v1433_v51 = vsel %vm4861_vm6, %v1303_v35, %v1432_v30 }
  0x3c   :  { %v1859_v43 = vrot.slane %v4234_v37, 1  ;;  %v1430_v46 = vsel %vm4816_vm3, %v1296_v19, %v1429_v41  ;;  %1168 = vst [vmem:[#allocation2 + $0x9c] sm:$0x1] %v1167_v31  ;;  %1055 = vst [vmem:[#allocation2 + $0x10] sm:$0x1] %v1054_v42  ;;  %v1311_v52 = vor.u32 %v1309_v23, %v1308_v39  ;;  %v1312_v20 = vrot.slane %v1308_v39, 4 }
  0x3d   :  { %v1118_v47 = vld [vmem:[#allocation2 + $0x1c] sm:$0x1]  ;;  %v5016_v50 = vld [vmem:[%s6742_s1 + $0x8] sm:$0xf]  ;;  %1431 = vst [vmem:[#allocation2 + $0x84] sm:$0x1] %v1430_v46  ;;  %v1694_v13 = vor.u32 %v4972_v59, %v1689_v49 }
  0x3e   :  { %v1435_v48 = vld [vmem:[#allocation2 + $0x8c] sm:$0x1]  ;;  %v1116_v28 = vsel %vm4834_vm5, 0, %v1115_v25  ;;  %v1059_v53 = vld [vmem:[#allocation2 + $0x20] sm:$0x1]  ;;  %1894 = vrot.lane.b32.xlu1 %v1859_v43, %s4773_s9  ;;  %v1710_v55 = vshrl.u32 %v4997_v36, 16  ;;  %1770 = vrot.lane.b32.xlu0 %v1701_v54, %s4774_s18 }
  0x3f   :  { %1434 = vst [vmem:[#allocation2 + $0x88] sm:$0xf] %v1433_v51  ;;  %v1436_v56 = vsel %vm4816_vm3, %v1304_v38, %v1435_v48  ;;  %v1438_v57 = vld [vmem:[#allocation2 + $0x90] sm:$0xf]  ;;  %v1441_v58 = vld [vmem:[#allocation2 + $0x94] sm:$0x1] }
  0x40   :  { %1117 = vst [vmem:[#allocation2 + $0x14] sm:$0x1] %v1116_v28  ;;  %v1194_v60 = vshrl.u32 %v1170_v40, 16  ;;  %1437 = vst [vmem:[#allocation2 + $0x8c] sm:$0x1] %v1436_v56  ;;  %v1439_v62 = vsel %vm4861_vm6, %v1311_v52, %v1438_v57  ;;  %v1442_v2 = vsel %vm4816_vm3, %v1312_v20, %v1441_v58  ;;  %v1197_v5 = vshll.u32 %v1170_v40, 16 }
  0x41   :  { %v1057_v63 = vsel %vm4816_vm3, 0, %v1056_v3  ;;  %v1121_v6 = vld [vmem:[#allocation2 + $0x24] sm:$0x1]  ;;  %v1714_v7 = vrot.slane %v1712_v45, 1  ;;  %1440 = vst [vmem:[#allocation2 + $0x90] sm:$0xf] %v1439_v62 }
  0x42   :  { %1443 = vst [vmem:[#allocation2 + $0x94] sm:$0x1] %v1442_v2  ;;  %v1196_v9 = vrot.slane %v1194_v60, 7  ;;  %1058 = vst [vmem:[#allocation2 + $0x18] sm:$0x1] %v1057_v63  ;;  %v1119_v10 = vsel %vm4834_vm5, 0, %v1118_v47  ;;  %1762 = vrot.lane.b32.xlu1 %v1673_v44, %s4774_s18  ;;  %1772 = vrot.lane.b32.xlu0 %v1708_v14, %s4774_s18 }
  0x43   :  { %v1202_v11 = vshrl.u32 %v5016_v50, 16  ;;  %v1463_v15 = vld [vmem:[#allocation2 + $0x98] sm:$0xf]  ;;  %1120 = vst [vmem:[#allocation2 + $0x1c] sm:$0x1] %v1119_v10  ;;  %v1205_v16 = vshll.u32 %v5016_v50, 16  ;;  %v1715_v26 = vor.u32 %v1714_v7, %v1710_v55 }
  0x44   :  { %v1060_v17 = vsel %vm4816_vm3, 0, %v1059_v53  ;;  %v5048_v18 = vld [vmem:[%s6742_s1 + $0xc] sm:$0xf]  ;;  %v1460_v12 = vld [vmem:[#allocation2 + $0x80] sm:$0xf]  ;;  %v1199_v22 = vor.u32 %v1197_v5, %v1196_v9  ;;  %v1200_v49 = vrot.slane %v1196_v9, 4 }
  0x45   :  { %v1204_v59 = vrot.slane %v1202_v11, 7  ;;  %1061 = vst [vmem:[#allocation2 + $0x20] sm:$0x1] %v1060_v17  ;;  %v1122_v61 = vsel %vm4834_vm5, 0, %v1121_v6  ;;  %v1500_v8 = vld [vmem:[#allocation2 + $0x80] sm:$0xe] }
  0x46   :  { %v5054_v19 = vld [vmem:[#allocation2 + $0x9c] sm:$0x1]  ;;  %v1354_v21 = vld [vmem:[#allocation2 + $0x10] sm:$0xf]  ;;  %1123 = vst [vmem:[#allocation2 + $0x24] sm:$0x1] %v1122_v61  ;;  %1768 = vrot.lane.b32.xlu1 %v1694_v13, %s4774_s18 }
  0x47   :  { %v1480_v23 = vld [vmem:[#allocation2 + $0x84] sm:$0x1]  ;;  %v5057_v24 = vcombine.low %v1463_v15, %v5054_v19  ;;  %v1355_v25 = vsel %vm4861_vm6, %v1199_v22, %v1354_v21  ;;  %v1461_v32 = vld [vmem:[#allocation2 + $0x88] sm:$0xf]  ;;  %v1357_v33 = vld [vmem:[#allocation2 + $0x14] sm:$0x1]  ;;  %v1207_v38 = vor.u32 %v1205_v16, %v1204_v59 }
  0x48   :  { %v4215_v27 = vcombine.low %v1460_v12, %v1480_v23  ;;  %1356 = vst [vmem:[#allocation2 + $0x10] sm:$0xf] %v1355_v25  ;;  %v1481_v34 = vld [vmem:[#allocation2 + $0x8c] sm:$0x1]  ;;  %v4235_v35 = vcombine.low %v1500_v8, %v1480_v23  ;;  %v1501_v36 = vld [vmem:[#allocation2 + $0x88] sm:$0xe]  ;;  %v1358_v37 = vsel %vm4816_vm3, %v1200_v49, %v1357_v33 }
  0x49   :  { %v1210_v39 = vshrl.u32 %v5048_v18, 16  ;;  %v4216_v41 = vcombine.low %v1461_v32, %v1481_v34  ;;  %v1462_v30 = vld [vmem:[#allocation2 + $0x90] sm:$0xf]  ;;  %v1740_v31 = vshll.u32 %v5057_v24, 16  ;;  %1359 = vst [vmem:[#allocation2 + $0x14] sm:$0x1] %v1358_v37  ;;  %v4236_v53 = vcombine.low %v1501_v36, %v1481_v34 }
  0x4a   :  { %v1717_v40 = vshrl.u32 %v4215_v27, 16  ;;  %v1719_v3 = vshll.u32 %v4215_v27, 16  ;;  %v5067_v42 = vld [vmem:[#allocation2 + $0x94] sm:$0x1]  ;;  %v5069_v43 = vld [vmem:[#allocation2 + $0x90] sm:$0xe]  ;;  %1774 = vrot.lane.b32.xlu1 %v1715_v26, %s4774_s18 }
  0x4b   :  { %v1208_v44 = vrot.slane %v1204_v59, 4  ;;  %v1213_v45 = vshll.u32 %v5048_v18, 16  ;;  %v1062_v46 = vld [vmem:[#allocation2 + $0x28] sm:$0x1]  ;;  %v1124_v47 = vld [vmem:[#allocation2 + $0x2c] sm:$0x1]  ;;  %v4217_v52 = vcombine.low %v1462_v30, %v5067_v42  ;;  %v4237_v7 = vcombine.low %v5069_v43, %v5067_v42 }
  0x4c   :  { %v1721_v50 = vrot.slane %v1719_v3, 1  ;;  %v1724_v51 = vshrl.u32 %v4216_v41, 16  ;;  %v1726_v48 = vshll.u32 %v4216_v41, 16  ;;  %v1360_v20 = vld [vmem:[#allocation2 + $0x18] sm:$0xf]  ;;  %v1860_v28 = vrot.slane %v4235_v35, 1 }
  0x4d   :  { %v1738_v54 = vshrl.u32 %v5057_v24, 16  ;;  %v5075_v55 = vld [vmem:[#allocation2 + $0x98] sm:$0xe]  ;;  %v1361_v56 = vsel %vm4861_vm6, %v1207_v38, %v1360_v20  ;;  %v1363_v57 = vld [vmem:[#allocation2 + $0x1c] sm:$0x1]  ;;  %v1733_v2 = vshll.u32 %v4217_v52, 16 }
  0x4e   :  { %v1173_v58 = vld [vmem:[%s6742_s1 + $0x10] sm:$0xf]  ;;  %v1722_v60 = vor.u32 %v1721_v50, %v1717_v40  ;;  %v1728_v62 = vrot.slane %v1726_v48, 1  ;;  %v1742_v5 = vrot.slane %v1740_v31, 1  ;;  %1362 = vst [vmem:[#allocation2 + $0x18] sm:$0xf] %v1361_v56  ;;  %v1364_v10 = vsel %vm4816_vm3, %v1208_v44, %v1363_v57 }
  0x4f   :  { %v1366_v63 = vld [vmem:[#allocation2 + $0x20] sm:$0xf]  ;;  %v1731_v6 = vshrl.u32 %v4217_v52, 16  ;;  %v5084_v9 = vld [vmem:[#allocation2 + $0x10] sm:$0xf]  ;;  %v1212_v11 = vrot.slane %v1210_v39, 7  ;;  %v4238_v21 = vcombine.low %v5075_v55, %v5054_v19 }
  0x50   :  { %v1369_v13 = vld [vmem:[#allocation2 + $0x24] sm:$0x1]  ;;  %1776 = vrot.lane.b32.xlu0 %v1722_v60, %s4774_s18  ;;  %v1729_v14 = vor.u32 %v1728_v62, %v1724_v51  ;;  %v1735_v15 = vrot.slane %v1733_v2, 1  ;;  %1365 = vst [vmem:[#allocation2 + $0x1c] sm:$0x1] %v1364_v10  ;;  %v1063_v16 = vsel %vm4816_vm3, 0, %v1062_v46  ;;  %v1743_v37 = vor.u32 %v1742_v5, %v1738_v54 }
  0x51   :  { %v1125_v17 = vsel %vm4834_vm5, 0, %v1124_v47  ;;  %v1065_v18 = vld [vmem:[#allocation2 + $0x30] sm:$0x1]  ;;  %v5093_v12 = vld [vmem:[#allocation2 + $0x14] sm:$0x1]  ;;  %v1215_v22 = vor.u32 %v1213_v45, %v1212_v11  ;;  %v1216_v49 = vrot.slane %v1212_v11, 4 }
  0x52   :  { %1064 = vst [vmem:[#allocation2 + $0x28] sm:$0x1] %v1063_v16  ;;  %1126 = vst [vmem:[#allocation2 + $0x2c] sm:$0x1] %v1125_v17  ;;  %v1218_v59 = vshrl.u32 %v1173_v58, 16  ;;  %v1221_v61 = vshll.u32 %v1173_v58, 16  ;;  %1778 = vrot.lane.b32.xlu1 %v1729_v14, %s4774_s18  ;;  %v5100_v23 = vcombine.low %v5084_v9, %v5093_v12  ;;  %v1736_v36 = vor.u32 %v1735_v15, %v1731_v6 }
  0x53   :  { %v1861_v8 = vrot.slane %v4236_v53, 1  ;;  %v1066_v24 = vsel %vm4816_vm3, 0, %v1065_v18  ;;  %v1127_v25 = vld [vmem:[#allocation2 + $0x34] sm:$0x1]  ;;  %v1367_v27 = vsel %vm4861_vm6, %v1215_v22, %v1366_v63  ;;  %v1370_v32 = vsel %vm4816_vm3, %v1216_v49, %v1369_v13  ;;  %v1077_v34 = vld [vmem:[#allocation2 + $0x50] sm:$0x1] }
  0x54   :  { %v1174_v26 = vld [vmem:[%s6742_s1 + $0x14] sm:$0xf]  ;;  %v1220_v33 = vrot.slane %v1218_v59, 7  ;;  %1067 = vst [vmem:[#allocation2 + $0x30] sm:$0x1] %v1066_v24  ;;  %v1128_v19 = vsel %vm4834_vm5, 0, %v1127_v25  ;;  %1896 = vrot.lane.b32.xlu0 %v1860_v28, %s4773_s9 }
  0x55   :  { %v1139_v35 = vld [vmem:[#allocation2 + $0x54] sm:$0x1]  ;;  %v1621_v38 = vshll.u32 %v5100_v23, 16  ;;  %1368 = vst [vmem:[#allocation2 + $0x20] sm:$0xf] %v1367_v27  ;;  %v1226_v39 = vshrl.u32 %v1174_v26, 16 }
  0x56   :  { %1371 = vst [vmem:[#allocation2 + $0x24] sm:$0x1] %v1370_v32  ;;  %1129 = vst [vmem:[#allocation2 + $0x34] sm:$0x1] %v1128_v19  ;;  %v1862_v40 = vrot.slane %v4237_v7, 1  ;;  %v1223_v41 = vor.u32 %v1221_v61, %v1220_v33  ;;  %v1224_v30 = vrot.slane %v1220_v33, 4  ;;  %1898 = vrot.lane.b32.xlu1 %v1861_v8, %s4773_s9 }
  0x57   :  { %v5115_v3 = vld [vmem:[#allocation2 + $0x18] sm:$0xf]  ;;  %v1229_v31 = vshll.u32 %v1174_v26, 16  ;;  %v1619_v42 = vshrl.u32 %v5100_v23, 16  ;;  %v1486_v43 = vld [vmem:[#allocation2 + $0x10] sm:$0xe] }
  0x58   :  { %v1228_v44 = vrot.slane %v1226_v39, 7  ;;  %v1078_v45 = vsel %vm4816_vm3, 0, %v1077_v34  ;;  %v1140_v46 = vsel %vm4834_vm5, 0, %v1139_v35  ;;  %v1050_v47 = vld [vmem:[#allocation2 + $0x8] sm:$0x1]  ;;  %v1623_v50 = vrot.slane %v1621_v38, 1  ;;  %1780 = vrot.lane.b32.xlu0 %v1736_v36, %s4774_s18 }
  0x59   :  { %v5123_v51 = vld [vmem:[#allocation2 + $0x1c] sm:$0x1]  ;;  %1079 = vst [vmem:[#allocation2 + $0x50] sm:$0x1] %v1078_v45  ;;  %1141 = vst [vmem:[#allocation2 + $0x54] sm:$0x1] %v1140_v46  ;;  %v4221_v10 = vcombine.low %v1486_v43, %v5093_v12 }
  0x5a   :  { %v1051_v48 = vsel %vm4816_vm3, 0, %v1050_v47  ;;  %v1112_v52 = vld [vmem:[#allocation2 + $0xc] sm:$0x1]  ;;  %v4202_v20 = vcombine.low %v5115_v3, %v5123_v51  ;;  %v1372_v28 = vld [vmem:[#allocation2 + $0x28] sm:$0xf]  ;;  %v1231_v54 = vor.u32 %v1229_v31, %v1228_v44  ;;  %v1232_v60 = vrot.slane %v1228_v44, 4  ;;  %1782 = vrot.lane.b32.xlu1 %v1743_v37, %s4774_s18 }
  0x5b   :  { %v1375_v53 = vld [vmem:[#allocation2 + $0x2c] sm:$0x1]  ;;  %1052 = vst [vmem:[#allocation2 + $0x8] sm:$0x1] %v1051_v48  ;;  %v1169_v55 = vld [vmem:[%s6742_s1] sm:$0xf]  ;;  %v1373_v57 = vsel %vm4861_vm6, %v1223_v41, %v1372_v28  ;;  %v1624_v16 = vor.u32 %v1623_v50, %v1619_v42 }
  0x5c   :  { %v1487_v56 = vld [vmem:[#allocation2 + $0x18] sm:$0xe]  ;;  %v1376_v58 = vsel %vm4816_vm3, %v1224_v30, %v1375_v53  ;;  %v1113_v62 = vsel %vm4834_vm5, 0, %v1112_v52  ;;  %v1863_v2 = vrot.slane %v4238_v21, 1  ;;  %v1626_v5 = vshrl.u32 %v4202_v20, 16  ;;  %1900 = vrot.lane.b32.xlu0 %v1862_v40, %s4773_s9 }
  0x5d   :  { %v1628_v63 = vshll.u32 %v4202_v20, 16  ;;  %1374 = vst [vmem:[#allocation2 + $0x28] sm:$0xf] %v1373_v57  ;;  %1377 = vst [vmem:[#allocation2 + $0x2c] sm:$0x1] %v1376_v58  ;;  %v1186_v7 = vshrl.u32 %v1169_v55, 16  ;;  %v4222_v24 = vcombine.low %v1487_v56, %v5123_v51 }
  0x5e   :  { %v1378_v6 = vld [vmem:[#allocation2 + $0x30] sm:$0xf]  ;;  %1114 = vst [vmem:[#allocation2 + $0xc] sm:$0x1] %v1113_v62  ;;  %v5141_v11 = vld [vmem:[#allocation2 + $0x20] sm:$0xf]  ;;  %1902 = vrot.lane.b32.xlu1 %v1863_v2, %s4773_s9 }
  0x5f   :  { %v1468_v13 = vld [vmem:[#allocation2 + $0x24] sm:$0x1]  ;;  %v1488_v14 = vld [vmem:[#allocation2 + $0x20] sm:$0xe]  ;;  %v1379_v15 = vsel %vm4861_vm6, %v1231_v54, %v1378_v6  ;;  %v1630_v17 = vrot.slane %v1628_v63, 1  ;;  %v1188_v49 = vrot.slane %v1186_v7, 7 }
  0x60   :  { %v4203_v18 = vcombine.low %v5141_v11, %v1468_v13  ;;  %1380 = vst [vmem:[#allocation2 + $0x30] sm:$0xf] %v1379_v15  ;;  %v1381_v22 = vld [vmem:[#allocation2 + $0x34] sm:$0x1]  ;;  %v1047_v59 = vld [vmem:[#allocation2] sm:$0x1]  ;;  %v4223_v26 = vcombine.low %v1488_v14, %v1468_v13  ;;  %1748 = vrot.lane.b32.xlu0 %v1624_v16, %s4774_s18 }
  0x61   :  { %v1382_v12 = vsel %vm4816_vm3, %v1232_v60, %v1381_v22  ;;  %v1189_v61 = vshll.u32 %v1169_v55, 16  ;;  %v1048_v8 = vsel %vm4816_vm3, 0, %v1047_v59  ;;  %v1109_v21 = vld [vmem:[#allocation2 + $0x4] sm:$0x1]  ;;  %v1631_v23 = vor.u32 %v1630_v17, %v1626_v5  ;;  %v5156_v37 = vld [vmem:[#allocation2 + $0x50] sm:$0xf] }
  0x62   :  { %v1635_v25 = vshll.u32 %v4203_v18, 16  ;;  %1383 = vst [vmem:[#allocation2 + $0x34] sm:$0x1] %v1382_v12  ;;  %1049 = vst [vmem:[#allocation2] sm:$0x1] %v1048_v8  ;;  %v1192_v32 = vrot.slane %v1188_v49, 4 }
  0x63   :  { %v1191_v27 = vor.u32 %v1189_v61, %v1188_v49  ;;  %v1348_v33 = vld [vmem:[#allocation2 + $0x8] sm:$0xf]  ;;  %v1110_v19 = vsel %vm4834_vm5, 0, %v1109_v21  ;;  %v1846_v34 = vrot.slane %v4221_v10, 1  ;;  %v1633_v35 = vshrl.u32 %v4203_v18, 16  ;;  %1750 = vrot.lane.b32.xlu1 %v1631_v23, %s4774_s18  ;;  %v4671_v51 = vld [vmem:[%s6743_s2] sm:$0xff]  }
  0x64   :  { %v1637_v36 = vrot.slane %v1635_v25, 1  ;;  %1111 = vst [vmem:[#allocation2 + $0x4] sm:$0x1] %v1110_v19  ;;  %v5158_v38 = vld [vmem:[#allocation2 + $0x28] sm:$0xf]  ;;  %v1847_v30 = vrot.slane %v4222_v24, 1  ;;  %4532 = vmatprep.subr.bf16.mxu0 %v4671_v51 }
  0x65   :  { %v1469_v39 = vld [vmem:[#allocation2 + $0x2c] sm:$0x1]  ;;  %v1474_v40 = vld [vmem:[#allocation2 + $0x54] sm:$0x1]  ;;  %v1349_v41 = vsel %vm4861_vm6, %v1191_v27, %v1348_v33  ;;  %v1848_v42 = vrot.slane %v4223_v26, 1  ;;  %1868 = vrot.lane.b32.xlu0 %v1846_v34, %s4773_s9  ;;  %v4672_v54 = vld [vmem:[%s6744_s0] sm:$0xff]   ;;  %4533 = vmatpush3.bf16.msra.mxu0 %v4671_v51 }
  0x66   :  { %v4204_v4 = vcombine.low %v5158_v38, %v1469_v39  ;;  %1350 = vst [vmem:[#allocation2 + $0x8] sm:$0xf] %v1349_v41  ;;  %v1351_v31 = vld [vmem:[#allocation2 + $0xc] sm:$0x1]  ;;  %v1489_v43 = vld [vmem:[#allocation2 + $0x28] sm:$0xe]  ;;  %v1638_v46 = vor.u32 %v1637_v36, %v1633_v35  ;;  %v4209_v50 = vcombine.low %v5156_v37, %v1474_v40  ;;  %4534 = vmatprep.mubr.msk.bf16.mxu0 %vm263_vm7, %v4672_v54 }
  0x67   :  { %v5164_v44 = vld [vmem:[#allocation2 + $0x30] sm:$0xf]  ;;  %v1352_v45 = vsel %vm4816_vm3, %v1192_v32, %v1351_v31  ;;  %1870 = vrot.lane.b32.xlu1 %v1847_v30, %s4773_s9  ;;  %v4224_v1 = vcombine.low %v1489_v43, %v1469_v39  ;;  %v4673_v55 = vld [vmem:[%s6744_s0 + $0x8] sm:$0xff]   ;;  %v4677_v49 = vld [vmem:[%s6744_s0 + $0x18] sm:$0xff]   ;;  %vm3071_vm11 = vcmask 1040384   ;;  %vm3168_vm12 = vcmask 1046528  }
  0x68   :  { %v1640_v47 = vshrl.u32 %v4204_v4, 16  ;;  %v1642_v29 = vshll.u32 %v4204_v4, 16  ;;  %1353 = vst [vmem:[#allocation2 + $0xc] sm:$0x1] %v1352_v45  ;;  %v1490_v52 = vld [vmem:[#allocation2 + $0x30] sm:$0xe]  ;;  %4535 = vmatmul.mubr.msk.bf16.vlgmr.msra.gmra.mxu0 %vm263_vm7, %v4673_v55 }
  0x69   :  { %v1470_v48 = vld [vmem:[#allocation2 + $0x34] sm:$0x1]  ;;  %v1494_v20 = vld [vmem:[#allocation2 + $0x50] sm:$0xe]  ;;  %1752 = vrot.lane.b32.xlu0 %v1638_v46, %s4774_s18  ;;  %v1677_v60 = vshll.u32 %v4209_v50, 16  ;;  %v1849_v2 = vrot.slane %v4224_v1, 1 }
  0x6a   :  { %v1644_v28 = vrot.slane %v1642_v29, 1  ;;  %v4205_v53 = vcombine.low %v5164_v44, %v1470_v48  ;;  %v4225_v63 = vcombine.low %v1490_v52, %v1470_v48  ;;  %v4229_v6 = vcombine.low %v1494_v20, %v1474_v40  ;;  %v4676_v22 = vld [vmem:[%s6744_s0 + $0x10] sm:$0xff]   ;;  %v4681_v27 = vld [vmem:[%s6745_s3 + $0x64] ss:$8 sps:$4 sm:$0xff]   ;;  %v4685_v19 = vld [vmem:[%s6745_s3 + $0x60] ss:$8 sps:$4 sm:$0xff]  }
  0x6b   :  { %v1675_v13 = vshrl.u32 %v4209_v50, 16  ;;  %v1679_v14 = vrot.slane %v1677_v60, 1  ;;  %4538 = vmatprep.mubr.msk.bf16.mxu0 %vm263_vm7, %v4676_v22  ;;  %v4678_v23 = vld [vmem:[%s6745_s3 + $0x74] ss:$8 sps:$4 sm:$0xff]   ;;  %v4680_v25 = vld [vmem:[%s6745_s3 + $0x70] ss:$8 sps:$4 sm:$0xff]  }
  0x6c   :  { %v1645_v56 = vor.u32 %v1644_v28, %v1640_v47  ;;  %v1647_v57 = vshrl.u32 %v4205_v53, 16  ;;  %v1649_v58 = vshll.u32 %v4205_v53, 16  ;;  %v1850_v16 = vrot.slane %v4225_v63, 1  ;;  %4598 = vmatprep.subr.bf16.mxu1 %v4678_v23  ;;  %2525 = vmatprep.subr.bf16.mxu0 %v4678_v23  ;;  %v4683_v32 = vld [vmem:[%s6744_s0 + $0x20] sm:$0xff]   ;;  %v4684_v33 = vld [vmem:[%s6744_s0 + $0x28] sm:$0xff]   ;;  %v4689_v35 = vld [vmem:[%s6744_s0 + $0x30] sm:$0xff]  }
  0x6d   :  { %v5183_v62 = vld [vmem:[#allocation2 + $0x8] sm:$0xf]  ;;  %1872 = vrot.lane.b32.xlu0 %v1848_v42, %s4773_s9  ;;  %v1854_v17 = vrot.slane %v4229_v6, 1  ;;  %v1680_v12 = vor.u32 %v1679_v14, %v1675_v13  ;;  %4614 = vmatpush1.bf16.msra.mxu1 %v4680_v25  ;;  %v4686_v34 = vld [vmem:[%s6745_s3 + $0x54] ss:$8 sps:$4 sm:$0xff]   ;;  %v4697_v30 = vld [vmem:[%s6744_s0 + $0x40] sm:$0xff]  }
  0x6e   :  { %1754 = vrot.lane.b32.xlu1 %v1645_v56, %s4774_s18  ;;  %v1651_v5 = vrot.slane %v1649_v58, 1  ;;  %v1485_v59 = vld [vmem:[#allocation2 + $0x8] sm:$0xe]  ;;  %2526 = vmatpush1.bf16.msra.mxu0 %v4680_v25  ;;  %v4688_v36 = vld [vmem:[%s6745_s3 + $0x50] ss:$8 sps:$4 sm:$0xff]   ;;  %v4713_v52 = vld [vmem:[%s6744_s0 + $0x60] sm:$0xff]  }
  0x6f   :  { %v1465_v7 = vld [vmem:[#allocation2 + $0xc] sm:$0x1]  ;;  %4599 = vmatprep.subr.bf16.mxu1 %v4681_v27  ;;  %2527 = vmatprep.subr.bf16.mxu0 %v4681_v27  ;;  %v4692_v40 = vld [vmem:[%s6744_s0 + $0x38] sm:$0xff]   ;;  %v4693_v41 = vld [vmem:[%s6745_s3 + $0x40] ss:$8 sps:$4 sm:$0xff]  }
  0x70   :  { %v1652_v10 = vor.u32 %v1651_v5, %v1647_v57  ;;  %v4200_v15 = vcombine.low %v5183_v62, %v1465_v7  ;;  %v4220_v21 = vcombine.low %v1485_v59, %v1465_v7  ;;  %4539 = vmatmul.mubr.msk.bf16.gmra.mxu0 %vm263_vm7, %v4677_v49  ;;  %v4690_v39 = vld [vmem:[%s6745_s3 + $0x44] ss:$8 sps:$4 sm:$0xff]   ;;  %v4694_v4 = vld [vmem:[%s6745_s3 + $0x34] ss:$8 sps:$4 sm:$0xff]   ;;  %v4696_v31 = vld [vmem:[%s6745_s3 + $0x30] ss:$8 sps:$4 sm:$0xff]  }
  0x71   :  { %4542 = vmatprep.mubr.msk.bf16.mxu0 %vm263_vm7, %v4683_v32  ;;  %4615 = vmatpush1.bf16.msra.mxu1 %v4685_v19  ;;  %v4698_v42 = vld [vmem:[%s6745_s3 + $0x24] ss:$8 sps:$4 sm:$0xff]   ;;  %v4701_v45 = vld [vmem:[%s6745_s3 + $0x20] ss:$8 sps:$4 sm:$0xff]   ;;  %v4705_v46 = vld [vmem:[%s6744_s0 + $0x50] sm:$0xff]  }
  0x72   :  { %1874 = vrot.lane.b32.xlu1 %v1849_v2, %s4773_s9  ;;  %v1614_v18 = vshll.u32 %v4200_v15, 16  ;;  %1756 = vrot.lane.b32.xlu0 %v1652_v10, %s4774_s18  ;;  %v1612_v61 = vshrl.u32 %v4200_v15, 16  ;;  %v1845_v26 = vrot.slane %v4220_v21, 1  ;;  %v4700_v43 = vld [vmem:[%s6744_s0 + $0x48] sm:$0xff]   ;;  %v4702_v47 = vld [vmem:[%s6745_s3 + $0x14] ss:$8 sps:$4 sm:$0xff]  }
  0x73   :  { %2528 = vmatpush1.bf16.msra.mxu0 %v4685_v19  ;;  %4600 = vmatprep.subr.bf16.mxu1 %v4686_v34  ;;  %v4704_v29 = vld [vmem:[%s6745_s3 + $0x10] ss:$8 sps:$4 sm:$0xff]   ;;  %v4706_v50 = vld [vmem:[%s6745_s3 + $0x4] ss:$8 sps:$4 sm:$0xff]   ;;  %v4709_v48 = vld [vmem:[%s6745_s3] ss:$8 sps:$4 sm:$0xff]  }
  0x74   :  { %v1616_v8 = vrot.slane %v1614_v18, 1  ;;  %2529 = vmatprep.subr.bf16.mxu0 %v4686_v34  ;;  %v4708_v51 = vld [vmem:[%s6744_s0 + $0x58] sm:$0xff]   ;;  %v4714_v1 = vld [vmem:[%s6745_s3 + $0xe4] ss:$8 sps:$4 sm:$0xff]   ;;  %v4717_v54 = vld [vmem:[%s6745_s3 + $0xe0] ss:$8 sps:$4 sm:$0xff]  }
  0x75   :  { %4616 = vmatpush1.bf16.msra.mxu1 %v4688_v36  ;;  %v4710_v20 = vld [vmem:[%s6745_s3 + $0xf4] ss:$8 sps:$4 sm:$0xff]   ;;  %v4712_v28 = vld [vmem:[%s6745_s3 + $0xf0] ss:$8 sps:$4 sm:$0xff]   ;;  %v4716_v53 = vld [vmem:[%s6744_s0 + $0x68] sm:$0xff]  }
  0x76   :  { %1876 = vrot.lane.b32.xlu1 %v1850_v16, %s4773_s9  ;;  %1764 = vrot.lane.b32.xlu0 %v1680_v12, %s4774_s18  ;;  %v1617_v24 = vor.u32 %v1616_v8, %v1612_v61  ;;  %v4721_v55 = vld [vmem:[%s6744_s0 + $0x70] sm:$0xff]   ;;  %v4722_v2 = vld [vmem:[%s6745_s3 + $0xc4] ss:$8 sps:$4 sm:$0xff]   ;;  %v4760_v12 = vld [vmem:[#allocation2 + $0x38] sm:$0xf] }
  0x77   :  { %2530 = vmatpush1.bf16.msra.mxu0 %v4688_v36  ;;  %4601 = vmatprep.subr.bf16.mxu1 %v4690_v39  ;;  %v4718_v56 = vld [vmem:[%s6745_s3 + $0xd4] ss:$8 sps:$4 sm:$0xff]   ;;  %v4720_v58 = vld [vmem:[%s6745_s3 + $0xd0] ss:$8 sps:$4 sm:$0xff]   ;;  %v4725_v63 = vld [vmem:[%s6745_s3 + $0xc0] ss:$8 sps:$4 sm:$0xff]  }
  0x78   :  { %4543 = vmatmul.mubr.msk.bf16.gmra.mxu0 %vm263_vm7, %v4684_v33  ;;  %2531 = vmatprep.subr.bf16.mxu0 %v4690_v39  ;;  %v4724_v5 = vld [vmem:[%s6744_s0 + $0x78] sm:$0xff]   ;;  %v4729_v13 = vld [vmem:[%s6744_s0 + $0x80] sm:$0xff]   ;;  %v4732_v16 = vld [vmem:[%s6744_s0 + $0x88] sm:$0xff]  }
  0x79   :  { %4546 = vmatprep.mubr.msk.bf16.mxu0 %vm263_vm7, %v4689_v35  ;;  %4617 = vmatpush1.bf16.msra.mxu1 %v4693_v41  ;;  %v4726_v6 = vld [vmem:[%s6745_s3 + $0xb4] ss:$8 sps:$4 sm:$0xff]   ;;  %v4728_v14 = vld [vmem:[%s6745_s3 + $0xb0] ss:$8 sps:$4 sm:$0xff]   ;;  %v4730_v15 = vld [vmem:[%s6745_s3 + $0xa4] ss:$8 sps:$4 sm:$0xff]  }
  0x7a   :  { %1884 = vrot.lane.b32.xlu1 %v1854_v17, %s4773_s9  ;;  %1746 = vrot.lane.b32.xlu0 %v1617_v24, %s4774_s18  ;;  %v4733_v22 = vld [vmem:[%s6745_s3 + $0xa0] ss:$8 sps:$4 sm:$0xff]   ;;  %v4734_v49 = vld [vmem:[%s6745_s3 + $0x94] ss:$8 sps:$4 sm:$0xff]  }
  0x7b   :  { %4602 = vmatprep.subr.bf16.mxu1 %v4694_v4  ;;  %2532 = vmatpush1.bf16.msra.mxu0 %v4693_v41  ;;  %v4736_v8 = vld [vmem:[%s6745_s3 + $0x90] ss:$8 sps:$4 sm:$0xff]   ;;  %v4737_v24 = vld [vmem:[%s6745_s3 + $0x84] ss:$8 sps:$4 sm:$0xff]   ;;  %v4761_v32 = vld [vmem:[#allocation2 + $0x40] sm:$0xf] }
  0x7c   :  { %2533 = vmatprep.subr.bf16.mxu0 %v4694_v4  ;;  %v4739_v25 = vld [vmem:[%s6744_s0 + $0x90] sm:$0xff]   ;;  %v4740_v27 = vld [vmem:[%s6744_s0 + $0x98] sm:$0xff]   ;;  %v4741_v19 = vld [vmem:[%s6745_s3 + $0x80] ss:$8 sps:$4 sm:$0xff]  }
  0x7d   :  { %4618 = vmatpush1.bf16.msra.mxu1 %v4696_v31  ;;  %v4744_v35 = vld [vmem:[%s6745_s3 + $0x114] ss:$8 sps:$4 sm:$0xff]   ;;  %v4745_v4 = vld [vmem:[%s6744_s0 + $0xa0] sm:$0xff]  }
  0x7e   :  { %1866 = vrot.lane.b32.xlu1 %v1845_v26, %s4773_s9  ;;  %4603 = vmatprep.subr.bf16.mxu1 %v4698_v42 }
  0x7f   :  { %2534 = vmatpush1.bf16.msra.mxu0 %v4696_v31 }
  0x80   :  { %4547 = vmatmul.mubr.msk.bf16.gmra.mxu0 %vm263_vm7, %v4692_v40  ;;  %2535 = vmatprep.subr.bf16.mxu0 %v4698_v42  ;;  %v4762_v40 = vld [vmem:[#allocation2 + $0x58] sm:$0xf] }
  0x81   :  { %4550 = vmatprep.mubr.msk.bf16.mxu0 %vm263_vm7, %v4697_v30  ;;  %4619 = vmatpush1.bf16.msra.mxu1 %v4701_v45 }
  0x82   :  { %4604 = vmatprep.subr.bf16.mxu1 %v4702_v47 }
  0x83   :  { %2536 = vmatpush1.bf16.msra.mxu0 %v4701_v45  ;;  %v4763_v45 = vld [vmem:[#allocation2 + $0x48] sm:$0xf] }
  0x84   :  { %2537 = vmatprep.subr.bf16.mxu0 %v4702_v47 }
  0x85   :  { %4620 = vmatpush1.bf16.msra.mxu1 %v4704_v29 }
  0x86   :  { %4605 = vmatprep.subr.bf16.mxu1 %v4706_v50 }
  0x87   :  { %2538 = vmatpush1.bf16.msra.mxu0 %v4704_v29 }
  0x88   :  { %4551 = vmatmul.mubr.msk.bf16.gmra.mxu0 %vm263_vm7, %v4700_v43  ;;  %2539 = vmatprep.subr.bf16.mxu0 %v4706_v50  ;;  %v4746_v43 = vld [vmem:[%s6744_s0 + $0xa8] sm:$0xff]   ;;  %v4764_v50 = vld [vmem:[#allocation2 + $0x60] sm:$0xf] }
  0x89   :  { %4554 = vmatprep.mubr.msk.bf16.mxu0 %vm263_vm7, %v4705_v46  ;;  %4621 = vmatpush1.bf16.msra.mxu1 %v4709_v48 }
  0x8a   :  { %4606 = vmatprep.subr.bf16.mxu1 %v4710_v20 }
  0x8b   :  { %2540 = vmatpush1.bf16.msra.mxu0 %v4709_v48 }
  0x8c   :  { %2541 = vmatprep.subr.bf16.mxu0 %v4710_v20  ;;  %v4765_v20 = vld [vmem:[#allocation2 + $0x68] sm:$0xf] }
  0x8d   :  { %4622 = vmatpush2.bf16.msra.mxu1 %v4712_v28 }
  0x8e   :  { %4607 = vmatprep.subr.bf16.mxu1 %v4714_v1 }
  0x8f   :  { %2542 = vmatpush2.bf16.msra.mxu0 %v4712_v28 }
  0x90   :  { %4555 = vmatmul.mubr.msk.bf16.gmra.mxu0 %vm263_vm7, %v4708_v51  ;;  %2543 = vmatprep.subr.bf16.mxu0 %v4714_v1  ;;  %v5310_v57 = vpop.permute.xlu1 %1882  ;;  %v4747_v1 = vld [vmem:[%s6744_s0 + $0xb0] sm:$0xff]  }
  0x91   :  { %4558 = vmatprep.mubr.msk.bf16.mxu0 %vm263_vm7, %v4713_v52  ;;  %4623 = vmatpush2.bf16.msra.mxu1 %v4717_v54 }
  0x92   :  { %4608 = vmatprep.subr.bf16.mxu1 %v4718_v56 }
  0x93   :  { %2544 = vmatpush2.bf16.msra.mxu0 %v4717_v54 }
  0x94   :  { %v1881_v60 = vpop.permute.xlu0 %1880  ;;  %2545 = vmatprep.subr.bf16.mxu0 %v4718_v56  ;;  %v4766_v56 = vld [vmem:[#allocation2 + $0x70] sm:$0xf] }
  0x95   :  { %4624 = vmatpush2.bf16.msra.mxu1 %v4720_v58  ;;  %v1879_v7 = vpop.permute.xlu1 %1878 }
  0x96   :  { %4609 = vmatprep.subr.bf16.mxu1 %v4722_v2 }
  0x97   :  { %2546 = vmatpush2.bf16.msra.mxu0 %v4720_v58 }
  0x98   :  { %4559 = vmatmul.mubr.msk.bf16.gmra.mxu0 %vm263_vm7, %v4716_v53  ;;  %v5328_v10 = vpop.permute.xlu0 %1888  ;;  %2547 = vmatprep.subr.bf16.mxu0 %v4722_v2  ;;  %v4748_v53 = vld [vmem:[%s6744_s0 + $0xb8] sm:$0xff]  }
  0x99   :  { %4562 = vmatprep.mubr.msk.bf16.mxu0 %vm263_vm7, %v4721_v55  ;;  %4625 = vmatpush2.bf16.msra.mxu1 %v4725_v63 }
  0x9a   :  { %4610 = vmatprep.subr.bf16.mxu1 %v4726_v6 }
  0x9b   :  { %2548 = vmatpush2.bf16.msra.mxu0 %v4725_v63 }
  0x9c   :  { %2549 = vmatprep.subr.bf16.mxu0 %v4726_v6  ;;  %v1887_v17 = vpop.permute.xlu1 %1886 }
  0x9d   :  { %4626 = vmatpush2.bf16.msra.mxu1 %v4728_v14 }
  0x9e   :  { %4611 = vmatprep.subr.bf16.mxu1 %v4730_v15 }
  0x9f   :  { %2550 = vmatpush2.bf16.msra.mxu0 %v4728_v14 }
  0xa0   :  { %4563 = vmatmul.mubr.msk.bf16.gmra.mxu0 %vm263_vm7, %v4724_v5  ;;  %v5344_v18 = vpop.permute.xlu0 %1892  ;;  %2551 = vmatprep.subr.bf16.mxu0 %v4730_v15  ;;  %v4767_v5 = vld [vmem:[#allocation2 + $0x78] sm:$0xf] }
  0xa1   :  { %4566 = vmatprep.mubr.msk.bf16.mxu0 %vm263_vm7, %v4729_v13  ;;  %4627 = vmatpush2.bf16.msra.mxu1 %v4733_v22  ;;  %v4768_v13 = vld [vmem:[#allocation2 + $0x80] sm:$0xf] }
  0xa2   :  { %4612 = vmatprep.subr.bf16.mxu1 %v4734_v49 }
  0xa3   :  { %2552 = vmatpush2.bf16.msra.mxu0 %v4733_v22  ;;  %v4769_v22 = vld [vmem:[#allocation2 + $0x88] sm:$0xf] }
  0xa4   :  { %v1759_v59 = vpop.permute.xlu0 %1758  ;;  %2553 = vmatprep.subr.bf16.mxu0 %v4734_v49 }
  0xa5   :  { %v1928_v61 = vsel %vm1904_vm8, %v4760_v12, %v1759_v59  ;;  %v1891_v21 = vpop.permute.xlu1 %1890  ;;  %4628 = vmatpush2.bf16.msra.mxu1 %v4736_v8 }
  0xa6   :  { %v5358_v23 = vsel %vm1965_vm9, %v1928_v61, %v1879_v7  ;;  %4613 = vmatprep.subr.bf16.mxu1 %v4737_v24  ;;  %v4749_v7 = vld [vmem:[%s6744_s0 + $0xc0] sm:$0xff]   ;;  %v4754_v61 = vld [vmem:[%s6744_s0 + $0xd0] sm:$0xff]  }
  0xa7   :  { %2034 = vrot.lane.b32.xlu0 %v5358_v23, %s4775_s11  ;;  %2554 = vmatpush2.bf16.msra.mxu0 %v4736_v8 }
  0xa8   :  { %4567 = vmatmul.mubr.msk.bf16.gmra.mxu0 %vm263_vm7, %v4732_v16  ;;  %v1761_v26 = vpop.permute.xlu0 %1760  ;;  %2555 = vmatprep.subr.bf16.mxu0 %v4737_v24  ;;  %v4770_v24 = vld [vmem:[#allocation2 + $0x90] sm:$0xf] }
  0xa9   :  { %v1931_v33 = vsel %vm1904_vm8, %v4761_v32, %v1761_v26  ;;  %4570 = vmatprep.mubr.msk.bf16.mxu0 %vm263_vm7, %v4739_v25  ;;  %4629 = vmatpush2.bf16.msra.mxu1 %v4741_v19 }
  0xaa   :  { %v1983_v34 = vsel %vm1965_vm9, %v1931_v33, %v1881_v60  ;;  %2650 = vmatprep.subr.bf16.mxu1 %v4744_v35  ;;  %v4756_v35 = vld [vmem:[%s6744_s0 + $0xe0] sm:$0xff]  }
  0xab   :  { %2068 = vrot.lane.b32.xlu0 %v1983_v34, %s4773_s9  ;;  %2556 = vmatpush2.bf16.msra.mxu0 %v4741_v19 }
  0xac   :  { %v1767_v39 = vpop.permute.xlu0 %1766 }
  0xad   :  { %v1940_v41 = vsel %vm1904_vm8, %v4762_v40, %v1767_v39  ;;  %v5486_v39 = vld [vmem:[#allocation2] sm:$0xf]  ;;  %v1464_v40 = vld [vmem:[#allocation2 + $0x4] sm:$0x1] }
  0xae   :  { %v5384_v30 = vsel %vm1965_vm9, %v1940_v41, %v1887_v17 }
  0xaf   :  { %2038 = vrot.lane.b32.xlu0 %v5384_v30, %s4775_s11 }
  0xb0   :  { %4571 = vmatmul.mubr.msk.bf16.gmra.mxu0 %vm263_vm7, %v4740_v27  ;;  %v1895_v36 = vpop.permute.xlu1 %1894  ;;  %v1771_v42 = vpop.permute.xlu0 %1770 }
  0xb1   :  { %4574 = vmatprep.mubr.msk.bf16.mxu0 %vm263_vm7, %v4745_v4  ;;  %v1946_v28 = vsel %vm1904_vm8, %v4765_v20, %v1771_v42  ;;  %v4771_v4 = vld [vmem:[#allocation2 + $0x98] sm:$0xf] }
  0xb2   :  { %v5417_v55 = vsel %vm1965_vm9, %v1946_v28, %v1891_v21  ;;  %v4755_v21 = vld [vmem:[%s6744_s0 + $0xd8] sm:$0xff]  }
  0xb4   :  { %v1763_v31 = vpop.permute.xlu1 %1762  ;;  %v1773_v48 = vpop.permute.xlu0 %1772 }
  0xb5   :  { %v1934_v46 = vsel %vm1904_vm8, %v4763_v45, %v1763_v31 }
  0xb6   :  { %v1985_v47 = vsel %vm1965_vm9, %v1934_v46, %v5310_v57  ;;  %v1949_v57 = vsel %vm1904_vm8, %v4766_v56, %v1773_v48  ;;  %v4758_v48 = vld [vmem:[%s6744_s0 + $0xf0] sm:$0xff]  }
  0xb7   :  { %2070 = vrot.lane.b32.xlu1 %v1985_v47, %s4773_s9  ;;  %v5427_v2 = vsel %vm1965_vm9, %v1949_v57, %v5344_v18 }
  0xb8   :  { %4575 = vmatmul.mubr.msk.bf16.gmra.mxu0 %vm263_vm7, %v4746_v43  ;;  %v1769_v29 = vpop.permute.xlu1 %1768  ;;  %v4199_v43 = vcombine.low %v5486_v39, %v1464_v40 }
  0xb9   :  { %v1943_v51 = vsel %vm1904_vm8, %v4764_v50, %v1769_v29  ;;  %4578 = vmatprep.mubr.msk.bf16.mxu0 %vm263_vm7, %v4747_v1 }
  0xba   :  { %v5403_v52 = vsel %vm1965_vm9, %v1943_v51, %v5328_v10  ;;  %v4753_v10 = vld [vmem:[%s6744_s0 + $0xc8] sm:$0xff]   ;;  %v1607_v51 = vshll.u32 %v4199_v43, 16 }
  0xbb   :  { %2036 = vrot.lane.b32.xlu1 %v1983_v34, %s4775_s11  ;;  %2072 = vrot.lane.b32.xlu0 %v5403_v52, %s4773_s9 }
  0xbc   :  { %v1775_v54 = vpop.permute.xlu1 %1774  ;;  %v1609_v56 = vrot.slane %v1607_v51, 1  ;;  %v4752_v51 = vld [vmem:[%s6745_s3 + $0x104] ss:$8 sps:$4 sm:$0xff]  }
  0xbd   :  { %v1952_v63 = vsel %vm1904_vm8, %v4767_v5, %v1775_v54  ;;  %v1605_v54 = vshrl.u32 %v4199_v43, 16 }
  0xbe   :  { %v5443_v16 = vsel %vm1965_vm9, %v1952_v63, %v1895_v36 }
  0xbf   :  { %2040 = vrot.lane.b32.xlu1 %v5403_v52, %s4775_s11  ;;  %2042 = vrot.lane.b32.xlu0 %v5417_v55, %s4775_s11 }
  0xc0   :  { %4579 = vmatmul.mubr.msk.bf16.gmra.mxu0 %vm263_vm7, %v4748_v53 }
  0xc1   :  { %4582 = vmatprep.mubr.msk.bf16.mxu0 %vm263_vm7, %v4749_v7 }
  0xc2   :  { %v1777_v58 = vpop.permute.xlu0 %1776 }
  0xc3   :  { %2074 = vrot.lane.b32.xlu1 %v5417_v55, %s4773_s9  ;;  %2076 = vrot.lane.b32.xlu0 %v5427_v2, %s4773_s9  ;;  %v1955_v14 = vsel %vm1904_vm8, %v4768_v13, %v1777_v58 }
  0xc4   :  { %v1779_v60 = vpop.permute.xlu1 %1778 }
  0xc5   :  { %v1958_v49 = vsel %vm1904_vm8, %v4769_v22, %v1779_v60  ;;  %v1484_v60 = vld [vmem:[#allocation2] sm:$0xe] }
  0xc6   :  { %v1897_v6 = vpop.permute.xlu0 %1896  ;;  %v4219_v7 = vcombine.low %v1484_v60, %v1464_v40 }
  0xc7   :  { %2044 = vrot.lane.b32.xlu1 %v5427_v2, %s4775_s11  ;;  %2046 = vrot.lane.b32.xlu0 %v5443_v16, %s4775_s11  ;;  %v5450_v18 = vsel %vm1965_vm9, %v1955_v14, %v1897_v6  ;;  %v1610_v6 = vor.u32 %v1609_v56, %v1605_v54 }
  0xc8   :  { %v1899_v15 = vpop.permute.xlu1 %1898  ;;  %4583 = vmatmul.mubr.msk.bf16.gmra.mxu0 %vm263_vm7, %v4753_v10 }
  0xc9   :  { %v5462_v8 = vsel %vm1965_vm9, %v1958_v49, %v1899_v15  ;;  %4586 = vmatprep.mubr.msk.bf16.mxu0 %vm263_vm7, %v4754_v61  ;;  %v1844_v15 = vrot.slane %v4219_v7, 1 }
  0xca   :  { %v1781_v17 = vpop.permute.xlu0 %1780 }
  0xcb   :  { %2078 = vrot.lane.b32.xlu1 %v5443_v16, %s4773_s9  ;;  %2080 = vrot.lane.b32.xlu0 %v5450_v18, %s4773_s9  ;;  %v1961_v25 = vsel %vm1904_vm8, %v4770_v24, %v1781_v17 }
  0xcc   :  { %v1783_v59 = vpop.permute.xlu1 %1782 }
  0xcd   :  { %v1964_v31 = vsel %vm1904_vm8, %v4771_v4, %v1783_v59  ;;  %v5563_v59 = vld [vmem:[%s6746_s4] ss:$0 sm:$0xff] }
  0xce   :  { %v1901_v12 = vpop.permute.xlu0 %1900 }
  0xcf   :  { %2048 = vrot.lane.b32.xlu1 %v5450_v18, %s4775_s11  ;;  %2050 = vrot.lane.b32.xlu0 %v5462_v8, %s4775_s11  ;;  %v2003_v32 = vsel %vm1965_vm9, %v1961_v25, %v1901_v12 }
  0xd0   :  { %v1903_v26 = vpop.permute.xlu1 %1902  ;;  %4587 = vmatmul.mubr.msk.bf16.gmra.mxu0 %vm263_vm7, %v4755_v21 }
  0xd1   :  { %4590 = vmatprep.mubr.msk.bf16.mxu0 %vm263_vm7, %v4756_v35  ;;  %v2005_v29 = vsel %vm1965_vm9, %v1964_v31, %v1903_v26 }
  0xd2   :  { %v1749_v27 = vpop.permute.xlu0 %1748 }
  0xd3   :  { %v1913_v33 = vsel %vm1904_vm8, %v5084_v9, %v1749_v27  ;;  %2082 = vrot.lane.b32.xlu1 %v5462_v8, %s4773_s9  ;;  %2084 = vrot.lane.b32.xlu0 %v2003_v32, %s4773_s9  ;;  %v4757_v9 = vld [vmem:[%s6744_s0 + $0xe8] sm:$0xff]  }
  0xd5   :  { %v1751_v19 = vpop.permute.xlu1 %1750 }
  0xd6   :  { %v1916_v45 = vsel %vm1904_vm8, %v5115_v3, %v1751_v19  ;;  %v4759_v3 = vld [vmem:[%s6744_s0 + $0xf8] sm:$0xff]  }
  0xd7   :  { %v1869_v34 = vpop.permute.xlu0 %1868  ;;  %2052 = vrot.lane.b32.xlu1 %v2003_v32, %s4775_s11 }
  0xd8   :  { %v5484_v36 = vsel %vm1965_vm9, %v1913_v33, %v1869_v34  ;;  %4591 = vmatmul.mubr.msk.bf16.gmra.mxu0 %vm263_vm7, %v4757_v9 }
  0xd9   :  { %v1871_v41 = vpop.permute.xlu1 %1870  ;;  %2056 = vrot.lane.b32.xlu0 %v5484_v36, %s4773_s9  ;;  %4594 = vmatprep.mubr.msk.bf16.mxu0 %vm263_vm7, %v4758_v48 }
  0xda   :  { %v5508_v20 = vsel %vm1965_vm9, %v1916_v45, %v1871_v41 }
  0xdb   :  { %v1753_v42 = vpop.permute.xlu0 %1752  ;;  %2086 = vrot.lane.b32.xlu1 %v2005_v29, %s4773_s9 }
  0xdc   :  { %v1919_v46 = vsel %vm1904_vm8, %v5141_v11, %v1753_v42 }
  0xdf   :  { %v1873_v50 = vpop.permute.xlu0 %1872  ;;  %2058 = vrot.lane.b32.xlu1 %v5508_v20, %s4773_s9 }
  0xe0   :  { %v1755_v47 = vpop.permute.xlu1 %1754  ;;  %v5511_v28 = vsel %vm1965_vm9, %v1919_v46, %v1873_v50  ;;  %4595 = vmatmul.mubr.msk.bf16.gmra.mxu0 %vm263_vm7, %v4759_v3 }
  0xe1   :  { %v1922_v11 = vsel %vm1904_vm8, %v5158_v38, %v1755_v47  ;;  %2060 = vrot.lane.b32.xlu0 %v5511_v28, %s4773_s9  ;;  %v4742_v47 = vld [vmem:[%s6745_s3 + $0x110] ss:$8 sps:$4 sm:$0xff]  }
  0xe4   :  { %v1875_v1 = vpop.permute.xlu1 %1874  ;;  %v1757_v53 = vpop.permute.xlu0 %1756 }
  0xe5   :  { %v1925_v57 = vsel %vm1904_vm8, %v5164_v44, %v1757_v53  ;;  %v5526_v58 = vsel %vm1965_vm9, %v1922_v11, %v1875_v1 }
  0xe6   :  { %2062 = vrot.lane.b32.xlu1 %v5526_v58, %s4773_s9 }
  0xe8   :  { %v1877_v38 = vpop.permute.xlu1 %1876  ;;  %v1765_v63 = vpop.permute.xlu0 %1764 }
  0xe9   :  { %v1979_v5 = vsel %vm1965_vm9, %v1925_v57, %v1877_v38  ;;  %v1937_v44 = vsel %vm1904_vm8, %v5156_v37, %v1765_v63  ;;  %v4750_v57 = vld [vmem:[%s6745_s3 + $0x100] ss:$8 sps:$4 sm:$0xff]  }
  0xea   :  { %2064 = vrot.lane.b32.xlu0 %v1979_v5, %s4773_s9  ;;  %2066 = vrot.lane.b32.xlu1 %v5358_v23, %s4773_s9 }
  0xec   :  { %v1885_v10 = vpop.permute.xlu1 %1884  ;;  %v1747_v14 = vpop.permute.xlu0 %1746 }
  0xed   :  { %v5536_v13 = vsel %vm1965_vm9, %v1937_v44, %v1885_v10  ;;  %v1910_v17 = vsel %vm1904_vm8, %v5183_v62, %v1747_v14 }
  0xee   :  { %1744 = vrot.lane.b32.xlu0 %v1610_v6, %s4774_s18  ;;  %1864 = vrot.lane.b32.xlu1 %v1844_v15, %s4773_s9 }
  0xf0   :  { %v1867_v22 = vpop.permute.xlu1 %1866 }
  0xf1   :  { %v5544_v49 = vsel %vm1965_vm9, %v1910_v17, %v1867_v22 }
  0xf2   :  { %2022 = vrot.lane.b32.xlu0 %v5544_v49, %s4775_s11  ;;  %2024 = vrot.lane.b32.xlu1 %v5484_v36, %s4775_s11 }
  0xf6   :  { %2026 = vrot.lane.b32.xlu0 %v5508_v20, %s4775_s11  ;;  %2028 = vrot.lane.b32.xlu1 %v5511_v28, %s4775_s11 }
  0xfa   :  { %2030 = vrot.lane.b32.xlu0 %v5526_v58, %s4775_s11  ;;  %2032 = vrot.lane.b32.xlu1 %v1979_v5, %s4775_s11 }
 0x119   :  { %v2035_v37 = vpop.permute.xlu0 %2034 }
 0x11a   :  { %v2102_v40 = vsel %vm2088_vm10, %v1979_v5, %v2035_v37 }
 0x11d   :  { %v5558_v62 = vpop.permute.xlu0 %2068 }
 0x11e   :  { %v2134_v31 = vsel %vm1965_vm9, %v2035_v37, %v5558_v62 }
 0x121   :  { %v2039_v12 = vpop.permute.xlu0 %2038 }
 0x122   :  { %v2106_v17 = vsel %vm2088_vm10, %v5536_v13, %v2039_v12 }
 0x128   :  { %v4536_v61 = vpop.f32.mrf.mxu0 }
 0x129   :  { %v403_v21 = vadd.f32 %v4536_v61, %v5563_v59  ;;  %v5566_v24 = vpop.permute.xlu1 %2070 }
 0x12a   :  { %v394_v25 = vpop.f32.mrf.mxu0  ;;  %v4250_v26 = vcombine.low %v5558_v62, %v5566_v24 }
 0x12b   :  { %v651_v27 = vmax.f32 %v403_v21, 0.0  ;;  %v395_v32 = vadd.f32 %v5563_v59, %v394_v25 }
 0x12c   :  { %v4537_v33 = vpop.f32.mrf.mxu0 }
 0x12d   :  { %v4373_v19 = vpack.c.bf16 %v651_v27, %v651_v27  ;;  %v649_v34 = vmax.f32 %v395_v32, 0.0  ;;  %v406_v35 = vadd.f32 %v4537_v33, %v5563_v59  ;;  %v2037_v9 = vpop.permute.xlu1 %2036  ;;  %v5573_v41 = vpop.permute.xlu0 %2072 }
 0x12e   :  { %v2104_v4 = vsel %vm2088_vm10, %v5358_v23, %v2037_v9  ;;  %v2136_v42 = vsel %vm1965_vm9, %v2037_v9, %v5566_v24  ;;  %v397_v45 = vpop.f32.mrf.mxu0  ;;  %v2138_v22 = vsel %vm1965_vm9, %v2039_v12, %v5573_v41 }
 0x12f   :  { %971 = vst [vmem:[%s6747_s6 + $0x20] sm:$0xf] %v4373_v19  ;;  %v4371_v43 = vpack.c.bf16 %v649_v34, %v649_v34  ;;  %v4248_v46 = vcombine.low %v2102_v40, %v2104_v4  ;;  %v4249_v29 = vcombine.low %v2134_v31, %v2136_v42  ;;  %v652_v50 = vmax.f32 %v406_v35, 0.0 }
 0x130   :  { %v398_v23 = vadd.f32 %v5563_v59, %v397_v45  ;;  %v4540_v48 = vpop.f32.mrf.mxu0 }
 0x131   :  { %969 = vst [vmem:[%s6747_s6 + $0x8] sm:$0xf] %v4371_v43  ;;  %v2041_v3 = vpop.permute.xlu1 %2040  ;;  %2587 = vmatprep.mubr.bf16.mxu1 %v4249_v29  ;;  %v2043_v11 = vpop.permute.xlu0 %2042  ;;  %v4374_v1 = vpack.c.bf16 %v652_v50, %v652_v50  ;;  %v419_v54 = vadd.f32 %v4540_v48, %v5563_v59 }
 0x132   :  { %v650_v53 = vmax.f32 %v398_v23, 0.0  ;;  %2588 = vmatmul.mubr.bf16.vlgmr.msra.gmra.mxu1 %v4248_v46  ;;  %v410_v56 = vpop.f32.mrf.mxu0  ;;  %v2108_v6 = vsel %vm2088_vm10, %v5384_v30, %v2041_v3 }
 0x133   :  { %2651 = vmatpush1.bf16.msra.mxu1 %v4742_v47  ;;  %972 = vst [vmem:[%s6747_s6 + $0x2c] sm:$0xf] %v4374_v1  ;;  %v655_v38 = vmax.f32 %v419_v54, 0.0  ;;  %v411_v5 = vadd.f32 %v5563_v59, %v410_v56  ;;  %v4251_v32 = vcombine.low %v2106_v17, %v2108_v6 }
 0x134   :  { %v4372_v60 = vpack.c.bf16 %v650_v53, %v650_v53  ;;  %2652 = vmatprep.subr.bf16.mxu1 %v4752_v51  ;;  %v4541_v63 = vpop.f32.mrf.mxu0  ;;  %v2110_v51 = vsel %vm2088_vm10, %v5403_v52, %v2043_v11 }
 0x135   :  { %v5604_v7 = vpop.permute.xlu1 %2074  ;;  %v5606_v44 = vpop.permute.xlu0 %2076  ;;  %v4377_v10 = vpack.c.bf16 %v655_v38, %v655_v38  ;;  %v653_v14 = vmax.f32 %v411_v5, 0.0  ;;  %v422_v15 = vadd.f32 %v4541_v63, %v5563_v59 }
 0x136   :  { %970 = vst [vmem:[%s6747_s6 + $0x14] sm:$0xf] %v4372_v60  ;;  %v2140_v30 = vsel %vm1965_vm9, %v2041_v3, %v5604_v7  ;;  %v4253_v37 = vcombine.low %v5573_v41, %v5604_v7  ;;  %v413_v61 = vpop.f32.mrf.mxu0  ;;  %v2142_v48 = vsel %vm1965_vm9, %v2043_v11, %v5606_v44 }
 0x137   :  { %v4252_v21 = vcombine.low %v2138_v22, %v2140_v30  ;;  %2653 = vmatpush1.bf16.msra.mxu1 %v4750_v57  ;;  %975 = vst [vmem:[%s6747_s6 + $0x50] sm:$0xf] %v4377_v10  ;;  %v4375_v25 = vpack.c.bf16 %v653_v14, %v653_v14  ;;  %v656_v27 = vmax.f32 %v422_v15, 0.0  ;;  %v414_v13 = vadd.f32 %v5563_v59, %v413_v61 }
 0x138   :  { %v4544_v33 = vpop.f32.mrf.mxu0 }
 0x139   :  { %v2045_v12 = vpop.permute.xlu1 %2044  ;;  %2597 = vmatprep.mubr.bf16.mxu1 %v4252_v21  ;;  %v2047_v19 = vpop.permute.xlu0 %2046  ;;  %973 = vst [vmem:[%s6747_s6 + $0x38] sm:$0xf] %v4375_v25  ;;  %v4378_v34 = vpack.c.bf16 %v656_v27, %v656_v27  ;;  %v654_v35 = vmax.f32 %v414_v13, 0.0  ;;  %v435_v40 = vadd.f32 %v4544_v33, %v5563_v59 }
 0x13a   :  { %2598 = vmatmul.mubr.bf16.gmra.mxu1 %v4251_v32  ;;  %v426_v9 = vpop.f32.mrf.mxu0  ;;  %v2112_v45 = vsel %vm2088_vm10, %v5417_v55, %v2045_v12  ;;  %v2114_v32 = vsel %vm2088_vm10, %v5427_v2, %v2047_v19 }
 0x13b   :  { %976 = vst [vmem:[%s6747_s6 + $0x5c] sm:$0xf] %v4378_v34  ;;  %v4376_v4 = vpack.c.bf16 %v654_v35, %v654_v35  ;;  %v659_v31 = vmax.f32 %v435_v40, 0.0  ;;  %v427_v42 = vadd.f32 %v5563_v59, %v426_v9  ;;  %v4254_v52 = vcombine.low %v2110_v51, %v2112_v45 }
 0x13c   :  { %v4545_v43 = vpop.f32.mrf.mxu0 }
 0x13d   :  { %v5634_v46 = vpop.permute.xlu1 %2078  ;;  %v5636_v47 = vpop.permute.xlu0 %2080  ;;  %974 = vst [vmem:[%s6747_s6 + $0x44] sm:$0xf] %v4376_v4  ;;  %v4381_v29 = vpack.c.bf16 %v659_v31, %v659_v31  ;;  %v657_v50 = vmax.f32 %v427_v42, 0.0  ;;  %v438_v23 = vadd.f32 %v4545_v43, %v5563_v59 }
 0x13e   :  { %v2144_v55 = vsel %vm1965_vm9, %v2045_v12, %v5634_v46  ;;  %v4256_v3 = vcombine.low %v5606_v44, %v5634_v46  ;;  %v429_v1 = vpop.f32.mrf.mxu0  ;;  %v2146_v33 = vsel %vm1965_vm9, %v2047_v19, %v5636_v47 }
 0x13f   :  { %v4255_v53 = vcombine.low %v2142_v48, %v2144_v55  ;;  %979 = vst [vmem:[%s6747_s6 + $0x80] sm:$0xf] %v4381_v29  ;;  %v4379_v54 = vpack.c.bf16 %v657_v50, %v657_v50  ;;  %v660_v56 = vmax.f32 %v438_v23, 0.0  ;;  %v430_v57 = vadd.f32 %v5563_v59, %v429_v1 }
 0x140   :  { %v4548_v60 = vpop.f32.mrf.mxu0 }
 0x141   :  { %v2049_v38 = vpop.permute.xlu1 %2048  ;;  %2607 = vmatprep.mubr.bf16.mxu1 %v4255_v53  ;;  %v2051_v11 = vpop.permute.xlu0 %2050  ;;  %977 = vst [vmem:[%s6747_s6 + $0x68] sm:$0xf] %v4379_v54  ;;  %v4382_v5 = vpack.c.bf16 %v660_v56, %v660_v56  ;;  %v658_v63 = vmax.f32 %v430_v57, 0.0  ;;  %v451_v6 = vadd.f32 %v4548_v60, %v5563_v59 }
 0x142   :  { %2608 = vmatmul.mubr.bf16.gmra.mxu1 %v4254_v52  ;;  %v442_v10 = vpop.f32.mrf.mxu0  ;;  %v2116_v30 = vsel %vm2088_vm10, %v5443_v16, %v2049_v38  ;;  %v2118_v52 = vsel %vm2088_vm10, %v5450_v18, %v2051_v11 }
 0x143   :  { %980 = vst [vmem:[%s6747_s6 + $0x8c] sm:$0xf] %v4382_v5  ;;  %v4380_v14 = vpack.c.bf16 %v658_v63, %v658_v63  ;;  %v663_v15 = vmax.f32 %v451_v6, 0.0  ;;  %v443_v17 = vadd.f32 %v5563_v59, %v442_v10  ;;  %v4257_v2 = vcombine.low %v2114_v32, %v2116_v30 }
 0x144   :  { %v4549_v22 = vpop.f32.mrf.mxu0 }
 0x145   :  { %v5664_v61 = vpop.permute.xlu1 %2082  ;;  %v5666_v21 = vpop.permute.xlu0 %2084  ;;  %978 = vst [vmem:[%s6747_s6 + $0x74] sm:$0xf] %v4380_v14  ;;  %v4385_v25 = vpack.c.bf16 %v663_v15, %v663_v15  ;;  %v661_v27 = vmax.f32 %v443_v17, 0.0  ;;  %v454_v13 = vadd.f32 %v4549_v22, %v5563_v59 }
 0x146   :  { %v2148_v16 = vsel %vm1965_vm9, %v2049_v38, %v5664_v61  ;;  %v4259_v12 = vcombine.low %v5636_v47, %v5664_v61  ;;  %v445_v34 = vpop.f32.mrf.mxu0  ;;  %v2150_v60 = vsel %vm1965_vm9, %v2051_v11, %v5666_v21 }
 0x147   :  { %v4258_v35 = vcombine.low %v2146_v33, %v2148_v16  ;;  %983 = vst [vmem:[%s6747_s6 + $0xb0] sm:$0xf] %v4385_v25  ;;  %v4383_v40 = vpack.c.bf16 %v661_v27, %v661_v27  ;;  %v664_v9 = vmax.f32 %v454_v13, 0.0  ;;  %v446_v4 = vadd.f32 %v5563_v59, %v445_v34 }
 0x148   :  { %v4552_v31 = vpop.f32.mrf.mxu0 }
 0x149   :  { %v2053_v42 = vpop.permute.xlu1 %2052  ;;  %2617 = vmatprep.mubr.bf16.mxu1 %v4258_v35  ;;  %981 = vst [vmem:[%s6747_s6 + $0x98] sm:$0xf] %v4383_v40  ;;  %v4386_v43 = vpack.c.bf16 %v664_v9, %v664_v9  ;;  %v662_v45 = vmax.f32 %v446_v4, 0.0  ;;  %v467_v29 = vadd.f32 %v4552_v31, %v5563_v59 }
 0x14a   :  { %2618 = vmatmul.mubr.bf16.gmra.mxu1 %v4257_v2  ;;  %v458_v50 = vpop.f32.mrf.mxu0  ;;  %v2120_v1 = vsel %vm2088_vm10, %v5462_v8, %v2053_v42 }
 0x14b   :  { %v5684_v19 = vpop.permute.xlu0 %2056  ;;  %984 = vst [vmem:[%s6747_s6 + $0xbc] sm:$0xf] %v4386_v43  ;;  %v4384_v23 = vpack.c.bf16 %v662_v45, %v662_v45  ;;  %v667_v51 = vmax.f32 %v467_v29, 0.0  ;;  %v459_v48 = vadd.f32 %v5563_v59, %v458_v50  ;;  %v4260_v15 = vcombine.low %v2118_v52, %v2120_v1 }
 0x14c   :  { %v4553_v55 = vpop.f32.mrf.mxu0 }
 0x14d   :  { %v5696_v53 = vpop.permute.xlu1 %2086  ;;  %982 = vst [vmem:[%s6747_s6 + $0xa4] sm:$0xf] %v4384_v23  ;;  %v4389_v54 = vpack.c.bf16 %v667_v51, %v667_v51  ;;  %v665_v56 = vmax.f32 %v459_v48, 0.0  ;;  %v470_v57 = vadd.f32 %v4553_v55, %v5563_v59 }
 0x14e   :  { %v2152_v38 = vsel %vm1965_vm9, %v2053_v42, %v5696_v53  ;;  %v4262_v8 = vcombine.low %v5666_v21, %v5696_v53  ;;  %v461_v5 = vpop.f32.mrf.mxu0 }
 0x14f   :  { %v4261_v63 = vcombine.low %v2150_v60, %v2152_v38  ;;  %987 = vst [vmem:[%s6747_s6 + $0xe0] sm:$0xf] %v4389_v54  ;;  %v4387_v10 = vpack.c.bf16 %v665_v56, %v665_v56  ;;  %v668_v14 = vmax.f32 %v470_v57, 0.0  ;;  %v462_v18 = vadd.f32 %v5563_v59, %v461_v5 }
 0x150   :  { %v4556_v11 = vpop.f32.mrf.mxu0 }
 0x151   :  { %v5716_v17 = vpop.permute.xlu1 %2058  ;;  %2627 = vmatprep.mubr.bf16.mxu1 %v4261_v63  ;;  %985 = vst [vmem:[%s6747_s6 + $0xc8] sm:$0xf] %v4387_v10  ;;  %v4390_v22 = vpack.c.bf16 %v668_v14, %v668_v14  ;;  %v666_v30 = vmax.f32 %v462_v18, 0.0  ;;  %v483_v25 = vadd.f32 %v4556_v11, %v5563_v59 }
 0x152   :  { %2628 = vmatmul.mubr.bf16.gmra.mxu1 %v4260_v15  ;;  %v474_v27 = vpop.f32.mrf.mxu0  ;;  %v4241_v45 = vcombine.low %v5684_v19, %v5716_v17 }
 0x153   :  { %v5710_v6 = vpop.permute.xlu0 %2060  ;;  %2670 = vmatprep.mubr.bf16.mxu1 %v4772_v0  ;;  %988 = vst [vmem:[%s6747_s6 + $0xec] sm:$0xf] %v4390_v22  ;;  %v4388_v13 = vpack.c.bf16 %v666_v30, %v666_v30  ;;  %v671_v32 = vmax.f32 %v483_v25, 0.0  ;;  %v475_v33 = vadd.f32 %v5563_v59, %v474_v27 }
 0x154   :  { %v4557_v16 = vpop.f32.mrf.mxu0 }
 0x155   :  { %986 = vst [vmem:[%s6747_s6 + $0xd4] sm:$0xf] %v4388_v13  ;;  %v4393_v40 = vpack.c.bf16 %v671_v32, %v671_v32  ;;  %v669_v9 = vmax.f32 %v475_v33, 0.0  ;;  %v486_v4 = vadd.f32 %v4557_v16, %v5563_v59 }
 0x156   :  { %v477_v2 = vpop.f32.mrf.mxu0 }
 0x157   :  { %991 = vst [vmem:[%s6747_s6 + $0x110] sm:$0xf] %v4393_v40  ;;  %v4391_v31 = vpack.c.bf16 %v669_v9, %v669_v9  ;;  %v672_v42 = vmax.f32 %v486_v4, 0.0  ;;  %v478_v43 = vadd.f32 %v5563_v59, %v477_v2 }
 0x158   :  { %v5727_v34 = vpop.permute.xlu1 %2062  ;;  %v4560_v29 = vpop.f32.mrf.mxu0 }
 0x159   :  { %989 = vst [vmem:[%s6747_s6 + $0xf8] sm:$0xf] %v4391_v31  ;;  %v4394_v51 = vpack.c.bf16 %v672_v42, %v672_v42  ;;  %v670_v48 = vmax.f32 %v478_v43, 0.0  ;;  %v499_v55 = vadd.f32 %v4560_v29, %v5563_v59  ;;  %v4244_v30 = vcombine.low %v5710_v6, %v5727_v34 }
 0x15a   :  { %4299 = vmatmul.mubr.msk.bf16.vlgmr.msra.gmra.mxu1 %vm1904_vm8, %v4241_v45  ;;  %v490_v1 = vpop.f32.mrf.mxu0 }
 0x15b   :  { %2680 = vmatprep.mubr.bf16.mxu1 %v4772_v0  ;;  %992 = vst [vmem:[%s6747_s6 + $0x11c] sm:$0xf] %v4394_v51  ;;  %v4392_v56 = vpack.c.bf16 %v670_v48, %v670_v48  ;;  %v675_v57 = vmax.f32 %v499_v55, 0.0  ;;  %v491_v52 = vadd.f32 %v5563_v59, %v490_v1 }
 0x15c   :  { %v5729_v35 = vpop.permute.xlu0 %2064  ;;  %v5741_v50 = vpop.permute.xlu1 %2066 }
 0x15d   :  { %v4561_v60 = vpop.f32.mrf.mxu0  ;;  %990 = vst [vmem:[%s6747_s6 + $0x104] sm:$0xf] %v4392_v56  ;;  %v4397_v63 = vpack.c.bf16 %v675_v57, %v675_v57  ;;  %v673_v10 = vmax.f32 %v491_v52, 0.0  ;;  %v4247_v52 = vcombine.low %v5729_v35, %v5741_v50 }
 0x15f   :  { %v493_v18 = vpop.f32.mrf.mxu0  ;;  %995 = vst [vmem:[%s6747_s6 + $0x140] sm:$0xf] %v4397_v63  ;;  %v4395_v15 = vpack.c.bf16 %v673_v10, %v673_v10 }
 0x160   :  { %v1745_v23 = vpop.permute.xlu0 %1744  ;;  %v1865_v38 = vpop.permute.xlu1 %1864  ;;  %v494_v22 = vadd.f32 %v5563_v59, %v493_v18 }
 0x161   :  { %v1907_v54 = vsel %vm1904_vm8, %v5486_v39, %v1745_v23  ;;  %v502_v39 = vadd.f32 %v4561_v60, %v5563_v59  ;;  %v4564_v27 = vpop.f32.mrf.mxu0  ;;  %993 = vst [vmem:[%s6747_s6 + $0x128] sm:$0xf] %v4395_v15 }
 0x162   :  { %v1967_v14 = vsel %vm1965_vm9, %v1907_v54, %v1865_v38  ;;  %v674_v33 = vmax.f32 %v494_v22, 0.0  ;;  %v515_v16 = vadd.f32 %v4564_v27, %v5563_v59  ;;  %4300 = vmatmul.mubr.msk.bf16.gmra.mxu1 %vm1904_vm8, %v4244_v30 }
 0x163   :  { %v676_v11 = vmax.f32 %v502_v39, 0.0  ;;  %v506_v2 = vpop.f32.mrf.mxu0  ;;  %2690 = vmatprep.mubr.bf16.mxu1 %v4772_v0 }
 0x164   :  { %v2023_v5 = vpop.permute.xlu0 %2022  ;;  %v2025_v13 = vpop.permute.xlu1 %2024  ;;  %v4396_v45 = vpack.c.bf16 %v674_v33, %v674_v33  ;;  %v507_v29 = vadd.f32 %v5563_v59, %v506_v2 }
 0x165   :  { %v2090_v25 = vsel %vm2088_vm10, %v1967_v14, %v2023_v5  ;;  %v4398_v32 = vpack.c.bf16 %v676_v11, %v676_v11  ;;  %v2122_v40 = vsel %vm1965_vm9, %v2023_v5, %v5684_v19  ;;  %v2092_v9 = vsel %vm2088_vm10, %v5544_v49, %v2025_v13  ;;  %v4565_v49 = vpop.f32.mrf.mxu0 }
 0x166   :  { %v2124_v4 = vsel %vm1965_vm9, %v2025_v13, %v5716_v17  ;;  %v4239_v31 = vcombine.low %v2090_v25, %v2092_v9  ;;  %v679_v19 = vmax.f32 %v515_v16, 0.0  ;;  %994 = vst [vmem:[%s6747_s6 + $0x134] sm:$0xf] %v4396_v45  ;;  %v518_v51 = vadd.f32 %v4565_v49, %v5563_v59 }
 0x167   :  { %v4240_v42 = vcombine.low %v2122_v40, %v2124_v4  ;;  %996 = vst [vmem:[%s6747_s6 + $0x14c] sm:$0xf] %v4398_v32  ;;  %v509_v1 = vpop.f32.mrf.mxu0  ;;  %v677_v56 = vmax.f32 %v507_v29, 0.0 }
 0x168   :  { %v2027_v43 = vpop.permute.xlu0 %2026  ;;  %v2029_v23 = vpop.permute.xlu1 %2028  ;;  %v4401_v17 = vpack.c.bf16 %v679_v19, %v679_v19  ;;  %v680_v57 = vmax.f32 %v518_v51, 0.0  ;;  %v510_v60 = vadd.f32 %v5563_v59, %v509_v1 }
 0x169   :  { %2557 = vmatprep.mubr.bf16.mxu0 %v4240_v42  ;;  %v2126_v48 = vsel %vm1965_vm9, %v2027_v43, %v5710_v6  ;;  %v2128_v55 = vsel %vm1965_vm9, %v2029_v23, %v5727_v34  ;;  %v4568_v38 = vpop.f32.mrf.mxu0  ;;  %v2096_v6 = vsel %vm2088_vm10, %v5508_v20, %v2029_v23  ;;  %v4399_v63 = vpack.c.bf16 %v677_v56, %v677_v56 }
 0x16a   :  { %2558 = vmatmul.mubr.bf16.vlgmr.msra.gmra.mxu0 %v4239_v31  ;;  %v4243_v54 = vcombine.low %v2126_v48, %v2128_v55  ;;  %999 = vst [vmem:[%s6747_s6 + $0x170] sm:$0xf] %v4401_v17  ;;  %v4402_v10 = vpack.c.bf16 %v680_v57, %v680_v57  ;;  %v531_v39 = vadd.f32 %v4568_v38, %v5563_v59  ;;  %v678_v18 = vmax.f32 %v510_v60, 0.0 }
 0x16b   :  { %4301 = vmatmul.mubr.msk.bf16.gmra.mxu1 %vm1904_vm8, %v4247_v52  ;;  %v522_v15 = vpop.f32.mrf.mxu0  ;;  %v2094_v11 = vsel %vm2088_vm10, %v5484_v36, %v2027_v43  ;;  %997 = vst [vmem:[%s6747_s6 + $0x158] sm:$0xf] %v4399_v63 }
 0x16c   :  { %v2031_v5 = vpop.permute.xlu0 %2030  ;;  %v2033_v34 = vpop.permute.xlu1 %2032  ;;  %2567 = vmatprep.mubr.bf16.mxu0 %v4243_v54  ;;  %2700 = vmatprep.mubr.bf16.mxu1 %v4772_v0  ;;  %1000 = vst [vmem:[%s6747_s6 + $0x17c] sm:$0xf] %v4402_v10  ;;  %v683_v20 = vmax.f32 %v531_v39, 0.0  ;;  %v4242_v22 = vcombine.low %v2094_v11, %v2096_v6  ;;  %v4400_v25 = vpack.c.bf16 %v678_v18, %v678_v18 }
 0x16d   :  { %v2132_v14 = vsel %vm1965_vm9, %v2033_v34, %v5741_v50  ;;  %v523_v50 = vadd.f32 %v5563_v59, %v522_v15  ;;  %v2130_v30 = vsel %vm1965_vm9, %v2031_v5, %v5729_v35  ;;  %v4569_v27 = vpop.f32.mrf.mxu0  ;;  %v2100_v2 = vsel %vm2088_vm10, %v5526_v58, %v2033_v34 }
 0x16e   :  { %v4246_v36 = vcombine.low %v2130_v30, %v2132_v14  ;;  %v4405_v13 = vpack.c.bf16 %v683_v20, %v683_v20  ;;  %v534_v33 = vadd.f32 %v4569_v27, %v5563_v59  ;;  %998 = vst [vmem:[%s6747_s6 + $0x164] sm:$0xf] %v4400_v25  ;;  %v2098_v19 = vsel %vm2088_vm10, %v5511_v28, %v2031_v5 }
 0x16f   :  { %v681_v32 = vmax.f32 %v523_v50, 0.0  ;;  %v525_v16 = vpop.f32.mrf.mxu0  ;;  %v4245_v23 = vcombine.low %v2098_v19, %v2100_v2 }
 0x170   :  { %1003 = vst [vmem:[%s6747_s6 + $0x1a0] sm:$0xf] %v4405_v13  ;;  %v684_v35 = vmax.f32 %v534_v33, 0.0  ;;  %v526_v9 = vadd.f32 %v5563_v59, %v525_v16 }
 0x171   :  { %v4403_v40 = vpack.c.bf16 %v681_v32, %v681_v32  ;;  %v4572_v4 = vpop.f32.mrf.mxu0 }
 0x172   :  { %2568 = vmatmul.mubr.bf16.gmra.mxu0 %v4242_v22  ;;  %v4406_v31 = vpack.c.bf16 %v684_v35, %v684_v35  ;;  %v682_v42 = vmax.f32 %v526_v9, 0.0  ;;  %v547_v43 = vadd.f32 %v4572_v4, %v5563_v59 }
 0x173   :  { %2577 = vmatprep.mubr.bf16.mxu0 %v4246_v36  ;;  %1001 = vst [vmem:[%s6747_s6 + $0x188] sm:$0xf] %v4403_v40  ;;  %4302 = vmatmul.mubr.msk.bf16.gmra.mxu1 %vm1904_vm8, %v4250_v26  ;;  %v538_v45 = vpop.f32.mrf.mxu0 }
 0x174   :  { %2710 = vmatprep.mubr.bf16.mxu1 %v4772_v0  ;;  %1004 = vst [vmem:[%s6747_s6 + $0x1ac] sm:$0xf] %v4406_v31  ;;  %v4404_v58 = vpack.c.bf16 %v682_v42, %v682_v42  ;;  %v687_v29 = vmax.f32 %v547_v43, 0.0  ;;  %v539_v49 = vadd.f32 %v5563_v59, %v538_v45 }
 0x175   :  { %v4573_v17 = vpop.f32.mrf.mxu0 }
 0x176   :  { %1002 = vst [vmem:[%s6747_s6 + $0x194] sm:$0xf] %v4404_v58  ;;  %v4409_v62 = vpack.c.bf16 %v687_v29, %v687_v29  ;;  %v685_v24 = vmax.f32 %v539_v49, 0.0  ;;  %v550_v28 = vadd.f32 %v4573_v17, %v5563_v59 }
 0x177   :  { %v541_v26 = vpop.f32.mrf.mxu0 }
 0x178   :  { %1007 = vst [vmem:[%s6747_s6 + $0x1d0] sm:$0xf] %v4409_v62  ;;  %v4407_v51 = vpack.c.bf16 %v685_v24, %v685_v24  ;;  %v688_v48 = vmax.f32 %v550_v28, 0.0  ;;  %v542_v55 = vadd.f32 %v5563_v59, %v541_v26 }
 0x179   :  { %v4576_v1 = vpop.f32.mrf.mxu0 }
 0x17a   :  { %2578 = vmatmul.mubr.bf16.gmra.mxu0 %v4245_v23  ;;  %1005 = vst [vmem:[%s6747_s6 + $0x1b8] sm:$0xf] %v4407_v51  ;;  %v4410_v54 = vpack.c.bf16 %v688_v48, %v688_v48  ;;  %v686_v56 = vmax.f32 %v542_v55, 0.0  ;;  %v563_v57 = vadd.f32 %v4576_v1, %v5563_v59 }
 0x17b   :  { %4303 = vmatmul.mubr.msk.bf16.gmra.mxu1 %vm1904_vm8, %v4253_v37  ;;  %v554_v52 = vpop.f32.mrf.mxu0 }
 0x17c   :  { %2720 = vmatprep.mubr.bf16.mxu1 %v4772_v0  ;;  %1008 = vst [vmem:[%s6747_s6 + $0x1dc] sm:$0xf] %v4410_v54  ;;  %v4408_v60 = vpack.c.bf16 %v686_v56, %v686_v56  ;;  %v691_v38 = vmax.f32 %v563_v57, 0.0  ;;  %v555_v6 = vadd.f32 %v5563_v59, %v554_v52 }
 0x17d   :  { %v4577_v5 = vpop.f32.mrf.mxu0 }
 0x17e   :  { %1006 = vst [vmem:[%s6747_s6 + $0x1c4] sm:$0xf] %v4408_v60  ;;  %v4413_v34 = vpack.c.bf16 %v691_v38, %v691_v38  ;;  %v689_v41 = vmax.f32 %v555_v6, 0.0  ;;  %v566_v7 = vadd.f32 %v4577_v5, %v5563_v59 }
 0x17f   :  { %v557_v37 = vpop.f32.mrf.mxu0 }
 0x180   :  { %1011 = vst [vmem:[%s6747_s6 + $0x200] sm:$0xf] %v4413_v34  ;;  %v4411_v63 = vpack.c.bf16 %v689_v41, %v689_v41  ;;  %v692_v10 = vmax.f32 %v566_v7, 0.0  ;;  %v558_v39 = vadd.f32 %v5563_v59, %v557_v37 }
 0x181   :  { %v4580_v14 = vpop.f32.mrf.mxu0 }
 0x182   :  { %1009 = vst [vmem:[%s6747_s6 + $0x1e8] sm:$0xf] %v4411_v63  ;;  %v4414_v18 = vpack.c.bf16 %v692_v10, %v692_v10  ;;  %v690_v15 = vmax.f32 %v558_v39, 0.0  ;;  %v579_v11 = vadd.f32 %v4580_v14, %v5563_v59 }
 0x183   :  { %4304 = vmatmul.mubr.msk.bf16.gmra.mxu1 %vm1904_vm8, %v4256_v3  ;;  %v570_v20 = vpop.f32.mrf.mxu0 }
 0x184   :  { %2730 = vmatprep.mubr.bf16.mxu1 %v4772_v0  ;;  %1012 = vst [vmem:[%s6747_s6 + $0x20c] sm:$0xf] %v4414_v18  ;;  %v4412_v50 = vpack.c.bf16 %v690_v15, %v690_v15  ;;  %v695_v22 = vmax.f32 %v579_v11, 0.0  ;;  %v571_v30 = vadd.f32 %v5563_v59, %v570_v20 }
 0x185   :  { %v4581_v25 = vpop.f32.mrf.mxu0 }
 0x186   :  { %1010 = vst [vmem:[%s6747_s6 + $0x1f4] sm:$0xf] %v4412_v50  ;;  %v4417_v27 = vpack.c.bf16 %v695_v22, %v695_v22  ;;  %v693_v44 = vmax.f32 %v571_v30, 0.0  ;;  %v582_v46 = vadd.f32 %v4581_v25, %v5563_v59 }
 0x187   :  { %v573_v3 = vpop.f32.mrf.mxu0 }
 0x188   :  { %1015 = vst [vmem:[%s6747_s6 + $0x230] sm:$0xf] %v4417_v27  ;;  %v4415_v36 = vpack.c.bf16 %v693_v44, %v693_v44  ;;  %v696_v13 = vmax.f32 %v582_v46, 0.0  ;;  %v574_v32 = vadd.f32 %v5563_v59, %v573_v3 }
 0x189   :  { %v4584_v33 = vpop.f32.mrf.mxu0 }
 0x18a   :  { %1013 = vst [vmem:[%s6747_s6 + $0x218] sm:$0xf] %v4415_v36  ;;  %v4418_v16 = vpack.c.bf16 %v696_v13, %v696_v13  ;;  %v694_v40 = vmax.f32 %v574_v32, 0.0  ;;  %v595_v35 = vadd.f32 %v4584_v33, %v5563_v59 }
 0x18b   :  { %4305 = vmatmul.mubr.msk.bf16.gmra.mxu1 %vm1904_vm8, %v4259_v12  ;;  %v586_v9 = vpop.f32.mrf.mxu0 }
 0x18c   :  { %2740 = vmatprep.mubr.bf16.mxu1 %v4772_v0  ;;  %1016 = vst [vmem:[%s6747_s6 + $0x23c] sm:$0xf] %v4418_v16  ;;  %v4416_v4 = vpack.c.bf16 %v694_v40, %v694_v40  ;;  %v699_v2 = vmax.f32 %v595_v35, 0.0  ;;  %v587_v31 = vadd.f32 %v5563_v59, %v586_v9 }
 0x18d   :  { %v4585_v42 = vpop.f32.mrf.mxu0 }
 0x18e   :  { %1014 = vst [vmem:[%s6747_s6 + $0x224] sm:$0xf] %v4416_v4  ;;  %v4421_v43 = vpack.c.bf16 %v699_v2, %v699_v2  ;;  %v697_v47 = vmax.f32 %v587_v31, 0.0  ;;  %v598_v61 = vadd.f32 %v4585_v42, %v5563_v59 }
 0x18f   :  { %v589_v12 = vpop.f32.mrf.mxu0 }
 0x190   :  { %1019 = vst [vmem:[%s6747_s6 + $0x260] sm:$0xf] %v4421_v43  ;;  %v4419_v0 = vpack.c.bf16 %v697_v47, %v697_v47  ;;  %v700_v45 = vmax.f32 %v598_v61, 0.0  ;;  %v590_v19 = vadd.f32 %v5563_v59, %v589_v12 }
 0x191   :  { %v4588_v58 = vpop.f32.mrf.mxu0 }
 0x192   :  { %1017 = vst [vmem:[%s6747_s6 + $0x248] sm:$0xf] %v4419_v0  ;;  %v4422_v29 = vpack.c.bf16 %v700_v45, %v700_v45  ;;  %v698_v49 = vmax.f32 %v590_v19, 0.0  ;;  %v611_v23 = vadd.f32 %v4588_v58, %v5563_v59 }
 0x193   :  { %4306 = vmatmul.mubr.msk.bf16.gmra.mxu1 %vm1904_vm8, %v4262_v8  ;;  %v602_v17 = vpop.f32.mrf.mxu0 }
 0x194   :  { %1020 = vst [vmem:[%s6747_s6 + $0x26c] sm:$0xf] %v4422_v29  ;;  %v4420_v62 = vpack.c.bf16 %v698_v49, %v698_v49  ;;  %v703_v24 = vmax.f32 %v611_v23, 0.0  ;;  %v603_v28 = vadd.f32 %v5563_v59, %v602_v17 }
 0x195   :  { %v4589_v26 = vpop.f32.mrf.mxu0 }
 0x196   :  { %1018 = vst [vmem:[%s6747_s6 + $0x254] sm:$0xf] %v4420_v62  ;;  %v4425_v51 = vpack.c.bf16 %v703_v24, %v703_v24  ;;  %v701_v48 = vmax.f32 %v603_v28, 0.0  ;;  %v614_v21 = vadd.f32 %v4589_v26, %v5563_v59  ;;  %v2271_v28 = vlaneseq }
 0x197   :  { %v605_v53 = vpop.f32.mrf.mxu0 }
 0x198   :  { %1023 = vst [vmem:[%s6747_s6 + $0x290] sm:$0xf] %v4425_v51  ;;  %v4423_v8 = vpack.c.bf16 %v701_v48, %v701_v48  ;;  %v704_v55 = vmax.f32 %v614_v21, 0.0  ;;  %v606_v1 = vadd.f32 %v5563_v59, %v605_v53  ;;  %v2272_v48 = vshrl.u32 %v2271_v28, 7 }
 0x199   :  { %v4592_v54 = vpop.f32.mrf.mxu0 }
 0x19a   :  { %1021 = vst [vmem:[%s6747_s6 + $0x278] sm:$0xf] %v4423_v8  ;;  %v4426_v56 = vpack.c.bf16 %v704_v55, %v704_v55  ;;  %v702_v57 = vmax.f32 %v606_v1, 0.0  ;;  %v627_v52 = vadd.f32 %v4592_v54, %v5563_v59  ;;  %v2273_v8 = vsub.s32 0, %v2272_v48  ;;  %v2269_v55 = vld [vmem:[%s6748_s5] sm:$0x3] }
 0x19b   :  { %v618_v60 = vpop.f32.mrf.mxu0  ;;  %v2277_v1 = vsub.s32 1, %v2272_v48 }
 0x19c   :  { %1024 = vst [vmem:[%s6747_s6 + $0x29c] sm:$0xf] %v4426_v56  ;;  %v4424_v38 = vpack.c.bf16 %v702_v57, %v702_v57  ;;  %v707_v6 = vmax.f32 %v627_v52, 0.0  ;;  %v619_v5 = vadd.f32 %v5563_v59, %v618_v60  ;;  %v5983_v57 = vrot.slane %v2269_v55, %v2273_v8 }
 0x19d   :  { %v4593_v34 = vpop.f32.mrf.mxu0  ;;  %v5985_v52 = vrot.slane %v2269_v55, %v2277_v1 }
 0x19e   :  { %1022 = vst [vmem:[%s6747_s6 + $0x284] sm:$0xf] %v4424_v38  ;;  %v4429_v41 = vpack.c.bf16 %v707_v6, %v707_v6  ;;  %v705_v7 = vmax.f32 %v619_v5, 0.0  ;;  %v630_v37 = vadd.f32 %v4593_v34, %v5563_v59 }
 0x19f   :  { %v621_v63 = vpop.f32.mrf.mxu0  ;;  %6757 = vst [vmem:[#allocation4_spill] sm:$0xff] %v5985_v52 }
 0x1a0   :  { %1027 = vst [vmem:[%s6747_s6 + $0x2c0] sm:$0xf] %v4429_v41  ;;  %v4427_v10 = vpack.c.bf16 %v705_v7, %v705_v7  ;;  %v708_v39 = vmax.f32 %v630_v37, 0.0  ;;  %v622_v14 = vadd.f32 %v5563_v59, %v621_v63 }
 0x1a1   :  { %v4596_v18 = vpop.f32.mrf.mxu0 }
 0x1a2   :  { %1025 = vst [vmem:[%s6747_s6 + $0x2a8] sm:$0xf] %v4427_v10  ;;  %v4430_v15 = vpack.c.bf16 %v708_v39, %v708_v39  ;;  %v706_v11 = vmax.f32 %v622_v14, 0.0  ;;  %v643_v20 = vadd.f32 %v4596_v18, %v5563_v59 }
 0x1a3   :  { %v634_v50 = vpop.f32.mrf.mxu0 }
 0x1a4   :  { %1028 = vst [vmem:[%s6747_s6 + $0x2cc] sm:$0xf] %v4430_v15  ;;  %v4428_v22 = vpack.c.bf16 %v706_v11, %v706_v11  ;;  %v711_v30 = vmax.f32 %v643_v20, 0.0  ;;  %v635_v25 = vadd.f32 %v5563_v59, %v634_v50 }
 0x1a5   :  { %v4597_v27 = vpop.f32.mrf.mxu0 }
 0x1a6   :  { %1026 = vst [vmem:[%s6747_s6 + $0x2b4] sm:$0xf] %v4428_v22  ;;  %v4433_v44 = vpack.c.bf16 %v711_v30, %v711_v30  ;;  %v709_v46 = vmax.f32 %v635_v25, 0.0  ;;  %v646_v3 = vadd.f32 %v4597_v27, %v5563_v59 }
 0x1a7   :  { %v637_v36 = vpop.f32.mrf.mxu0 }
 0x1a8   :  { %1031 = vst [vmem:[%s6747_s6 + $0x2f0] sm:$0xf] %v4433_v44  ;;  %v4431_v13 = vpack.c.bf16 %v709_v46, %v709_v46  ;;  %v712_v32 = vmax.f32 %v646_v3, 0.0  ;;  %v638_v33 = vadd.f32 %v5563_v59, %v637_v36 }
 0x1aa   :  { %1029 = vst [vmem:[%s6747_s6 + $0x2d8] sm:$0xf] %v4431_v13  ;;  %v4434_v16 = vpack.c.bf16 %v712_v32, %v712_v32  ;;  %v710_v40 = vmax.f32 %v638_v33, 0.0 }
 0x1ac   :  { %1032 = vst [vmem:[%s6747_s6 + $0x2fc] sm:$0xf] %v4434_v16  ;;  %v4432_v35 = vpack.c.bf16 %v710_v40, %v710_v40 }
 0x1ae   :  { %1030 = vst [vmem:[%s6747_s6 + $0x2e4] sm:$0xf] %v4432_v35 }
 0x1f2   :  { %v2589_v9 = vpop.f32.mrf.mxu1 }
 0x1f3   :  { %v5994_v37 = vadd.f32 %v2589_v9, %v5983_v57 }
 0x1f4   :  { %v2591_v4 = vpop.f32.mrf.mxu1 }
 0x1f5   :  { %v5997_v63 = vadd.f32 %v2591_v4, %v5985_v52 }
 0x1f6   :  { %v2593_v2 = vpop.f32.mrf.mxu1 }
 0x1f7   :  { %v6000_v10 = vadd.f32 %v2593_v2, %v5983_v57 }
 0x1f8   :  { %v2595_v31 = vpop.f32.mrf.mxu1 }
 0x1f9   :  { %v6003_v39 = vadd.f32 %v2595_v31, %v5985_v52 }
 0x1fa   :  { %v2599_v59 = vpop.f32.mrf.mxu1 }
 0x1fb   :  { %v6006_v18 = vadd.f32 %v2599_v59, %v5983_v57 }
 0x1fc   :  { %v2601_v42 = vpop.f32.mrf.mxu1 }
 0x1fd   :  { %v6010_v50 = vadd.f32 %v2601_v42, %v5985_v52 }
 0x1fe   :  { %v2603_v43 = vpop.f32.mrf.mxu1 }
 0x1ff   :  { %v6013_v22 = vadd.f32 %v2603_v43, %v5983_v57 }
 0x200   :  { %v2605_v47 = vpop.f32.mrf.mxu1 }
 0x201   :  { %v6016_v30 = vadd.f32 %v2605_v47, %v5985_v52 }
 0x202   :  { %v2609_v61 = vpop.f32.mrf.mxu1 }
 0x203   :  { %v6019_v25 = vadd.f32 %v2609_v61, %v5983_v57 }
 0x204   :  { %v2611_v12 = vpop.f32.mrf.mxu1 }
 0x205   :  { %v6025_v32 = vadd.f32 %v2611_v12, %v5985_v52 }
 0x206   :  { %v2613_v0 = vpop.f32.mrf.mxu1 }
 0x207   :  { %v6028_v33 = vadd.f32 %v2613_v0, %v5983_v57 }
 0x208   :  { %v2615_v45 = vpop.f32.mrf.mxu1 }
 0x209   :  { %v6031_v16 = vadd.f32 %v2615_v45, %v5985_v52 }
 0x20a   :  { %v2619_v19 = vpop.f32.mrf.mxu1 }
 0x20b   :  { %v6034_v40 = vadd.f32 %v2619_v19, %v5983_v57 }
 0x20c   :  { %v2621_v58 = vpop.f32.mrf.mxu1 }
 0x20d   :  { %v6039_v59 = vadd.f32 %v2621_v58, %v5985_v52 }
 0x20e   :  { %v2623_v29 = vpop.f32.mrf.mxu1 }
 0x20f   :  { %v6042_v42 = vadd.f32 %v2623_v29, %v5983_v57 }
 0x210   :  { %v2625_v49 = vpop.f32.mrf.mxu1 }
 0x211   :  { %v6045_v43 = vadd.f32 %v2625_v49, %v5985_v52 }
 0x212   :  { %v5972_v23 = vpop.f32.mrf.mxu1 }
 0x213   :  { %v6055_v58 = vadd.f32 %v5972_v23, %v5983_v57 }
 0x214   :  { %v5974_v17 = vpop.f32.mrf.mxu1 }
 0x215   :  { %v6059_v29 = vadd.f32 %v5974_v17, %v5985_v52 }
 0x216   :  { %v5976_v62 = vpop.f32.mrf.mxu1 }
 0x218   :  { %v5978_v24 = vpop.f32.mrf.mxu1 }
 0x219   :  { %6756 = vst [vmem:[#allocation3_spill] sm:$0xff] %v5978_v24 }
 0x21a   :  { %v2672_v26 = vpop.f32.mrf.mxu1 }
 0x21c   :  { %v2674_v51 = vpop.f32.mrf.mxu1 }
 0x21e   :  { %v2676_v21 = vpop.f32.mrf.mxu1 }
 0x220   :  { %v2678_v53 = vpop.f32.mrf.mxu1 }
 0x222   :  { %v2682_v54 = vpop.f32.mrf.mxu1 }
 0x224   :  { %v2684_v56 = vpop.f32.mrf.mxu1 }
 0x226   :  { %v5987_v38 = vpop.f32.mrf.mxu1 }
 0x228   :  { %v5990_v34 = vpop.f32.mrf.mxu1 }
 0x22a   :  { %v2559_v60 = vpop.f32.mrf.mxu0 }
 0x22b   :  { %v2560_v6 = vadd.f32 %v2559_v60, %v5983_v57  ;;  %v6021_v27 = vpop.f32.mrf.mxu1 }
 0x22c   :  { %v2561_v5 = vpop.f32.mrf.mxu0 }
 0x22d   :  { %v2673_v41 = vadd.f32 %v2672_v26, %v2560_v6  ;;  %v2562_v7 = vadd.f32 %v2561_v5, %v5985_v52  ;;  %v6047_v47 = vpop.f32.mrf.mxu1 }
 0x22e   :  { %v2563_v14 = vpop.f32.mrf.mxu0 }
 0x22f   :  { %v2751_v15 = vmax.f32 %v2673_v41, 0.0  ;;  %v2675_v11 = vadd.f32 %v2674_v51, %v2562_v7  ;;  %v2564_v20 = vadd.f32 %v2563_v14, %v5983_v57  ;;  %v6072_v1 = vpop.f32.mrf.mxu1 }
 0x230   :  { %v2565_v44 = vpop.f32.mrf.mxu0 }
 0x231   :  { %v2783_v46 = vmul.f32 0.25, %v2751_v15  ;;  %v2752_v3 = vmax.f32 %v2675_v11, 0.0  ;;  %v2677_v36 = vadd.f32 %v2676_v21, %v2564_v20  ;;  %v2566_v13 = vadd.f32 %v2565_v44, %v5985_v52 }
 0x232   :  { %v2569_v35 = vpop.f32.mrf.mxu0 }
 0x233   :  { %v2815_v9 = vsub.f32 %v2751_v15, %v2783_v46  ;;  %v6036_v4 = vmul.f32 0.25, %v2752_v3  ;;  %v2753_v2 = vmax.f32 %v2677_v36, 0.0  ;;  %v2679_v31 = vadd.f32 %v2678_v53, %v2566_v13 }
 0x234   :  { %v2570_v61 = vadd.f32 %v2569_v35, %v5983_v57  ;;  %v2571_v12 = vpop.f32.mrf.mxu0 }
 0x235   :  { %v2847_v0 = vadd.f32 %v2815_v9, %v2783_v46  ;;  %v2816_v45 = vsub.f32 %v2752_v3, %v6036_v4  ;;  %v6051_v19 = vmul.f32 0.25, %v2753_v2  ;;  %v2754_v28 = vmax.f32 %v2679_v31, 0.0 }
 0x236   :  { %v6061_v49 = vadd.f32 %v2682_v54, %v2570_v61  ;;  %v2572_v26 = vadd.f32 %v2571_v12, %v5985_v52  ;;  %v2573_v51 = vpop.f32.mrf.mxu0 }
 0x237   :  { %v2911_v48 = vmul.f32 0.25, %v2847_v0  ;;  %v2848_v21 = vadd.f32 %v2816_v45, %v6036_v4  ;;  %v6066_v53 = vsub.f32 %v2753_v2, %v6051_v19  ;;  %v2879_v8 = vadd.f32 %v2815_v9, %v6051_v19  ;;  %v6084_v2 = vpop.f32.mrf.mxu1 }
 0x238   :  { %v6069_v55 = vmul.f32 0.25, %v2754_v28  ;;  %v2755_v23 = vmax.f32 %v6061_v49, 0.0  ;;  %v6074_v17 = vadd.f32 %v2684_v56, %v2572_v26  ;;  %v2574_v54 = vadd.f32 %v2573_v51, %v5983_v57 }
 0x239   :  { %v2943_v60 = vsub.f32 %v2847_v0, %v2911_v48  ;;  %v3007_v6 = vrot.slane %v2911_v48, 7  ;;  %v3104_v5 = vrot.slane %v2911_v48, 1  ;;  %v2912_v41 = vmul.f32 0.25, %v2848_v21 }
 0x23a   :  { %v2849_v7 = vadd.f32 %v6066_v53, %v2783_v46  ;;  %v3489_v14 = vmul.f32 0.25, %v2879_v8  ;;  %v6079_v15 = vsub.f32 %v2754_v28, %v6069_v55  ;;  %v2880_v11 = vadd.f32 %v2816_v45, %v6069_v55 }
 0x23b   :  { %v3072_v20 = vsel %vm3071_vm11, %v2911_v48, %v3007_v6  ;;  %v3169_v44 = vsel %vm3168_vm12, %v3104_v5, %v2911_v48  ;;  %v2944_v56 = vsub.f32 %v2848_v21, %v2912_v41  ;;  %v3008_v3 = vrot.slane %v2912_v41, 7 }
 0x23c   :  { %v3201_v36 = vadd.f32 %v3072_v20, %v2943_v60  ;;  %v3233_v13 = vadd.f32 %v3169_v44, %v2943_v60  ;;  %v3105_v35 = vrot.slane %v2912_v41, 1  ;;  %v2913_v9 = vmul.f32 0.25, %v2849_v7  ;;  %v2702_v44 = vpop.f32.mrf.mxu1 }
 0x23d   :  { %v3073_v46 = vsel %vm3071_vm11, %v2912_v41, %v3008_v3  ;;  %v3521_v31 = vsub.f32 %v2879_v8, %v3489_v14  ;;  %v3585_v61 = vrot.slane %v3489_v14, 7  ;;  %v3681_v12 = vrot.slane %v3489_v14, 1  ;;  %v2575_v8 = vpop.f32.mrf.mxu0 }
 0x23e   :  { %v3170_v0 = vsel %vm3168_vm12, %v3105_v35, %v2912_v41  ;;  %v3202_v45 = vadd.f32 %v3073_v46, %v2944_v56  ;;  %v2945_v28 = vsub.f32 %v2849_v7, %v2913_v9  ;;  %v3009_v49 = vrot.slane %v2913_v9, 7 }
 0x23f   :  { %v3234_v26 = vadd.f32 %v3170_v0, %v2944_v56  ;;  %v3106_v51 = vrot.slane %v2913_v9, 1  ;;  %v3649_v48 = vsel %vm3071_vm11, %v3489_v14, %v3585_v61  ;;  %v3745_v21 = vsel %vm3168_vm12, %v3681_v12, %v3489_v14 }
 0x240   :  { %v4435_v60 = vpack.c.bf16 %v3202_v45, %v3201_v36  ;;  %v3074_v6 = vsel %vm3071_vm11, %v2913_v9, %v3009_v49  ;;  %v3777_v5 = vadd.f32 %v3649_v48, %v3521_v31  ;;  %v3809_v20 = vadd.f32 %v3745_v21, %v3521_v31 }
 0x241   :  { %v4451_v3 = vpack.c.bf16 %v3234_v26, %v3233_v13  ;;  %v3171_v24 = vsel %vm3168_vm12, %v3106_v51, %v2913_v9  ;;  %v3203_v41 = vadd.f32 %v3074_v6, %v2945_v28  ;;  %v2850_v7 = vadd.f32 %v6079_v15, %v6036_v4 }
 0x242   :  { %3361 = vst [vmem:[%s6747_s6] sm:$0xff] %v4435_v60  ;;  %v3235_v56 = vadd.f32 %v3171_v24, %v2945_v28  ;;  %v3490_v14 = vmul.f32 0.25, %v2880_v11  ;;  %v6097_v36 = vmul.f32 0.25, %v2755_v23  ;;  %v2756_v35 = vmax.f32 %v6074_v17, 0.0 }
 0x243   :  { %3473 = vst [vmem:[%s6747_s6 + $0x60] sm:$0xff] %v4451_v3  ;;  %v2914_v13 = vmul.f32 0.25, %v2850_v7  ;;  %v2687_v9 = vadd.f32 %v5987_v38, %v2574_v54  ;;  %v6105_v46 = vadd.f32 %v2702_v44, %v5994_v37  ;;  %v6108_v4 = vadd.f32 %v2575_v8, %v5985_v52 }
 0x244   :  { %v3522_v31 = vsub.f32 %v2880_v11, %v3490_v14  ;;  %v3586_v24 = vrot.slane %v3490_v14, 7  ;;  %v3682_v61 = vrot.slane %v3490_v14, 1  ;;  %v2819_v12 = vsub.f32 %v2755_v23, %v6097_v36 }
 0x245   :  { %v2946_v0 = vsub.f32 %v2850_v7, %v2914_v13  ;;  %v3010_v17 = vrot.slane %v2914_v13, 7  ;;  %v3107_v45 = vrot.slane %v2914_v13, 1  ;;  %v2881_v28 = vadd.f32 %v6066_v53, %v6097_v36 }
 0x246   :  { %v3650_v49 = vsel %vm3071_vm11, %v3490_v14, %v3586_v24  ;;  %v3746_v38 = vsel %vm3168_vm12, %v3682_v61, %v3490_v14  ;;  %v2851_v37 = vadd.f32 %v2819_v12, %v6051_v19  ;;  %v6116_v54 = vmul.f32 0.25, %v2756_v35 }
 0x247   :  { %v3075_v11 = vsel %vm3071_vm11, %v2914_v13, %v3010_v17  ;;  %v3172_v26 = vsel %vm3168_vm12, %v3107_v45, %v2914_v13  ;;  %v3778_v51 = vadd.f32 %v3650_v49, %v3522_v31  ;;  %v3810_v23 = vadd.f32 %v3746_v38, %v3522_v31 }
 0x248   :  { %v3204_v48 = vadd.f32 %v3075_v11, %v2946_v0  ;;  %v3236_v21 = vadd.f32 %v3172_v26, %v2946_v0  ;;  %v2915_v60 = vmul.f32 0.25, %v2851_v37  ;;  %v3491_v6 = vmul.f32 0.25, %v2881_v28 }
 0x249   :  { %v4467_v44 = vpack.c.bf16 %v3778_v51, %v3777_v5  ;;  %v4483_v53 = vpack.c.bf16 %v3810_v23, %v3809_v20  ;;  %v6121_v8 = vsub.f32 %v2756_v35, %v6116_v54  ;;  %v2882_v19 = vadd.f32 %v6079_v15, %v6116_v54 }
 0x24a   :  { %v4436_v3 = vpack.c.bf16 %v3204_v48, %v3203_v41  ;;  %v4452_v7 = vpack.c.bf16 %v3236_v21, %v3235_v56  ;;  %v2947_v14 = vsub.f32 %v2851_v37, %v2915_v60  ;;  %v3011_v24 = vrot.slane %v2915_v60, 7 }
 0x24b   :  { %3937 = vst [vmem:[%s6747_s6 + $0xc0] sm:$0xff] %v4467_v44  ;;  %4049 = vst [vmem:[%s6747_s6 + $0x120] sm:$0xff] %v4483_v53  ;;  %v3108_v5 = vrot.slane %v2915_v60, 1  ;;  %v3523_v20 = vsub.f32 %v2881_v28, %v3491_v6  ;;  %v3587_v13 = vrot.slane %v3491_v6, 7  ;;  %v3683_v35 = vrot.slane %v3491_v6, 1 }
 0x24c   :  { %3362 = vst [vmem:[%s6747_s6 + $0xc] sm:$0xff] %v4436_v3  ;;  %3474 = vst [vmem:[%s6747_s6 + $0x6c] sm:$0xff] %v4452_v7  ;;  %v3076_v15 = vsel %vm3071_vm11, %v2915_v60, %v3011_v24  ;;  %v2852_v41 = vadd.f32 %v6121_v8, %v6069_v55  ;;  %v3492_v56 = vmul.f32 0.25, %v2882_v19  ;;  %v2757_v31 = vmax.f32 %v2687_v9, 0.0  ;;  %v2704_v3 = vpop.f32.mrf.mxu1 }
 0x24d   :  { %v3173_v61 = vsel %vm3168_vm12, %v3108_v5, %v2915_v60  ;;  %v3205_v0 = vadd.f32 %v3076_v15, %v2947_v14  ;;  %v3651_v17 = vsel %vm3071_vm11, %v3491_v6, %v3587_v13  ;;  %v3747_v45 = vsel %vm3168_vm12, %v3683_v35, %v3491_v6 }
 0x24e   :  { %v3237_v28 = vadd.f32 %v3173_v61, %v2947_v14  ;;  %v3779_v49 = vadd.f32 %v3651_v17, %v3523_v20  ;;  %v3811_v38 = vadd.f32 %v3747_v45, %v3523_v20  ;;  %v2916_v37 = vmul.f32 0.25, %v2852_v41 }
 0x24f   :  { %v3524_v11 = vsub.f32 %v2882_v19, %v3492_v56  ;;  %v3588_v26 = vrot.slane %v3492_v56, 7  ;;  %v3684_v51 = vrot.slane %v3492_v56, 1  ;;  %v6143_v23 = vmul.f32 0.25, %v2757_v31  ;;  %v2579_v19 = vpop.f32.mrf.mxu0 }
 0x250   :  { %v2948_v48 = vsub.f32 %v2852_v41, %v2916_v37  ;;  %v3012_v55 = vrot.slane %v2916_v37, 7  ;;  %v3109_v21 = vrot.slane %v2916_v37, 1  ;;  %v2763_v9 = vmax.f32 %v6105_v46, 0.0 }
 0x251   :  { %v3652_v60 = vsel %vm3071_vm11, %v3492_v56, %v3588_v26  ;;  %v3748_v44 = vsel %vm3168_vm12, %v3684_v51, %v3492_v56  ;;  %v6149_v6 = vsub.f32 %v2757_v31, %v6143_v23  ;;  %v2883_v53 = vadd.f32 %v2819_v12, %v6143_v23  ;;  %v2581_v26 = vpop.f32.mrf.mxu0 }
 0x252   :  { %v3077_v7 = vsel %vm3071_vm11, %v2916_v37, %v3012_v55  ;;  %v3174_v14 = vsel %vm3168_vm12, %v3109_v21, %v2916_v37  ;;  %v3780_v24 = vadd.f32 %v3652_v60, %v3524_v11  ;;  %v3812_v5 = vadd.f32 %v3748_v44, %v3524_v11  ;;  %v2706_v37 = vpop.f32.mrf.mxu1 }
 0x253   :  { %v3206_v20 = vadd.f32 %v3077_v7, %v2948_v48  ;;  %v3238_v13 = vadd.f32 %v3174_v14, %v2948_v48  ;;  %v2853_v46 = vadd.f32 %v6149_v6, %v6097_v36  ;;  %v3493_v35 = vmul.f32 0.25, %v2883_v53  ;;  %v2583_v14 = vpop.f32.mrf.mxu0 }
 0x254   :  { %v4468_v15 = vpack.c.bf16 %v3780_v24, %v3779_v49  ;;  %v4484_v41 = vpack.c.bf16 %v3812_v5, %v3811_v38  ;;  %v6156_v56 = vmul.f32 0.25, %v2763_v9  ;;  %v2689_v12 = vadd.f32 %v5990_v34, %v6108_v4  ;;  %v2708_v7 = vpop.f32.mrf.mxu1 }
 0x255   :  { %v4437_v31 = vpack.c.bf16 %v3206_v20, %v3205_v0  ;;  %v4453_v61 = vpack.c.bf16 %v3238_v13, %v3237_v28  ;;  %v2917_v17 = vmul.f32 0.25, %v2853_v46  ;;  %v3525_v45 = vsub.f32 %v2883_v53, %v3493_v35 }
 0x256   :  { %3938 = vst [vmem:[%s6747_s6 + $0xcc] sm:$0xff] %v4468_v15  ;;  %4050 = vst [vmem:[%s6747_s6 + $0x12c] sm:$0xff] %v4484_v41  ;;  %v3589_v36 = vrot.slane %v3493_v35, 7  ;;  %v3685_v49 = vrot.slane %v3493_v35, 1  ;;  %v6167_v38 = vsub.f32 %v2763_v9, %v6156_v56  ;;  %v2758_v34 = vmax.f32 %v2689_v12, 0.0 }
 0x257   :  { %3363 = vst [vmem:[%s6747_s6 + $0x18] sm:$0xff] %v4437_v31  ;;  %3475 = vst [vmem:[%s6747_s6 + $0x78] sm:$0xff] %v4453_v61  ;;  %v2949_v4 = vsub.f32 %v2853_v46, %v2917_v17  ;;  %v3013_v0 = vrot.slane %v2917_v17, 7  ;;  %v3110_v28 = vrot.slane %v2917_v17, 1  ;;  %v2705_v11 = vadd.f32 %v2704_v3, %v5997_v63 }
 0x258   :  { %v3653_v51 = vsel %vm3071_vm11, %v3493_v35, %v3589_v36  ;;  %v3749_v48 = vsel %vm3168_vm12, %v3685_v49, %v3493_v35  ;;  %v6178_v55 = vmul.f32 0.25, %v2758_v34  ;;  %v2580_v21 = vadd.f32 %v2579_v19, %v5983_v57 }
 0x259   :  { %v3078_v9 = vsel %vm3071_vm11, %v2917_v17, %v3013_v0  ;;  %v3175_v60 = vsel %vm3168_vm12, %v3110_v28, %v2917_v17  ;;  %v3781_v44 = vadd.f32 %v3653_v51, %v3525_v45  ;;  %v3813_v53 = vadd.f32 %v3749_v48, %v3525_v45 }
 0x25a   :  { %v3207_v24 = vadd.f32 %v3078_v9, %v2949_v4  ;;  %v3239_v5 = vadd.f32 %v3175_v60, %v2949_v4  ;;  %v6184_v63 = vsub.f32 %v2758_v34, %v6178_v55  ;;  %v2884_v3 = vadd.f32 %v6121_v8, %v6178_v55 }
 0x25b   :  { %v2764_v20 = vmax.f32 %v2705_v11, 0.0  ;;  %v2693_v13 = vadd.f32 %v6021_v27, %v2580_v21  ;;  %v2707_v19 = vadd.f32 %v2706_v37, %v6000_v10  ;;  %v2582_v46 = vadd.f32 %v2581_v26, %v5985_v52 }
 0x25c   :  { %v2854_v35 = vadd.f32 %v6184_v63, %v6116_v54  ;;  %v3494_v15 = vmul.f32 0.25, %v2884_v3  ;;  %v6194_v41 = vadd.f32 %v2708_v7, %v6003_v39  ;;  %v6197_v12 = vadd.f32 %v2583_v14, %v5983_v57 }
 0x25d   :  { %v6199_v31 = vmul.f32 0.25, %v2764_v20  ;;  %v2759_v8 = vmax.f32 %v2693_v13, 0.0  ;;  %v2765_v61 = vmax.f32 %v2707_v19, 0.0  ;;  %v6202_v27 = vadd.f32 %v6047_v47, %v2582_v46 }
 0x25e   :  { %v2918_v10 = vmul.f32 0.25, %v2854_v35  ;;  %v3526_v17 = vsub.f32 %v2884_v3, %v3494_v15  ;;  %v3590_v45 = vrot.slane %v3494_v15, 7  ;;  %v3686_v37 = vrot.slane %v3494_v15, 1 }
 0x25f   :  { %v6205_v54 = vsub.f32 %v2764_v20, %v6199_v31  ;;  %v6207_v26 = vmul.f32 0.25, %v2759_v8  ;;  %v2797_v39 = vmul.f32 0.25, %v2765_v61  ;;  %v2760_v36 = vmax.f32 %v6202_v27, 0.0 }
 0x260   :  { %v2950_v49 = vsub.f32 %v2854_v35, %v2918_v10  ;;  %v3014_v34 = vrot.slane %v2918_v10, 7  ;;  %v3111_v4 = vrot.slane %v2918_v10, 1  ;;  %v3654_v0 = vsel %vm3071_vm11, %v3494_v15, %v3590_v45 }
 0x261   :  { %v3750_v47 = vsel %vm3168_vm12, %v3686_v37, %v3494_v15  ;;  %v3782_v28 = vadd.f32 %v3654_v0, %v3526_v17  ;;  %v6213_v11 = vsub.f32 %v2759_v8, %v6207_v26  ;;  %v2885_v51 = vadd.f32 %v6149_v6, %v6207_v26 }
 0x262   :  { %v3079_v48 = vsel %vm3071_vm11, %v2918_v10, %v3014_v34  ;;  %v3176_v21 = vsel %vm3168_vm12, %v3111_v4, %v2918_v10  ;;  %v3814_v9 = vadd.f32 %v3750_v47, %v3526_v17  ;;  %v2829_v60 = vsub.f32 %v2765_v61, %v2797_v39 }
 0x263   :  { %v3208_v7 = vadd.f32 %v3079_v48, %v2950_v49  ;;  %v3240_v14 = vadd.f32 %v3176_v21, %v2950_v49  ;;  %v4469_v3 = vpack.c.bf16 %v3782_v28, %v3781_v44  ;;  %v2855_v20 = vadd.f32 %v6213_v11, %v6143_v23 }
 0x264   :  { %v4485_v13 = vpack.c.bf16 %v3814_v9, %v3813_v53  ;;  %v3495_v19 = vmul.f32 0.25, %v2885_v51  ;;  %v2861_v46 = vadd.f32 %v2829_v60, %v6156_v56  ;;  %v2891_v35 = vadd.f32 %v6167_v38, %v2797_v39 }
 0x265   :  { %v4438_v15 = vpack.c.bf16 %v3208_v7, %v3207_v24  ;;  %v4454_v6 = vpack.c.bf16 %v3240_v14, %v3239_v5  ;;  %3939 = vst [vmem:[%s6747_s6 + $0xd8] sm:$0xff] %v4469_v3  ;;  %v2919_v8 = vmul.f32 0.25, %v2855_v20  ;;  %v2893_v61 = vadd.f32 %v2829_v60, %v2797_v39 }
 0x266   :  { %4051 = vst [vmem:[%s6747_s6 + $0x138] sm:$0xff] %v4485_v13  ;;  %v3527_v44 = vsub.f32 %v2885_v51, %v3495_v19  ;;  %v3591_v23 = vrot.slane %v3495_v19, 7  ;;  %v3687_v53 = vrot.slane %v3495_v19, 1  ;;  %v2925_v10 = vmul.f32 0.25, %v2861_v46 }
 0x267   :  { %3364 = vst [vmem:[%s6747_s6 + $0x24] sm:$0xff] %v4438_v15  ;;  %3476 = vst [vmem:[%s6747_s6 + $0x84] sm:$0xff] %v4454_v6  ;;  %v2951_v24 = vsub.f32 %v2855_v20, %v2919_v8  ;;  %v3015_v5 = vrot.slane %v2919_v8, 7  ;;  %v3112_v17 = vrot.slane %v2919_v8, 1  ;;  %v3501_v45 = vmul.f32 0.25, %v2891_v35 }
 0x268   :  { %v3655_v37 = vsel %vm3071_vm11, %v3495_v19, %v3591_v23  ;;  %v3751_v39 = vsel %vm3168_vm12, %v3687_v53, %v3495_v19  ;;  %v2957_v49 = vsub.f32 %v2861_v46, %v2925_v10  ;;  %v3021_v34 = vrot.slane %v2925_v10, 7 }
 0x269   :  { %v3080_v4 = vsel %vm3071_vm11, %v2919_v8, %v3015_v5  ;;  %v3177_v0 = vsel %vm3168_vm12, %v3112_v17, %v2919_v8  ;;  %v6239_v47 = vadd.f32 %v3655_v37, %v3527_v44  ;;  %v6241_v28 = vadd.f32 %v3751_v39, %v3527_v44  ;;  %v2712_v17 = vpop.f32.mrf.mxu1  ;;  %v2585_v37 = vpop.f32.mrf.mxu0 }
 0x26a   :  { %v6243_v51 = vadd.f32 %v3080_v4, %v2951_v24  ;;  %v6245_v48 = vadd.f32 %v3177_v0, %v2951_v24  ;;  %v3086_v21 = vsel %vm3071_vm11, %v2925_v10, %v3021_v34  ;;  %v3118_v9 = vrot.slane %v2925_v10, 1 }
 0x26b   :  { %v6248_v60 = vadd.f32 %v3086_v21, %v2957_v49  ;;  %v3503_v7 = vmul.f32 0.25, %v2893_v61  ;;  %v3533_v14 = vsub.f32 %v2891_v35, %v3501_v45  ;;  %v3597_v3 = vrot.slane %v3501_v45, 7 }
 0x26c   :  { %v3183_v20 = vsel %vm3168_vm12, %v3118_v9, %v2925_v10  ;;  %v3693_v13 = vrot.slane %v3501_v45, 1  ;;  %v6253_v19 = vmul.f32 0.25, %v2760_v36  ;;  %v2766_v46 = vmax.f32 %v6194_v41, 0.0 }
 0x26d   :  { %v6256_v15 = vadd.f32 %v3183_v20, %v2957_v49  ;;  %v3535_v6 = vsub.f32 %v2893_v61, %v3503_v7  ;;  %v3599_v8 = vrot.slane %v3503_v7, 7  ;;  %v3661_v44 = vsel %vm3071_vm11, %v3501_v45, %v3597_v3 }
 0x26e   :  { %v3695_v23 = vrot.slane %v3503_v7, 1  ;;  %v3757_v53 = vsel %vm3168_vm12, %v3693_v13, %v3501_v45  ;;  %v6260_v35 = vadd.f32 %v3661_v44, %v3533_v14  ;;  %v6265_v10 = vsub.f32 %v2760_v36, %v6253_v19 }
 0x26f   :  { %v3663_v24 = vsel %vm3071_vm11, %v3503_v7, %v3599_v8  ;;  %v6268_v5 = vadd.f32 %v3757_v53, %v3533_v14  ;;  %v2886_v41 = vadd.f32 %v6184_v63, %v6253_v19  ;;  %v2798_v61 = vmul.f32 0.25, %v2766_v46 }
 0x270   :  { %v3759_v39 = vsel %vm3168_vm12, %v3695_v23, %v3503_v7  ;;  %v6273_v45 = vadd.f32 %v3663_v24, %v3535_v6  ;;  %v2856_v49 = vadd.f32 %v6265_v10, %v6178_v55  ;;  %v6279_v27 = vadd.f32 %v6072_v1, %v6197_v12 }
 0x271   :  { %v6281_v36 = vadd.f32 %v3759_v39, %v3535_v6  ;;  %v3496_v34 = vmul.f32 0.25, %v2886_v41  ;;  %v2830_v4 = vsub.f32 %v2766_v46, %v2798_v61  ;;  %v2892_v63 = vadd.f32 %v6205_v54, %v2798_v61 }
 0x272   :  { %v2920_v0 = vmul.f32 0.25, %v2856_v49  ;;  %v2761_v21 = vmax.f32 %v6279_v27, 0.0  ;;  %v6286_v9 = vadd.f32 %v2712_v17, %v6006_v18  ;;  %v6289_v7 = vadd.f32 %v2585_v37, %v5985_v52 }
 0x273   :  { %v3528_v55 = vsub.f32 %v2886_v41, %v3496_v34  ;;  %v3592_v14 = vrot.slane %v3496_v34, 7  ;;  %v3688_v3 = vrot.slane %v3496_v34, 1  ;;  %v2862_v1 = vadd.f32 %v2830_v4, %v6199_v31 }
 0x274   :  { %v2952_v12 = vsub.f32 %v2856_v49, %v2920_v0  ;;  %v3016_v20 = vrot.slane %v2920_v0, 7  ;;  %v3113_v13 = vrot.slane %v2920_v0, 1  ;;  %v2894_v46 = vadd.f32 %v2830_v4, %v2798_v61 }
 0x275   :  { %v3656_v6 = vsel %vm3071_vm11, %v3496_v34, %v3592_v14  ;;  %v3752_v8 = vsel %vm3168_vm12, %v3688_v3, %v3496_v34  ;;  %v2926_v44 = vmul.f32 0.25, %v2862_v1  ;;  %v3502_v23 = vmul.f32 0.25, %v2892_v63 }
 0x276   :  { %v3081_v18 = vsel %vm3071_vm11, %v2920_v0, %v3016_v20  ;;  %v3178_v53 = vsel %vm3168_vm12, %v3113_v13, %v2920_v0  ;;  %v3784_v24 = vadd.f32 %v3656_v6, %v3528_v55  ;;  %v3816_v41 = vadd.f32 %v3752_v8, %v3528_v55  ;;  %v2714_v0 = vpop.f32.mrf.mxu1 }
 0x277   :  { %v3210_v17 = vadd.f32 %v3081_v18, %v2952_v12  ;;  %v3242_v37 = vadd.f32 %v3178_v53, %v2952_v12  ;;  %v2958_v39 = vsub.f32 %v2862_v1, %v2926_v44  ;;  %v3022_v27 = vrot.slane %v2926_v44, 7 }
 0x278   :  { %v4470_v49 = vpack.c.bf16 %v3784_v24, %v6239_v47  ;;  %v4486_v61 = vpack.c.bf16 %v3816_v41, %v6241_v28  ;;  %v3119_v4 = vrot.slane %v2926_v44, 1  ;;  %v3504_v14 = vmul.f32 0.25, %v2894_v46  ;;  %v2716_v41 = vpop.f32.mrf.mxu1 }
 0x279   :  { %v4439_v34 = vpack.c.bf16 %v3210_v17, %v6243_v51  ;;  %v4455_v3 = vpack.c.bf16 %v3242_v37, %v6245_v48  ;;  %v3087_v20 = vsel %vm3071_vm11, %v2926_v44, %v3022_v27  ;;  %v3534_v52 = vsub.f32 %v2892_v63, %v3502_v23 }
 0x27a   :  { %3940 = vst [vmem:[%s6747_s6 + $0xe4] sm:$0xff] %v4470_v49  ;;  %4052 = vst [vmem:[%s6747_s6 + $0x144] sm:$0xff] %v4486_v61  ;;  %v3184_v47 = vsel %vm3168_vm12, %v3119_v4, %v2926_v44  ;;  %v3216_v28 = vadd.f32 %v3087_v20, %v2958_v39  ;;  %v3536_v55 = vsub.f32 %v2894_v46, %v3504_v14  ;;  %v3598_v1 = vrot.slane %v3502_v23, 7  ;;  %v2718_v20 = vpop.f32.mrf.mxu1 }
 0x27b   :  { %3365 = vst [vmem:[%s6747_s6 + $0x30] sm:$0xff] %v4439_v34  ;;  %3477 = vst [vmem:[%s6747_s6 + $0x90] sm:$0xff] %v4455_v3  ;;  %v3248_v51 = vadd.f32 %v3184_v47, %v2958_v39  ;;  %v3600_v48 = vrot.slane %v3504_v14, 7  ;;  %v3694_v63 = vrot.slane %v3502_v23, 1  ;;  %v3696_v12 = vrot.slane %v3504_v14, 1 }
 0x27c   :  { %v4442_v13 = vpack.c.bf16 %v3216_v28, %v6248_v60  ;;  %v3662_v6 = vsel %vm3071_vm11, %v3502_v23, %v3598_v1  ;;  %v2793_v8 = vmul.f32 0.25, %v2761_v21  ;;  %v2767_v46 = vmax.f32 %v6286_v9, 0.0 }
 0x27d   :  { %v4458_v44 = vpack.c.bf16 %v3248_v51, %v6256_v15  ;;  %v3664_v18 = vsel %vm3071_vm11, %v3504_v14, %v3600_v48  ;;  %v3758_v53 = vsel %vm3168_vm12, %v3694_v63, %v3502_v23  ;;  %v3760_v24 = vsel %vm3168_vm12, %v3696_v12, %v3504_v14 }
 0x27e   :  { %3368 = vst [vmem:[%s6747_s6 + $0x54] sm:$0xff] %v4442_v13  ;;  %v3790_v17 = vadd.f32 %v3662_v6, %v3534_v52  ;;  %v3792_v60 = vadd.f32 %v3664_v18, %v3536_v55  ;;  %v3822_v37 = vadd.f32 %v3758_v53, %v3534_v52  ;;  %v3824_v39 = vadd.f32 %v3760_v24, %v3536_v55  ;;  %v2722_v13 = vpop.f32.mrf.mxu1 }
 0x27f   :  { %3480 = vst [vmem:[%s6747_s6 + $0xb4] sm:$0xff] %v4458_v44  ;;  %v2825_v15 = vsub.f32 %v2761_v21, %v2793_v8  ;;  %v2859_v9 = vadd.f32 %v6167_v38, %v2793_v8  ;;  %v2887_v23 = vadd.f32 %v6213_v11, %v2793_v8  ;;  %v6329_v27 = vmul.f32 0.25, %v2767_v46 }
 0x280   :  { %v4473_v49 = vpack.c.bf16 %v3790_v17, %v6260_v35  ;;  %v4474_v61 = vpack.c.bf16 %v3792_v60, %v6273_v45  ;;  %v4489_v4 = vpack.c.bf16 %v3822_v37, %v6268_v5  ;;  %v4490_v52 = vpack.c.bf16 %v3824_v39, %v6281_v36  ;;  %v2724_v39 = vpop.f32.mrf.mxu1 }
 0x281   :  { %v2857_v14 = vadd.f32 %v2825_v15, %v6207_v26  ;;  %v2889_v34 = vadd.f32 %v2825_v15, %v6156_v56  ;;  %v2923_v3 = vmul.f32 0.25, %v2859_v9  ;;  %v3497_v21 = vmul.f32 0.25, %v2887_v23 }
 0x282   :  { %3943 = vst [vmem:[%s6747_s6 + $0x108] sm:$0xff] %v4473_v49  ;;  %3944 = vst [vmem:[%s6747_s6 + $0x114] sm:$0xff] %v4474_v61  ;;  %v2831_v56 = vsub.f32 %v2767_v46, %v6329_v27  ;;  %v2699_v38 = vadd.f32 %v6084_v2, %v6289_v7  ;;  %v2715_v26 = vadd.f32 %v2714_v0, %v6010_v50 }
 0x283   :  { %4055 = vst [vmem:[%s6747_s6 + $0x168] sm:$0xff] %v4489_v4  ;;  %4056 = vst [vmem:[%s6747_s6 + $0x174] sm:$0xff] %v4490_v52  ;;  %v2717_v11 = vadd.f32 %v2716_v41, %v6013_v22  ;;  %v2921_v35 = vmul.f32 0.25, %v2857_v14  ;;  %v2955_v5 = vsub.f32 %v2859_v9, %v2923_v3  ;;  %v3019_v45 = vrot.slane %v2923_v3, 7 }
 0x284   :  { %v3116_v36 = vrot.slane %v2923_v3, 1  ;;  %v3499_v47 = vmul.f32 0.25, %v2889_v34  ;;  %v3529_v28 = vsub.f32 %v2887_v23, %v3497_v21  ;;  %v3593_v55 = vrot.slane %v3497_v21, 7 }
 0x285   :  { %v3689_v1 = vrot.slane %v3497_v21, 1  ;;  %v2953_v51 = vsub.f32 %v2857_v14, %v2921_v35  ;;  %v3017_v48 = vrot.slane %v2921_v35, 7  ;;  %v3084_v63 = vsel %vm3071_vm11, %v2923_v3, %v3019_v45 }
 0x286   :  { %v3114_v12 = vrot.slane %v2921_v35, 1  ;;  %v3181_v2 = vsel %vm3168_vm12, %v3116_v36, %v2923_v3  ;;  %v6356_v7 = vadd.f32 %v3084_v63, %v2955_v5  ;;  %v3531_v50 = vsub.f32 %v2889_v34, %v3499_v47 }
 0x287   :  { %v3595_v22 = vrot.slane %v3499_v47, 7  ;;  %v3082_v0 = vsel %vm3071_vm11, %v2921_v35, %v3017_v48  ;;  %v6360_v8 = vadd.f32 %v3181_v2, %v2955_v5  ;;  %v3657_v46 = vsel %vm3071_vm11, %v3497_v21, %v3593_v55 }
 0x288   :  { %v3179_v6 = vsel %vm3168_vm12, %v3114_v12, %v2921_v35  ;;  %v6363_v44 = vadd.f32 %v3082_v0, %v2953_v51  ;;  %v3691_v24 = vrot.slane %v3499_v47, 1  ;;  %v3753_v41 = vsel %vm3168_vm12, %v3689_v1, %v3497_v21 }
 0x289   :  { %v6365_v18 = vadd.f32 %v3179_v6, %v2953_v51  ;;  %v3659_v53 = vsel %vm3071_vm11, %v3499_v47, %v3595_v22  ;;  %v6369_v17 = vadd.f32 %v3657_v46, %v3529_v28  ;;  %v2863_v37 = vadd.f32 %v2831_v56, %v6329_v27 }
 0x28a   :  { %v6371_v60 = vadd.f32 %v3659_v53, %v3531_v50  ;;  %v3755_v15 = vsel %vm3168_vm12, %v3691_v24, %v3499_v47  ;;  %v6375_v9 = vadd.f32 %v3753_v41, %v3529_v28  ;;  %v2762_v23 = vmax.f32 %v2699_v38, 0.0 }
 0x28b   :  { %v2768_v49 = vmax.f32 %v2715_v26, 0.0  ;;  %v6377_v61 = vadd.f32 %v3755_v15, %v3531_v50  ;;  %v2927_v4 = vmul.f32 0.25, %v2863_v37  ;;  %v2769_v52 = vmax.f32 %v2717_v11, 0.0 }
 0x28c   :  { %v6380_v14 = vadd.f32 %v2718_v20, %v6016_v30  ;;  %v2794_v34 = vmul.f32 0.25, %v2762_v23  ;;  %v6385_v21 = vadd.f32 %v2722_v13, %v6019_v25  ;;  %v6388_v35 = vadd.f32 %v2724_v39, %v6025_v32 }
 0x28d   :  { %v6382_v3 = vmul.f32 0.25, %v2768_v49  ;;  %v2959_v5 = vsub.f32 %v2863_v37, %v2927_v4  ;;  %v3023_v45 = vrot.slane %v2927_v4, 7  ;;  %v3120_v38 = vrot.slane %v2927_v4, 1 }
 0x28e   :  { %v6390_v26 = vmul.f32 0.25, %v2769_v52  ;;  %v2826_v36 = vsub.f32 %v2762_v23, %v2794_v34  ;;  %v2860_v11 = vadd.f32 %v6205_v54, %v2794_v34  ;;  %v2888_v30 = vadd.f32 %v6265_v10, %v2794_v34 }
 0x28f   :  { %v6395_v20 = vsub.f32 %v2768_v49, %v6382_v3  ;;  %v3088_v47 = vsel %vm3071_vm11, %v2927_v4, %v3023_v45  ;;  %v3185_v25 = vsel %vm3168_vm12, %v3120_v38, %v2927_v4  ;;  %v2770_v50 = vmax.f32 %v6380_v14, 0.0 }
 0x290   :  { %v6400_v32 = vsub.f32 %v2769_v52, %v6390_v26  ;;  %v6403_v28 = vadd.f32 %v2831_v56, %v6390_v26  ;;  %v6405_v55 = vadd.f32 %v3088_v47, %v2959_v5  ;;  %v6407_v1 = vadd.f32 %v3185_v25, %v2959_v5  ;;  %v2726_v52 = vpop.f32.mrf.mxu1 }
 0x291   :  { %v2858_v54 = vadd.f32 %v2826_v36, %v6253_v19  ;;  %v2890_v10 = vadd.f32 %v2826_v36, %v6199_v31  ;;  %v2924_v51 = vmul.f32 0.25, %v2860_v11  ;;  %v3498_v48 = vmul.f32 0.25, %v2888_v30 }
 0x292   :  { %v2864_v63 = vadd.f32 %v6395_v20, %v6382_v3  ;;  %v2865_v12 = vadd.f32 %v6400_v32, %v6329_v27  ;;  %v6416_v56 = vmul.f32 0.25, %v6403_v28 }
 0x293   :  { %v2922_v13 = vmul.f32 0.25, %v2858_v54  ;;  %v3500_v2 = vmul.f32 0.25, %v2890_v10  ;;  %v2956_v22 = vsub.f32 %v2860_v11, %v2924_v51  ;;  %v3020_v0 = vrot.slane %v2924_v51, 7 }
 0x294   :  { %v3117_v19 = vrot.slane %v2924_v51, 1  ;;  %v3530_v6 = vsub.f32 %v2888_v30, %v3498_v48  ;;  %v3594_v27 = vrot.slane %v3498_v48, 7  ;;  %v3690_v30 = vrot.slane %v3498_v48, 1 }
 0x295   :  { %v2954_v31 = vsub.f32 %v2858_v54, %v2922_v13  ;;  %v3018_v46 = vrot.slane %v2922_v13, 7  ;;  %v3115_v53 = vrot.slane %v2922_v13, 1  ;;  %v3532_v24 = vsub.f32 %v2890_v10, %v3500_v2 }
 0x296   :  { %v3085_v41 = vsel %vm3071_vm11, %v2924_v51, %v3020_v0  ;;  %v3182_v37 = vsel %vm3168_vm12, %v3117_v19, %v2924_v51  ;;  %v3596_v39 = vrot.slane %v3500_v2, 7  ;;  %v3658_v45 = vsel %vm3071_vm11, %v3498_v48, %v3594_v27  ;;  %v2728_v0 = vpop.f32.mrf.mxu1 }
 0x297   :  { %v3083_v15 = vsel %vm3071_vm11, %v2922_v13, %v3018_v46  ;;  %v3180_v23 = vsel %vm3168_vm12, %v3115_v53, %v2922_v13  ;;  %v3214_v49 = vadd.f32 %v3085_v41, %v2956_v22  ;;  %v3246_v4 = vadd.f32 %v3182_v37, %v2956_v22 }
 0x298   :  { %v3212_v34 = vadd.f32 %v3083_v15, %v2954_v31  ;;  %v3244_v5 = vadd.f32 %v3180_v23, %v2954_v31  ;;  %v3660_v38 = vsel %vm3071_vm11, %v3500_v2, %v3596_v39  ;;  %v3692_v47 = vrot.slane %v3500_v2, 1  ;;  %v2732_v27 = vpop.f32.mrf.mxu1 }
 0x299   :  { %v4441_v36 = vpack.c.bf16 %v3214_v49, %v6356_v7  ;;  %v4457_v11 = vpack.c.bf16 %v3246_v4, %v6360_v8  ;;  %v3786_v10 = vadd.f32 %v3658_v45, %v3530_v6  ;;  %v3788_v51 = vadd.f32 %v3660_v38, %v3532_v24 }
 0x29a   :  { %v4440_v25 = vpack.c.bf16 %v3212_v34, %v6363_v44  ;;  %v4456_v54 = vpack.c.bf16 %v3244_v5, %v6365_v18  ;;  %v3754_v7 = vsel %vm3168_vm12, %v3690_v30, %v3498_v48  ;;  %v3756_v8 = vsel %vm3168_vm12, %v3692_v47, %v3500_v2 }
 0x29b   :  { %3367 = vst [vmem:[%s6747_s6 + $0x48] sm:$0xff] %v4441_v36  ;;  %3479 = vst [vmem:[%s6747_s6 + $0xa8] sm:$0xff] %v4457_v11  ;;  %v2928_v13 = vmul.f32 0.25, %v2864_v63  ;;  %v2929_v22 = vmul.f32 0.25, %v2865_v12  ;;  %v3818_v44 = vadd.f32 %v3754_v7, %v3530_v6  ;;  %v3820_v18 = vadd.f32 %v3756_v8, %v3532_v24 }
 0x29c   :  { %3366 = vst [vmem:[%s6747_s6 + $0x3c] sm:$0xff] %v4440_v25  ;;  %3478 = vst [vmem:[%s6747_s6 + $0x9c] sm:$0xff] %v4456_v54  ;;  %v4471_v19 = vpack.c.bf16 %v3786_v10, %v6369_v17  ;;  %v4472_v31 = vpack.c.bf16 %v3788_v51, %v6371_v60  ;;  %v3601_v37 = vrot.slane %v6416_v56, 7  ;;  %v3697_v4 = vrot.slane %v6416_v56, 1  ;;  %v2734_v25 = vpop.f32.mrf.mxu1 }
 0x29d   :  { %v2960_v48 = vsub.f32 %v2864_v63, %v2928_v13  ;;  %v3024_v46 = vrot.slane %v2928_v13, 7  ;;  %v3121_v2 = vrot.slane %v2928_v13, 1  ;;  %v2961_v53 = vsub.f32 %v2865_v12, %v2929_v22 }
 0x29e   :  { %3941 = vst [vmem:[%s6747_s6 + $0xf0] sm:$0xff] %v4471_v19  ;;  %3942 = vst [vmem:[%s6747_s6 + $0xfc] sm:$0xff] %v4472_v31  ;;  %v4487_v41 = vpack.c.bf16 %v3818_v44, %v6375_v9  ;;  %v4488_v6 = vpack.c.bf16 %v3820_v18, %v6377_v61  ;;  %v3025_v24 = vrot.slane %v2929_v22, 7  ;;  %v3122_v17 = vrot.slane %v2929_v22, 1 }
 0x29f   :  { %v3089_v60 = vsel %vm3071_vm11, %v2928_v13, %v3024_v46  ;;  %v3186_v63 = vsel %vm3168_vm12, %v3121_v2, %v2928_v13  ;;  %v3537_v12 = vsub.f32 %v6403_v28, %v6416_v56  ;;  %v3665_v49 = vsel %vm3071_vm11, %v6416_v56, %v3601_v37 }
 0x2a0   :  { %4053 = vst [vmem:[%s6747_s6 + $0x150] sm:$0xff] %v4487_v41  ;;  %4054 = vst [vmem:[%s6747_s6 + $0x15c] sm:$0xff] %v4488_v6  ;;  %v3218_v9 = vadd.f32 %v3089_v60, %v2960_v48  ;;  %v3250_v61 = vadd.f32 %v3186_v63, %v2960_v48  ;;  %v3090_v39 = vsel %vm3071_vm11, %v2929_v22, %v3025_v24  ;;  %v2802_v38 = vmul.f32 0.25, %v2770_v50 }
 0x2a1   :  { %v3187_v15 = vsel %vm3168_vm12, %v3122_v17, %v2929_v22  ;;  %v6466_v23 = vadd.f32 %v3090_v39, %v2961_v53  ;;  %v3793_v45 = vadd.f32 %v3665_v49, %v3537_v12  ;;  %v3761_v36 = vsel %vm3168_vm12, %v3697_v4, %v6416_v56 }
 0x2a2   :  { %v6468_v28 = vadd.f32 %v3187_v15, %v2961_v53  ;;  %v4443_v34 = vpack.c.bf16 %v3218_v9, %v6405_v55  ;;  %v4459_v5 = vpack.c.bf16 %v3250_v61, %v6407_v1  ;;  %v2771_v11 = vmax.f32 %v6385_v21, 0.0 }
 0x2a3   :  { %v2772_v30 = vmax.f32 %v6388_v35, 0.0  ;;  %v6482_v47 = vadd.f32 %v2726_v52, %v6028_v33  ;;  %v3825_v55 = vadd.f32 %v3761_v36, %v3537_v12  ;;  %v2834_v1 = vsub.f32 %v2770_v50, %v2802_v38 }
 0x2a4   :  { %3369 = vst [vmem:[%s6747_s6 + $0x180] sm:$0xff] %v4443_v34  ;;  %3481 = vst [vmem:[%s6747_s6 + $0x1e0] sm:$0xff] %v4459_v5  ;;  %v2896_v21 = vadd.f32 %v6395_v20, %v2802_v38  ;;  %v6494_v35 = vadd.f32 %v2728_v0, %v6031_v16  ;;  %v6496_v33 = vmul.f32 0.25, %v2771_v11  ;;  %v6502_v54 = vadd.f32 %v2732_v27, %v6034_v40 }
 0x2a5   :  { %v6498_v56 = vmul.f32 0.25, %v2772_v30  ;;  %v2773_v52 = vmax.f32 %v6482_v47, 0.0  ;;  %v2866_v10 = vadd.f32 %v2834_v1, %v6382_v3  ;;  %v6507_v50 = vadd.f32 %v2734_v25, %v6039_v59 }
 0x2a6   :  { %v3506_v51 = vmul.f32 0.25, %v2896_v21  ;;  %v2774_v14 = vmax.f32 %v6494_v35, 0.0  ;;  %v6510_v16 = vsub.f32 %v2771_v11, %v6496_v33  ;;  %v2897_v20 = vadd.f32 %v6400_v32, %v6496_v33 }
 0x2a7   :  { %v6515_v7 = vsub.f32 %v2772_v30, %v6498_v56  ;;  %v2898_v40 = vadd.f32 %v2834_v1, %v6498_v56  ;;  %v2930_v8 = vmul.f32 0.25, %v2866_v10 }
 0x2a8   :  { %v3538_v13 = vsub.f32 %v2896_v21, %v3506_v51  ;;  %v3602_v3 = vrot.slane %v3506_v51, 7  ;;  %v3698_v22 = vrot.slane %v3506_v51, 1  ;;  %v2867_v0 = vadd.f32 %v6510_v16, %v6390_v26 }
 0x2a9   :  { %v3507_v59 = vmul.f32 0.25, %v2897_v20  ;;  %v2868_v44 = vadd.f32 %v6515_v7, %v2802_v38  ;;  %v3508_v18 = vmul.f32 0.25, %v2898_v40  ;;  %v2962_v19 = vsub.f32 %v2866_v10, %v2930_v8 }
 0x2aa   :  { %v3026_v31 = vrot.slane %v2930_v8, 7  ;;  %v3123_v48 = vrot.slane %v2930_v8, 1  ;;  %v3666_v32 = vsel %vm3071_vm11, %v3506_v51, %v3602_v3  ;;  %v3762_v46 = vsel %vm3168_vm12, %v3698_v22, %v3506_v51 }
 0x2ab   :  { %v3794_v2 = vadd.f32 %v3666_v32, %v3538_v13  ;;  %v2931_v53 = vmul.f32 0.25, %v2867_v0  ;;  %v3539_v41 = vsub.f32 %v2897_v20, %v3507_v59  ;;  %v3826_v17 = vadd.f32 %v3762_v46, %v3538_v13 }
 0x2ac   :  { %v3091_v6 = vsel %vm3071_vm11, %v2930_v8, %v3026_v31  ;;  %v3188_v24 = vsel %vm3168_vm12, %v3123_v48, %v2930_v8  ;;  %v3603_v26 = vrot.slane %v3507_v59, 7  ;;  %v3699_v4 = vrot.slane %v3507_v59, 1 }
 0x2ad   :  { %v3220_v60 = vadd.f32 %v3091_v6, %v2962_v19  ;;  %v3252_v63 = vadd.f32 %v3188_v24, %v2962_v19  ;;  %v4475_v12 = vpack.c.bf16 %v3794_v2, %v3793_v45  ;;  %v2963_v37 = vsub.f32 %v2867_v0, %v2931_v53  ;;  %v2736_v2 = vpop.f32.mrf.mxu1 }
 0x2ae   :  { %v4491_v27 = vpack.c.bf16 %v3826_v17, %v3825_v55  ;;  %v3027_v9 = vrot.slane %v2931_v53, 7  ;;  %v3124_v61 = vrot.slane %v2931_v53, 1  ;;  %v3667_v39 = vsel %vm3071_vm11, %v3507_v59, %v3603_v26 }
 0x2af   :  { %v4444_v15 = vpack.c.bf16 %v3220_v60, %v6466_v23  ;;  %v4460_v49 = vpack.c.bf16 %v3252_v63, %v6468_v28  ;;  %3945 = vst [vmem:[%s6747_s6 + $0x240] sm:$0xff] %v4475_v12  ;;  %v3795_v34 = vadd.f32 %v3667_v39, %v3539_v41  ;;  %v2932_v38 = vmul.f32 0.25, %v2868_v44 }
 0x2b0   :  { %4057 = vst [vmem:[%s6747_s6 + $0x2a0] sm:$0xff] %v4491_v27  ;;  %v3092_v5 = vsel %vm3071_vm11, %v2931_v53, %v3027_v9  ;;  %v3189_v45 = vsel %vm3168_vm12, %v3124_v61, %v2931_v53  ;;  %v3540_v36 = vsub.f32 %v2898_v40, %v3508_v18  ;;  %v3763_v11 = vsel %vm3168_vm12, %v3699_v4, %v3507_v59 }
 0x2b1   :  { %3370 = vst [vmem:[%s6747_s6 + $0x18c] sm:$0xff] %v4444_v15  ;;  %3482 = vst [vmem:[%s6747_s6 + $0x1ec] sm:$0xff] %v4460_v49  ;;  %v3221_v23 = vadd.f32 %v3092_v5, %v2963_v37  ;;  %v3253_v28 = vadd.f32 %v3189_v45, %v2963_v37  ;;  %v3604_v30 = vrot.slane %v3508_v18, 7  ;;  %v3827_v25 = vadd.f32 %v3763_v11, %v3539_v41 }
 0x2b2   :  { %v2964_v55 = vsub.f32 %v2868_v44, %v2932_v38  ;;  %v3028_v1 = vrot.slane %v2932_v38, 7  ;;  %v3125_v21 = vrot.slane %v2932_v38, 1  ;;  %v3700_v51 = vrot.slane %v3508_v18, 1 }
 0x2b3   :  { %v3668_v10 = vsel %vm3071_vm11, %v3508_v18, %v3604_v30  ;;  %v6546_v20 = vmul.f32 0.25, %v2773_v52  ;;  %v6550_v40 = vmul.f32 0.25, %v2774_v14  ;;  %v2775_v22 = vmax.f32 %v6502_v54, 0.0 }
 0x2b4   :  { %v3093_v8 = vsel %vm3071_vm11, %v2932_v38, %v3028_v1  ;;  %v3190_v13 = vsel %vm3168_vm12, %v3125_v21, %v2932_v38  ;;  %v3796_v3 = vadd.f32 %v3668_v10, %v3540_v36  ;;  %v3764_v44 = vsel %vm3168_vm12, %v3700_v51, %v3508_v18 }
 0x2b5   :  { %v3222_v0 = vadd.f32 %v3093_v8, %v2964_v55  ;;  %v3254_v59 = vadd.f32 %v3190_v13, %v2964_v55  ;;  %v2837_v19 = vsub.f32 %v2773_v52, %v6546_v20  ;;  %v3828_v31 = vadd.f32 %v3764_v44, %v3540_v36 }
 0x2b6   :  { %v4476_v48 = vpack.c.bf16 %v3796_v3, %v3795_v34  ;;  %v2899_v32 = vadd.f32 %v6510_v16, %v6546_v20  ;;  %v2838_v46 = vsub.f32 %v2774_v14, %v6550_v40  ;;  %v2900_v18 = vadd.f32 %v6515_v7, %v6550_v40 }
 0x2b7   :  { %v4445_v53 = vpack.c.bf16 %v3222_v0, %v3221_v23  ;;  %v4461_v54 = vpack.c.bf16 %v3254_v59, %v3253_v28  ;;  %v2869_v41 = vadd.f32 %v2837_v19, %v6496_v33  ;;  %v4492_v47 = vpack.c.bf16 %v3828_v31, %v3827_v25  ;;  %v2738_v59 = vpop.f32.mrf.mxu1 }
 0x2b8   :  { %3946 = vst [vmem:[%s6747_s6 + $0x24c] sm:$0xff] %v4476_v48  ;;  %v3509_v52 = vmul.f32 0.25, %v2899_v32  ;;  %v2870_v16 = vadd.f32 %v2838_v46, %v6498_v56  ;;  %v6571_v6 = vmul.f32 0.25, %v2775_v22  ;;  %v3510_v33 = vmul.f32 0.25, %v2900_v18 }
 0x2b9   :  { %3371 = vst [vmem:[%s6747_s6 + $0x198] sm:$0xff] %v4445_v53  ;;  %3483 = vst [vmem:[%s6747_s6 + $0x1f8] sm:$0xff] %v4461_v54  ;;  %v2933_v35 = vmul.f32 0.25, %v2869_v41  ;;  %v2776_v14 = vmax.f32 %v6507_v50, 0.0  ;;  %v2737_v7 = vadd.f32 %v2736_v2, %v6042_v42 }
 0x2ba   :  { %4058 = vst [vmem:[%s6747_s6 + $0x2ac] sm:$0xff] %v4492_v47  ;;  %v3541_v56 = vsub.f32 %v2899_v32, %v3509_v52  ;;  %v3605_v24 = vrot.slane %v3509_v52, 7  ;;  %v3701_v17 = vrot.slane %v3509_v52, 1  ;;  %v2934_v26 = vmul.f32 0.25, %v2870_v16 }
 0x2bb   :  { %v2965_v60 = vsub.f32 %v2869_v41, %v2933_v35  ;;  %v3029_v63 = vrot.slane %v2933_v35, 7  ;;  %v3126_v12 = vrot.slane %v2933_v35, 1  ;;  %v3542_v37 = vsub.f32 %v2900_v18, %v3510_v33 }
 0x2bc   :  { %v3669_v27 = vsel %vm3071_vm11, %v3509_v52, %v3605_v24  ;;  %v3765_v9 = vsel %vm3168_vm12, %v3701_v17, %v3509_v52  ;;  %v2966_v61 = vsub.f32 %v2870_v16, %v2934_v26  ;;  %v3030_v50 = vrot.slane %v2934_v26, 7 }
 0x2bd   :  { %v3094_v42 = vsel %vm3071_vm11, %v2933_v35, %v3029_v63  ;;  %v3191_v39 = vsel %vm3168_vm12, %v3126_v12, %v2933_v35  ;;  %v3797_v15 = vadd.f32 %v3669_v27, %v3541_v56  ;;  %v3829_v49 = vadd.f32 %v3765_v9, %v3541_v56  ;;  %v2742_v35 = vpop.f32.mrf.mxu1 }
 0x2be   :  { %v3223_v4 = vadd.f32 %v3094_v42, %v2965_v60  ;;  %v3255_v34 = vadd.f32 %v3191_v39, %v2965_v60  ;;  %v3095_v5 = vsel %vm3071_vm11, %v2934_v26, %v3030_v50  ;;  %v3127_v45 = vrot.slane %v2934_v26, 1 }
 0x2bf   :  { %v3224_v38 = vadd.f32 %v3095_v5, %v2966_v61  ;;  %v3606_v36 = vrot.slane %v3510_v33, 7  ;;  %v3702_v23 = vrot.slane %v3510_v33, 1  ;;  %v2839_v28 = vsub.f32 %v2775_v22, %v6571_v6  ;;  %v2744_v42 = vpop.f32.mrf.mxu1 }
 0x2c0   :  { %v3192_v11 = vsel %vm3168_vm12, %v3127_v45, %v2934_v26  ;;  %v2901_v30 = vadd.f32 %v2837_v19, %v6571_v6  ;;  %v6592_v25 = vmul.f32 0.25, %v2776_v14  ;;  %v2777_v55 = vmax.f32 %v2737_v7, 0.0 }
 0x2c1   :  { %v3256_v1 = vadd.f32 %v3192_v11, %v2966_v61  ;;  %v4446_v21 = vpack.c.bf16 %v3224_v38, %v3223_v4  ;;  %v3670_v10 = vsel %vm3071_vm11, %v3510_v33, %v3606_v36  ;;  %v3766_v51 = vsel %vm3168_vm12, %v3702_v23, %v3510_v33 }
 0x2c2   :  { %v3798_v8 = vadd.f32 %v3670_v10, %v3542_v37  ;;  %v3830_v13 = vadd.f32 %v3766_v51, %v3542_v37  ;;  %v2871_v3 = vadd.f32 %v2839_v28, %v6546_v20  ;;  %v3511_v0 = vmul.f32 0.25, %v2901_v30 }
 0x2c3   :  { %3372 = vst [vmem:[%s6747_s6 + $0x1a4] sm:$0xff] %v4446_v21  ;;  %v4462_v22 = vpack.c.bf16 %v3256_v1, %v3255_v34  ;;  %v6601_v44 = vsub.f32 %v2776_v14, %v6592_v25  ;;  %v2902_v19 = vadd.f32 %v2838_v46, %v6592_v25  ;;  %v6604_v31 = vmul.f32 0.25, %v2777_v55 }
 0x2c4   :  { %v4477_v48 = vpack.c.bf16 %v3798_v8, %v3797_v15  ;;  %v4493_v32 = vpack.c.bf16 %v3830_v13, %v3829_v49  ;;  %v2935_v2 = vmul.f32 0.25, %v2871_v3  ;;  %v3543_v53 = vsub.f32 %v2901_v30, %v3511_v0 }
 0x2c5   :  { %3484 = vst [vmem:[%s6747_s6 + $0x204] sm:$0xff] %v4462_v22  ;;  %v3607_v20 = vrot.slane %v3511_v0, 7  ;;  %v3703_v54 = vrot.slane %v3511_v0, 1  ;;  %v2872_v41 = vadd.f32 %v6601_v44, %v6550_v40  ;;  %v3512_v18 = vmul.f32 0.25, %v2902_v19 }
 0x2c6   :  { %3947 = vst [vmem:[%s6747_s6 + $0x258] sm:$0xff] %v4477_v48  ;;  %4059 = vst [vmem:[%s6747_s6 + $0x2b8] sm:$0xff] %v4493_v32  ;;  %v2967_v46 = vsub.f32 %v2871_v3, %v2935_v2  ;;  %v3031_v47 = vrot.slane %v2935_v2, 7  ;;  %v3128_v52 = vrot.slane %v2935_v2, 1  ;;  %v6618_v16 = vsub.f32 %v2777_v55, %v6604_v31  ;;  %v6759_v48 = vld [vmem:[#allocation3_spill] sm:$0xff] }
 0x2c7   :  { %v3671_v33 = vsel %vm3071_vm11, %v3511_v0, %v3607_v20  ;;  %v3767_v40 = vsel %vm3168_vm12, %v3703_v54, %v3511_v0  ;;  %v2936_v14 = vmul.f32 0.25, %v2872_v41  ;;  %v3544_v7 = vsub.f32 %v2902_v19, %v3512_v18  ;;  %v6758_v19 = vld [vmem:[#allocation4_spill] sm:$0xff] }
 0x2c8   :  { %v3096_v56 = vsel %vm3071_vm11, %v2935_v2, %v3031_v47  ;;  %v3193_v24 = vsel %vm3168_vm12, %v3128_v52, %v2935_v2  ;;  %v3799_v17 = vadd.f32 %v3671_v33, %v3543_v53  ;;  %v3831_v26 = vadd.f32 %v3767_v40, %v3543_v53 }
 0x2c9   :  { %v3225_v60 = vadd.f32 %v3096_v56, %v2967_v46  ;;  %v3257_v63 = vadd.f32 %v3193_v24, %v2967_v46  ;;  %v2968_v12 = vsub.f32 %v2872_v41, %v2936_v14  ;;  %v3032_v37 = vrot.slane %v2936_v14, 7 }
 0x2ca   :  { %v3129_v27 = vrot.slane %v2936_v14, 1  ;;  %v3608_v9 = vrot.slane %v3512_v18, 7  ;;  %v3704_v61 = vrot.slane %v3512_v18, 1  ;;  %v2873_v50 = vadd.f32 %v6618_v16, %v6571_v6 }
 0x2cb   :  { %v3097_v39 = vsel %vm3071_vm11, %v2936_v14, %v3032_v37  ;;  %v2903_v15 = vadd.f32 %v2839_v28, %v6604_v31  ;;  %v2739_v49 = vadd.f32 %v2738_v59, %v6045_v43  ;;  %v2743_v4 = vadd.f32 %v2742_v35, %v6055_v58  ;;  %v2746_v28 = vpop.f32.mrf.mxu1 }
 0x2cc   :  { %v3194_v34 = vsel %vm3168_vm12, %v3129_v27, %v2936_v14  ;;  %v3226_v5 = vadd.f32 %v3097_v39, %v2968_v12  ;;  %v3672_v45 = vsel %vm3071_vm11, %v3512_v18, %v3608_v9  ;;  %v3768_v38 = vsel %vm3168_vm12, %v3704_v61, %v3512_v18 }
 0x2cd   :  { %v3258_v36 = vadd.f32 %v3194_v34, %v2968_v12  ;;  %v3800_v23 = vadd.f32 %v3672_v45, %v3544_v7  ;;  %v3832_v11 = vadd.f32 %v3768_v38, %v3544_v7  ;;  %v2937_v6 = vmul.f32 0.25, %v2873_v50  ;;  %v2748_v20 = vpop.f32.mrf.mxu1 }
 0x2ce   :  { %v4447_v30 = vpack.c.bf16 %v3226_v5, %v3225_v60  ;;  %v3513_v55 = vmul.f32 0.25, %v2903_v15  ;;  %v2778_v1 = vmax.f32 %v2739_v49, 0.0  ;;  %v2779_v21 = vmax.f32 %v2743_v4, 0.0 }
 0x2cf   :  { %v4463_v10 = vpack.c.bf16 %v3258_v36, %v3257_v63  ;;  %v4478_v43 = vpack.c.bf16 %v3800_v23, %v3799_v17  ;;  %v4494_v51 = vpack.c.bf16 %v3832_v11, %v3831_v26  ;;  %v2969_v58 = vsub.f32 %v2873_v50, %v2937_v6 }
 0x2d0   :  { %v2634_v8 = vadd.f32 %v5976_v62, %v5983_v57  ;;  %3373 = vst [vmem:[%s6747_s6 + $0x1b0] sm:$0xff] %v4447_v30  ;;  %v3033_v13 = vrot.slane %v2937_v6, 7  ;;  %v3130_v3 = vrot.slane %v2937_v6, 1  ;;  %v3609_v0 = vrot.slane %v3513_v55, 7 }
 0x2d1   :  { %3485 = vst [vmem:[%s6747_s6 + $0x210] sm:$0xff] %v4463_v10  ;;  %3948 = vst [vmem:[%s6747_s6 + $0x264] sm:$0xff] %v4478_v43  ;;  %v3705_v62 = vrot.slane %v3513_v55, 1  ;;  %v6647_v57 = vmul.f32 0.25, %v2778_v1  ;;  %v6649_v59 = vmul.f32 0.25, %v2779_v21  ;;  %v2745_v22 = vadd.f32 %v2744_v42, %v6059_v29 }
 0x2d2   :  { %4060 = vst [vmem:[%s6747_s6 + $0x2c4] sm:$0xff] %v4494_v51  ;;  %v2636_v32 = vadd.f32 %v6759_v48, %v6758_v19  ;;  %v3098_v2 = vsel %vm3071_vm11, %v2937_v6, %v3033_v13  ;;  %v2747_v53 = vadd.f32 %v2746_v28, %v2634_v8  ;;  %v3195_v54 = vsel %vm3168_vm12, %v3130_v3, %v2937_v6 }
 0x2d3   :  { %v3227_v41 = vadd.f32 %v3098_v2, %v2969_v58  ;;  %v3545_v18 = vsub.f32 %v2903_v15, %v3513_v55  ;;  %v3673_v46 = vsel %vm3071_vm11, %v3513_v55, %v3609_v0  ;;  %v3769_v47 = vsel %vm3168_vm12, %v3705_v62, %v3513_v55 }
 0x2d4   :  { %v2842_v52 = vsub.f32 %v2778_v1, %v6647_v57  ;;  %v2904_v29 = vadd.f32 %v6601_v44, %v6647_v57  ;;  %v2843_v35 = vsub.f32 %v2779_v21, %v6649_v59  ;;  %v2905_v33 = vadd.f32 %v6618_v16, %v6649_v59 }
 0x2d5   :  { %v2780_v40 = vmax.f32 %v2745_v22, 0.0  ;;  %v2781_v14 = vmax.f32 %v2747_v53, 0.0  ;;  %v6664_v7 = vadd.f32 %v2748_v20, %v2636_v32  ;;  %v3259_v56 = vadd.f32 %v3195_v54, %v2969_v58 }
 0x2d6   :  { %v2874_v24 = vadd.f32 %v2842_v52, %v6592_v25  ;;  %v3514_v17 = vmul.f32 0.25, %v2904_v29  ;;  %v2875_v26 = vadd.f32 %v2843_v35, %v6604_v31  ;;  %v3801_v60 = vadd.f32 %v3673_v46, %v3545_v18 }
 0x2d7   :  { %v3833_v63 = vadd.f32 %v3769_v47, %v3545_v18  ;;  %v3515_v12 = vmul.f32 0.25, %v2905_v33  ;;  %v6668_v37 = vmul.f32 0.25, %v2780_v40  ;;  %v2813_v42 = vmul.f32 0.25, %v2781_v14 }
 0x2d8   :  { %v2938_v44 = vmul.f32 0.25, %v2874_v24  ;;  %v3546_v27 = vsub.f32 %v2904_v29, %v3514_v17  ;;  %v3610_v9 = vrot.slane %v3514_v17, 7  ;;  %v3706_v61 = vrot.slane %v3514_v17, 1 }
 0x2d9   :  { %v2939_v16 = vmul.f32 0.25, %v2875_v26  ;;  %v3611_v50 = vrot.slane %v3515_v12, 7  ;;  %v2782_v39 = vmax.f32 %v6664_v7, 0.0  ;;  %v3707_v45 = vrot.slane %v3515_v12, 1 }
 0x2da   :  { %v2970_v15 = vsub.f32 %v2874_v24, %v2938_v44  ;;  %v3034_v49 = vrot.slane %v2938_v44, 7  ;;  %v3131_v25 = vrot.slane %v2938_v44, 1  ;;  %v3674_v4 = vsel %vm3071_vm11, %v3514_v17, %v3610_v9 }
 0x2db   :  { %v3770_v31 = vsel %vm3168_vm12, %v3706_v61, %v3514_v17  ;;  %v3802_v34 = vadd.f32 %v3674_v4, %v3546_v27  ;;  %v3035_v5 = vrot.slane %v2939_v16, 7  ;;  %v3132_v11 = vrot.slane %v2939_v16, 1 }
 0x2dc   :  { %v3099_v38 = vsel %vm3071_vm11, %v2938_v44, %v3034_v49  ;;  %v3196_v36 = vsel %vm3168_vm12, %v3131_v25, %v2938_v44  ;;  %v3834_v23 = vadd.f32 %v3770_v31, %v3546_v27  ;;  %v2971_v1 = vsub.f32 %v2875_v26, %v2939_v16 }
 0x2dd   :  { %v3228_v6 = vadd.f32 %v3099_v38, %v2970_v15  ;;  %v3260_v30 = vadd.f32 %v3196_v36, %v2970_v15  ;;  %v4479_v55 = vpack.c.bf16 %v3802_v34, %v3801_v60  ;;  %v3100_v28 = vsel %vm3071_vm11, %v2939_v16, %v3035_v5 }
 0x2de   :  { %v4495_v21 = vpack.c.bf16 %v3834_v23, %v3833_v63  ;;  %v3547_v10 = vsub.f32 %v2905_v33, %v3515_v12  ;;  %v3197_v58 = vsel %vm3168_vm12, %v3132_v11, %v2939_v16  ;;  %v3675_v8 = vsel %vm3071_vm11, %v3515_v12, %v3611_v50 }
 0x2df   :  { %v4448_v43 = vpack.c.bf16 %v3228_v6, %v3227_v41  ;;  %v4464_v51 = vpack.c.bf16 %v3260_v30, %v3259_v56  ;;  %3949 = vst [vmem:[%s6747_s6 + $0x270] sm:$0xff] %v4479_v55  ;;  %v3771_v13 = vsel %vm3168_vm12, %v3707_v45, %v3515_v12  ;;  %v2844_v3 = vsub.f32 %v2780_v40, %v6668_v37 }
 0x2e0   :  { %4061 = vst [vmem:[%s6747_s6 + $0x2d0] sm:$0xff] %v4495_v21  ;;  %v2906_v0 = vadd.f32 %v2842_v52, %v6668_v37  ;;  %v3229_v62 = vadd.f32 %v3100_v28, %v2971_v1  ;;  %v2845_v22 = vsub.f32 %v2781_v14, %v2813_v42  ;;  %v2907_v19 = vadd.f32 %v2843_v35, %v2813_v42 }
 0x2e1   :  { %3374 = vst [vmem:[%s6747_s6 + $0x1bc] sm:$0xff] %v4448_v43  ;;  %3486 = vst [vmem:[%s6747_s6 + $0x21c] sm:$0xff] %v4464_v51  ;;  %v2814_v48 = vmul.f32 0.25, %v2782_v39  ;;  %v3261_v32 = vadd.f32 %v3197_v58, %v2971_v1  ;;  %v3803_v2 = vadd.f32 %v3675_v8, %v3547_v10  ;;  %v2876_v53 = vadd.f32 %v2844_v3, %v6647_v57 }
 0x2e2   :  { %v3516_v20 = vmul.f32 0.25, %v2906_v0  ;;  %v3835_v54 = vadd.f32 %v3771_v13, %v3547_v10  ;;  %v2877_v41 = vadd.f32 %v2845_v22, %v6649_v59  ;;  %v2909_v18 = vadd.f32 %v2845_v22, %v2813_v42 }
 0x2e3   :  { %v3517_v46 = vmul.f32 0.25, %v2907_v19  ;;  %v2940_v47 = vmul.f32 0.25, %v2876_v53  ;;  %v2846_v14 = vsub.f32 %v2782_v39, %v2814_v48  ;;  %v2908_v30 = vadd.f32 %v2844_v3, %v2814_v48 }
 0x2e4   :  { %v3548_v52 = vsub.f32 %v2906_v0, %v3516_v20  ;;  %v3612_v29 = vrot.slane %v3516_v20, 7  ;;  %v3708_v33 = vrot.slane %v3516_v20, 1  ;;  %v2941_v40 = vmul.f32 0.25, %v2877_v41 }
 0x2e5   :  { %v3519_v7 = vmul.f32 0.25, %v2909_v18  ;;  %v3613_v56 = vrot.slane %v3517_v46, 7  ;;  %v2972_v35 = vsub.f32 %v2876_v53, %v2940_v47  ;;  %v3036_v24 = vrot.slane %v2940_v47, 7 }
 0x2e6   :  { %v3133_v17 = vrot.slane %v2940_v47, 1  ;;  %v3676_v26 = vsel %vm3071_vm11, %v3516_v20, %v3612_v29  ;;  %v3772_v57 = vsel %vm3168_vm12, %v3708_v33, %v3516_v20  ;;  %v2973_v63 = vsub.f32 %v2877_v41, %v2941_v40 }
 0x2e7   :  { %v3804_v60 = vadd.f32 %v3676_v26, %v3548_v52  ;;  %v3037_v59 = vrot.slane %v2941_v40, 7  ;;  %v3101_v12 = vsel %vm3071_vm11, %v2940_v47, %v3036_v24  ;;  %v3836_v27 = vadd.f32 %v3772_v57, %v3548_v52 }
 0x2e8   :  { %v3198_v44 = vsel %vm3168_vm12, %v3133_v17, %v2940_v47  ;;  %v3134_v9 = vrot.slane %v2941_v40, 1  ;;  %v3230_v61 = vadd.f32 %v3101_v12, %v2972_v35  ;;  %v3549_v25 = vsub.f32 %v2907_v19, %v3517_v46 }
 0x2e9   :  { %v3262_v16 = vadd.f32 %v3198_v44, %v2972_v35  ;;  %v4480_v50 = vpack.c.bf16 %v3804_v60, %v3803_v2  ;;  %v3102_v42 = vsel %vm3071_vm11, %v2941_v40, %v3037_v59  ;;  %v4496_v39 = vpack.c.bf16 %v3836_v27, %v3835_v54 }
 0x2ea   :  { %v3199_v15 = vsel %vm3168_vm12, %v3134_v9, %v2941_v40  ;;  %v3231_v49 = vadd.f32 %v3102_v42, %v2973_v63  ;;  %v4449_v4 = vpack.c.bf16 %v3230_v61, %v3229_v62  ;;  %v3551_v34 = vsub.f32 %v2909_v18, %v3519_v7 }
 0x2eb   :  { %v4465_v31 = vpack.c.bf16 %v3262_v16, %v3261_v32  ;;  %3950 = vst [vmem:[%s6747_s6 + $0x27c] sm:$0xff] %v4480_v50  ;;  %v3615_v5 = vrot.slane %v3519_v7, 7  ;;  %4062 = vst [vmem:[%s6747_s6 + $0x2dc] sm:$0xff] %v4496_v39  ;;  %v3677_v45 = vsel %vm3071_vm11, %v3517_v46, %v3613_v56  ;;  %v3709_v38 = vrot.slane %v3517_v46, 1 }
 0x2ec   :  { %v3711_v36 = vrot.slane %v3519_v7, 1  ;;  %v2878_v23 = vadd.f32 %v2846_v14, %v6668_v37  ;;  %3375 = vst [vmem:[%s6747_s6 + $0x1c8] sm:$0xff] %v4449_v4  ;;  %v3263_v11 = vadd.f32 %v3199_v15, %v2973_v63  ;;  %v2910_v55 = vadd.f32 %v2846_v14, %v2814_v48 }
 0x2ed   :  { %3487 = vst [vmem:[%s6747_s6 + $0x228] sm:$0xff] %v4465_v31  ;;  %v3679_v6 = vsel %vm3071_vm11, %v3519_v7, %v3615_v5  ;;  %v3773_v1 = vsel %vm3168_vm12, %v3709_v38, %v3517_v46  ;;  %v3805_v28 = vadd.f32 %v3677_v45, %v3549_v25  ;;  %v3518_v51 = vmul.f32 0.25, %v2908_v30 }
 0x2ee   :  { %v3775_v21 = vsel %vm3168_vm12, %v3711_v36, %v3519_v7  ;;  %v2942_v10 = vmul.f32 0.25, %v2878_v23  ;;  %v3807_v37 = vadd.f32 %v3679_v6, %v3551_v34  ;;  %v3837_v43 = vadd.f32 %v3773_v1, %v3549_v25 }
 0x2ef   :  { %v3520_v58 = vmul.f32 0.25, %v2910_v55  ;;  %v3839_v8 = vadd.f32 %v3775_v21, %v3551_v34  ;;  %v3550_v22 = vsub.f32 %v2908_v30, %v3518_v51  ;;  %v3614_v32 = vrot.slane %v3518_v51, 7 }
 0x2f0   :  { %v2974_v13 = vsub.f32 %v2878_v23, %v2942_v10  ;;  %v3038_v0 = vrot.slane %v2942_v10, 7  ;;  %v3135_v62 = vrot.slane %v2942_v10, 1  ;;  %v3710_v53 = vrot.slane %v3518_v51, 1 }
 0x2f1   :  { %v3552_v19 = vsub.f32 %v2910_v55, %v3520_v58  ;;  %v3616_v2 = vrot.slane %v3520_v58, 7  ;;  %v3712_v20 = vrot.slane %v3520_v58, 1  ;;  %v3678_v18 = vsel %vm3071_vm11, %v3518_v51, %v3614_v32 }
 0x2f2   :  { %v3103_v3 = vsel %vm3071_vm11, %v2942_v10, %v3038_v0  ;;  %v3200_v48 = vsel %vm3168_vm12, %v3135_v62, %v2942_v10  ;;  %v3774_v47 = vsel %vm3168_vm12, %v3710_v53, %v3518_v51  ;;  %v3806_v29 = vadd.f32 %v3678_v18, %v3550_v22 }
 0x2f3   :  { %v3232_v54 = vadd.f32 %v3103_v3, %v2974_v13  ;;  %v3264_v41 = vadd.f32 %v3200_v48, %v2974_v13  ;;  %v3680_v46 = vsel %vm3071_vm11, %v3520_v58, %v3616_v2  ;;  %v3776_v52 = vsel %vm3168_vm12, %v3712_v20, %v3520_v58 }
 0x2f4   :  { %v3808_v33 = vadd.f32 %v3680_v46, %v3552_v19  ;;  %v3838_v56 = vadd.f32 %v3774_v47, %v3550_v22  ;;  %v3840_v14 = vadd.f32 %v3776_v52, %v3552_v19  ;;  %v4481_v35 = vpack.c.bf16 %v3806_v29, %v3805_v28 }
 0x2f5   :  { %v4450_v40 = vpack.c.bf16 %v3232_v54, %v3231_v49  ;;  %v4466_v7 = vpack.c.bf16 %v3264_v41, %v3263_v11 }
 0x2f6   :  { %v4482_v24 = vpack.c.bf16 %v3808_v33, %v3807_v37  ;;  %v4497_v17 = vpack.c.bf16 %v3838_v56, %v3837_v43  ;;  %v4498_v26 = vpack.c.bf16 %v3840_v14, %v3839_v8  ;;  %3951 = vst [vmem:[%s6747_s6 + $0x288] sm:$0xff] %v4481_v35 }
 0x2f7   :  { %3376 = vst [vmem:[%s6747_s6 + $0x1d4] sm:$0xff] %v4450_v40  ;;  %3488 = vst [vmem:[%s6747_s6 + $0x234] sm:$0xff] %v4466_v7 }
 0x2f8   :  { %3952 = vst [vmem:[%s6747_s6 + $0x294] sm:$0xff] %v4482_v24  ;;  %4063 = vst [vmem:[%s6747_s6 + $0x2e8] sm:$0xff] %v4497_v17 }
 0x2f9   :  { %4064 = vst [vmem:[%s6747_s6 + $0x2f4] sm:$0xff] %v4498_v26 }

</bundles_post_ra>
